<compile_context>
chip_gen: v5e
topology: v5e:2x2
jax: 0.10.0
libtpu: 0.0.40
codegen_flags: <defaults>
</compile_context>

<pallas_src>
import jax
import jax.numpy as jnp
from jax import lax
from jax.experimental import pallas as pl
from jax.experimental.pallas import tpu as pltpu

_LANE = 128   # TPU vreg lane width
_SUB = 8      # TPU vreg sublane width (f32)


def _round_up(n, m):
    return (n + m - 1) // m * m


def _pad_axis(a, axis, target):
    pad = target - a.shape[axis]
    if pad == 0:
        return a
    widths = [(0, 0)] * a.ndim
    widths[axis] = (0, pad)
    return jnp.pad(a, widths)


# ----------------------------------------------------------------------------
# One-time parameter preparation (pad to lane multiples, cast to compute dtype,
# decide layer-0 K-tiling).  Call this ONCE; reuse the result for every forward.
# ----------------------------------------------------------------------------
def prepare_mlp_params(params, *, compute_dtype=jnp.bfloat16,
                       w0_block_bytes=16 << 20):
    """params: list of (W, b); W is (d_in, d_out) (transpose of torch weight)."""
    n_layers = len(params)
    d_in = params[0][0].shape[0]
    dims = [d_in] + [w.shape[1] for (w, _) in params]
    dims_pad = [_round_up(d, _LANE) for d in dims]

    itemsize = jnp.dtype(compute_dtype).itemsize
    # K-tile layer 0 if its (padded) weight exceeds the per-block VMEM budget.
    w0_bytes = dims_pad[0] * dims_pad[1] * itemsize
    num_k = max(1, -(-w0_bytes // w0_block_bytes))
    k_block = _round_up(-(-dims_pad[0] // num_k), _LANE)
    dims_pad[0] = k_block * num_k

    weights, biases = [], []
    for li, (w, b) in enumerate(params):
        wp = _pad_axis(_pad_axis(w.astype(compute_dtype), 0, dims_pad[li]),
                       1, dims_pad[li + 1])
        bp = _pad_axis(b.astype(jnp.float32), 0, dims_pad[li + 1]).reshape(1, -1)
        weights.append(wp)
        biases.append(bp)

    return dict(weights=weights, biases=biases, dims=dims, dims_pad=dims_pad,
                k_block=k_block, num_k=num_k, n_layers=n_layers,
                num_classes=dims[-1], compute_dtype=jnp.dtype(compute_dtype))


# ----------------------------------------------------------------------------
# Fused kernel: (optional in-kernel token mean, f32) -> layer-0 matmul with
# optional K accumulation -> remaining layers (matmul + bias [+ ReLU]).
# refs = (w0, b0, w1, b1, ..., o_ref, acc_ref)
# ----------------------------------------------------------------------------
def _make_mlp_kernel(n_layers, reduce_mean):
    def kernel(x_ref, *refs):
        o_ref, acc_ref = refs[-2], refs[-1]
        k = pl.program_id(1)

        h = x_ref[...]
        if reduce_mean:                       # preprocess == 'mean' (f32 mean)
            h = jnp.mean(h.astype(jnp.float32), axis=1)

        w0 = refs[0][...]
        contrib = jnp.dot(h.astype(w0.dtype), w0,
                          preferred_element_type=jnp.float32)

        @pl.when(k == 0)
        def _():
            acc_ref[...] = jnp.zeros_like(acc_ref)

        acc_ref[...] += contrib

        @pl.when(k == pl.num_programs(1) - 1)
        def _():
            hh = acc_ref[...] + refs[1][...]          # layer-0 bias (f32)
            if n_layers > 1:
                hh = jnp.maximum(hh, 0.0)             # ReLU; Dropout = identity
            for li in range(1, n_layers):
                w = refs[2 * li][...]
                b = refs[2 * li + 1][...]
                hh = jnp.dot(hh.astype(w.dtype), w,
                             preferred_element_type=jnp.float32) + b
                if li < n_layers - 1:
                    hh = jnp.maximum(hh, 0.0)
            o_ref[...] = hh.astype(o_ref.dtype)
    return kernel


def _const_spec(shape, mode):
    idx = lambda i, k: (0,) * len(shape)
    if mode is None:
        return pl.BlockSpec(shape, idx)
    return pl.BlockSpec(shape, idx, pipeline_mode=mode)


# ----------------------------------------------------------------------------
# Forward wrapper
# ----------------------------------------------------------------------------
def mlp_classifier_forward(x, prepared, *, preprocess="flatten", block_rows=256):
    """x: (B, token_num, emb_dim) float32; returns (B, num_classes) float32."""
    weights, biases = prepared["weights"], prepared["biases"]
    dims, dims_pad = prepared["dims"], prepared["dims_pad"]
    k_block, num_k = prepared["k_block"], prepared["num_k"]
    n_layers, num_classes = prepared["n_layers"], prepared["num_classes"]
    cdt = prepared["compute_dtype"]

    B = x.shape[0]
    T = x.shape[1]

    if preprocess == "flatten":
        x_in = x.reshape(B, -1)               # zero-cost view of contiguous HBM
        if x_in.shape[1] != dims[0]:
            raise ValueError("flatten input dim mismatch")
        x_in = _pad_axis(x_in, 1, dims_pad[0])
    elif preprocess == "mean":
        if x.shape[-1] != dims[0]:
            raise ValueError("mean input dim mismatch")
        x_in = _pad_axis(x, 2, dims_pad[0])   # token mean is fused in-kernel (f32)
    else:
        raise ValueError(f"Unsupported preprocess type: {preprocess}")

    # ---- row (batch) tiling --------------------------------------------------
    sub = _SUB * max(1, 4 // cdt.itemsize)    # 8 (f32) / 16 (bf16) / 32 (fp8,int8)
    n_row_tiles = max(1, -(-B // block_rows))
    if B >= 2 * sub:
        n_row_tiles = max(n_row_tiles, 2)     # feed both v7x TensorCores
    tb = _round_up(-(-B // n_row_tiles), sub)
    if preprocess == "mean":
        # keep the double-buffered (tb, T, E_pad) activation tile modest so the
        # weights stay VMEM-resident (v7x: 64 MiB per TC).
        while tb > sub and 2 * tb * T * dims_pad[0] * x_in.dtype.itemsize > (8 << 20):
            tb = _round_up(max(tb // 2, sub), sub)
    b_pad = _round_up(B, tb)
    grid_rows = b_pad // tb
    if b_pad != B:
        x_in = _pad_axis(x_in, 0, b_pad)

    if preprocess == "flatten":
        x_spec = pl.BlockSpec((tb, k_block), lambda i, k: (i, k))
        x_tile_bytes = tb * k_block * x_in.dtype.itemsize
    else:
        x_spec = pl.BlockSpec((tb, T, k_block), lambda i, k: (i, 0, k))
        x_tile_bytes = tb * T * k_block * x_in.dtype.itemsize

    wb_inputs = []
    for li in range(n_layers):
        wb_inputs += [weights[li], biases[li]]

    kernel = _make_mlp_kernel(n_layers, preprocess == "mean")

    # ---- cost estimate + VMEM budget ----------------------------------------
    flops = 2 * B * sum(dims[i] * dims[i + 1] for i in range(n_layers))
    bytes_accessed = (x.size * x.dtype.itemsize
                      + sum(w.size * w.dtype.itemsize for w in weights)
                      + sum(b.size * 4 for b in biases)
                      + B * num_classes * 4)
    cost = pl.CostEstimate(flops=int(flops), transcendentals=0,
                           bytes_accessed=int(bytes_accessed))

    weight_bytes = (sum(w.size * w.dtype.itemsize for w in weights)
                    + sum(b.size * 4 for b in biases))
    out_tile_bytes = tb * dims_pad[-1] * 4
    acc_bytes = tb * dims_pad[1] * 4
    vmem_est = 2 * weight_bytes + 2 * x_tile_bytes + 2 * out_tile_bytes + acc_bytes
    vmem_limit = None
    if vmem_est > (16 << 20):
        # TODO(synk): clamp per-generation (v7x has only 64 MiB VMEM per TC).
        vmem_limit = min(int(vmem_est * 1.25) + (1 << 20), 100 << 20)

    def run(weight_mode):
        wb_specs = []
        for li in range(n_layers):
            if li == 0 and num_k > 1:
                # layer-0 weight streams along the K grid axis
                wb_specs.append(pl.BlockSpec((k_block, dims_pad[1]),
                                             lambda i, k: (k, 0)))
            else:
                wb_specs.append(_const_spec(weights[li].shape, weight_mode))
            wb_specs.append(_const_spec(biases[li].shape, weight_mode))

        return pl.pallas_call(
            kernel,
            out_shape=jax.ShapeDtypeStruct((b_pad, dims_pad[-1]), jnp.float32),
            grid=(grid_rows, num_k),
            in_specs=[x_spec] + wb_specs,
            out_specs=pl.BlockSpec((tb, dims_pad[-1]), lambda i, k: (i, 0)),
            scratch_shapes=[pltpu.VMEM((tb, dims_pad[1]), jnp.float32)],
            compiler_params=pltpu.CompilerParams(
                dimension_semantics=("parallel", "arbitrary"),
                vmem_limit_bytes=vmem_limit),
            cost_estimate=cost,
        )(x_in, *wb_inputs)

    try:
        # Single-buffer the constant-index weights/biases (halves their VMEM).
        out = run(pl.Buffered(1))
    except Exception:
        # Fallback if this jax build rejects pipeline_mode on the outer grid.
        out = run(None)

    return out[:B, :num_classes]


# ----------------------------------------------------------------------------
# Pure-JAX reference (true f32 math, for correctness check)
# ----------------------------------------------------------------------------
def mlp_classifier_reference(x, params, *, preprocess="flatten"):
    if preprocess == "flatten":
        h = x.reshape(x.shape[0], -1)
    else:
        h = jnp.mean(x, axis=1)
    n = len(params)
    for li, (w, b) in enumerate(params):
        h = jnp.dot(h, w, preferred_element_type=jnp.float32,
                    precision=lax.Precision.HIGHEST) + b
        if li < n - 1:
            h = jax.nn.relu(h)          # Dropout is identity in eval mode
    return h


# ----------------------------------------------------------------------------
# main
# ----------------------------------------------------------------------------
if __name__ == "__main__":
    T, E = 8, 160                       # token_num, emb_dim
    hidden_dims = [256, 128]
    num_classes = 10

    key = jax.random.PRNGKey(0)

    def make_params(key, in_dim):
        dims = [in_dim] + hidden_dims + [num_classes]
        params = []
        for i in range(len(dims) - 1):
            key, kw, kb = jax.random.split(key, 3)
            w = jax.random.normal(kw, (dims[i], dims[i + 1]), jnp.float32) * 0.05
            b = jax.random.normal(kb, (dims[i + 1],), jnp.float32) * 0.5
            params.append((w, b))
        return key, params

    cases = [
        # (preprocess, batch, w0_block_bytes)
        ("flatten", 2, 16 << 20),       # single K block, single row tile
        ("mean",    2, 16 << 20),       # fused in-kernel f32 token mean
        ("flatten", 40, 128 * 1024),    # forces layer-0 K-tiling + 2 row tiles
    ]

    for preprocess, B, w0_block_bytes in cases:
        in_dim = T * E if preprocess == "flatten" else E
        key, params = make_params(key, in_dim)
        key, kx = jax.random.split(key)
        x = jax.random.normal(kx, (B, T, E), dtype=jnp.float32)

        prepared = prepare_mlp_params(params, compute_dtype=jnp.bfloat16,
                                      w0_block_bytes=w0_block_bytes)

        out = jax.block_until_ready(
            mlp_classifier_forward(x, prepared, preprocess=preprocess))
        ref = jax.block_until_ready(
            mlp_classifier_reference(x, params, preprocess=preprocess))

        assert out.shape == (B, num_classes), out.shape
        max_err = float(jnp.max(jnp.abs(out - ref)))
        # bf16 operands / f32 accumulation vs. true-f32 reference
        assert jnp.allclose(out, ref, rtol=5e-2, atol=5e-2), (
            f"{preprocess} B={B}: max abs err {max_err}")

    print("KERNEL_OK")
</pallas_src>

<mosaic_0001>
module attributes {stable_mosaic.version = 11 : i64} {
  func.func @kernel(%arg0: i32, %arg1: i32, %arg2: memref<16x1280xf32, #tpu.memory_space<vmem>>, %arg3: memref<1280x256xbf16, #tpu.memory_space<vmem>>, %arg4: memref<1x256xf32, #tpu.memory_space<vmem>>, %arg5: memref<256x128xbf16, #tpu.memory_space<vmem>>, %arg6: memref<1x128xf32, #tpu.memory_space<vmem>>, %arg7: memref<128x128xbf16, #tpu.memory_space<vmem>>, %arg8: memref<1x128xf32, #tpu.memory_space<vmem>>, %arg9: memref<16x128xf32, #tpu.memory_space<vmem>>, %arg10: memref<16x256xf32, #tpu.memory_space<vmem>>) attributes {dimension_semantics = [#tpu.dimension_semantics<parallel>, #tpu.dimension_semantics<arbitrary>], iteration_bounds = array<i64: 1, 1>, scalar_prefetch = 0 : i64, scratch_operands = 1 : i64, tpu.core_type = #tpu.core_type<tc>, window_params = [{transform_indices = @transform_0, window_bounds = array<i64: 16, 1280>}, {pipeline_mode = #tpu.pipeline_mode<synchronous>, transform_indices = @transform_1, window_bounds = array<i64: 1280, 256>}, {pipeline_mode = #tpu.pipeline_mode<synchronous>, transform_indices = @transform_2, window_bounds = array<i64: 1, 256>}, {pipeline_mode = #tpu.pipeline_mode<synchronous>, transform_indices = @transform_3, window_bounds = array<i64: 256, 128>}, {pipeline_mode = #tpu.pipeline_mode<synchronous>, transform_indices = @transform_4, window_bounds = array<i64: 1, 128>}, {pipeline_mode = #tpu.pipeline_mode<synchronous>, transform_indices = @transform_5, window_bounds = array<i64: 128, 128>}, {pipeline_mode = #tpu.pipeline_mode<synchronous>, transform_indices = @transform_6, window_bounds = array<i64: 1, 128>}, {transform_indices = @transform_7, window_bounds = array<i64: 16, 128>}]} {
    %c0 = arith.constant 0 : index
    %c0_0 = arith.constant 0 : index
    %0 = vector.load %arg2[%c0, %c0_0] : memref<16x1280xf32, #tpu.memory_space<vmem>>, vector<16x1280xf32>
    %c0_1 = arith.constant 0 : index
    %c0_2 = arith.constant 0 : index
    %1 = vector.load %arg3[%c0_1, %c0_2] : memref<1280x256xbf16, #tpu.memory_space<vmem>>, vector<1280x256xbf16>
    %2 = arith.truncf %0 : vector<16x1280xf32> to vector<16x1280xbf16>
    %cst = arith.constant dense<0.000000e+00> : vector<16x256xf32>
    %3 = tpu.matmul %2, %1, %cst {dimension_numbers = #tpu.dot_dimension_numbers<[1], [0], [0], [1], [0, 0, 1, 1], [], []>} : vector<16x1280xbf16>, vector<1280x256xbf16>, vector<16x256xf32> -> vector<16x256xf32>
    %c0_i32 = arith.constant 0 : i32
    %4 = arith.cmpi eq, %arg1, %c0_i32 : i32
    %5 = arith.extui %4 : i1 to i32
    %c0_i32_3 = arith.constant 0 : i32
    %6 = arith.cmpi ne, %5, %c0_i32_3 : i32
    scf.if %6 {
      %cst_10 = arith.constant 0.000000e+00 : f32
      %13 = vector.broadcast %cst_10 : f32 to vector<16x256xf32>
      %c0_11 = arith.constant 0 : index
      %c0_12 = arith.constant 0 : index
      %14 = vector.load %arg10[%c0_11, %c0_12] : memref<16x256xf32, #tpu.memory_space<vmem>>, vector<16x256xf32>
      tpu.vector_store %arg10[%c0_11, %c0_12], %13 {strides = array<i32>} : memref<16x256xf32, #tpu.memory_space<vmem>>, vector<16x256xf32>,
    } else {
    }
    %c0_4 = arith.constant 0 : index
    %c0_5 = arith.constant 0 : index
    %7 = vector.load %arg10[%c0_4, %c0_5] : memref<16x256xf32, #tpu.memory_space<vmem>>, vector<16x256xf32>
    %8 = arith.addf %7, %3 : vector<16x256xf32>
    %c0_6 = arith.constant 0 : index
    %c0_7 = arith.constant 0 : index
    %9 = vector.load %arg10[%c0_6, %c0_7] : memref<16x256xf32, #tpu.memory_space<vmem>>, vector<16x256xf32>
    tpu.vector_store %arg10[%c0_6, %c0_7], %8 {strides = array<i32>} : memref<16x256xf32, #tpu.memory_space<vmem>>, vector<16x256xf32>,
    %c0_i32_8 = arith.constant 0 : i32
    %10 = arith.cmpi eq, %arg1, %c0_i32_8 : i32
    %11 = arith.extui %10 : i1 to i32
    %c0_i32_9 = arith.constant 0 : i32
    %12 = arith.cmpi ne, %11, %c0_i32_9 : i32
    scf.if %12 {
      %c0_10 = arith.constant 0 : index
      %c0_11 = arith.constant 0 : index
      %13 = vector.load %arg10[%c0_10, %c0_11] : memref<16x256xf32, #tpu.memory_space<vmem>>, vector<16x256xf32>
      %c0_12 = arith.constant 0 : index
      %c0_13 = arith.constant 0 : index
      %14 = vector.load %arg4[%c0_12, %c0_13] : memref<1x256xf32, #tpu.memory_space<vmem>>, vector<1x256xf32>
      %15 = vector.broadcast %14 : vector<1x256xf32> to vector<16x256xf32>
      %16 = arith.addf %13, %15 : vector<16x256xf32>
      %cst_14 = arith.constant 0.000000e+00 : f32
      %17 = vector.broadcast %cst_14 : f32 to vector<16x256xf32>
      %18 = arith.maximumf %16, %17 : vector<16x256xf32>
      %c0_15 = arith.constant 0 : index
      %c0_16 = arith.constant 0 : index
      %19 = vector.load %arg5[%c0_15, %c0_16] : memref<256x128xbf16, #tpu.memory_space<vmem>>, vector<256x128xbf16>
      %c0_17 = arith.constant 0 : index
      %c0_18 = arith.constant 0 : index
      %20 = vector.load %arg6[%c0_17, %c0_18] : memref<1x128xf32, #tpu.memory_space<vmem>>, vector<1x128xf32>
      %21 = arith.truncf %18 : vector<16x256xf32> to vector<16x256xbf16>
      %cst_19 = arith.constant dense<0.000000e+00> : vector<16x128xf32>
      %22 = tpu.matmul %21, %19, %cst_19 {dimension_numbers = #tpu.dot_dimension_numbers<[1], [0], [0], [1], [0, 0, 1, 1], [], []>} : vector<16x256xbf16>, vector<256x128xbf16>, vector<16x128xf32> -> vector<16x128xf32>
      %23 = vector.broadcast %20 : vector<1x128xf32> to vector<16x128xf32>
      %24 = arith.addf %22, %23 : vector<16x128xf32>
      %cst_20 = arith.constant 0.000000e+00 : f32
      %25 = vector.broadcast %cst_20 : f32 to vector<16x128xf32>
      %26 = arith.maximumf %24, %25 : vector<16x128xf32>
      %c0_21 = arith.constant 0 : index
      %c0_22 = arith.constant 0 : index
      %27 = vector.load %arg7[%c0_21, %c0_22] : memref<128x128xbf16, #tpu.memory_space<vmem>>, vector<128x128xbf16>
      %c0_23 = arith.constant 0 : index
      %c0_24 = arith.constant 0 : index
      %28 = vector.load %arg8[%c0_23, %c0_24] : memref<1x128xf32, #tpu.memory_space<vmem>>, vector<1x128xf32>
      %29 = arith.truncf %26 : vector<16x128xf32> to vector<16x128xbf16>
      %cst_25 = arith.constant dense<0.000000e+00> : vector<16x128xf32>
      %30 = tpu.matmul %29, %27, %cst_25 {dimension_numbers = #tpu.dot_dimension_numbers<[1], [0], [0], [1], [0, 0, 1, 1], [], []>} : vector<16x128xbf16>, vector<128x128xbf16>, vector<16x128xf32> -> vector<16x128xf32>
      %31 = vector.broadcast %28 : vector<1x128xf32> to vector<16x128xf32>
      %32 = arith.addf %30, %31 : vector<16x128xf32>
      %c0_26 = arith.constant 0 : index
      %c0_27 = arith.constant 0 : index
      %33 = vector.load %arg9[%c0_26, %c0_27] : memref<16x128xf32, #tpu.memory_space<vmem>>, vector<16x128xf32>
      tpu.vector_store %arg9[%c0_26, %c0_27], %32 {strides = array<i32>} : memref<16x128xf32, #tpu.memory_space<vmem>>, vector<16x128xf32>,
    } else {
    }
    return
  }
  func.func @transform_0(%arg0: i32, %arg1: i32) -> (i32, i32) {
    %c0_i32 = arith.constant 0 : i32
    return %arg0, %arg1 : i32, i32
  }
  func.func @transform_1(%arg0: i32, %arg1: i32) -> (i32, i32) {
    %c0_i32 = arith.constant 0 : i32
    %c0_i32_0 = arith.constant 0 : i32
    %c0_i32_1 = arith.constant 0 : i32
    return %c0_i32, %c0_i32_0 : i32, i32
  }
  func.func @transform_2(%arg0: i32, %arg1: i32) -> (i32, i32) {
    %c0_i32 = arith.constant 0 : i32
    %c0_i32_0 = arith.constant 0 : i32
    %c0_i32_1 = arith.constant 0 : i32
    return %c0_i32, %c0_i32_0 : i32, i32
  }
  func.func @transform_3(%arg0: i32, %arg1: i32) -> (i32, i32) {
    %c0_i32 = arith.constant 0 : i32
    %c0_i32_0 = arith.constant 0 : i32
    %c0_i32_1 = arith.constant 0 : i32
    return %c0_i32, %c0_i32_0 : i32, i32
  }
  func.func @transform_4(%arg0: i32, %arg1: i32) -> (i32, i32) {
    %c0_i32 = arith.constant 0 : i32
    %c0_i32_0 = arith.constant 0 : i32
    %c0_i32_1 = arith.constant 0 : i32
    return %c0_i32, %c0_i32_0 : i32, i32
  }
  func.func @transform_5(%arg0: i32, %arg1: i32) -> (i32, i32) {
    %c0_i32 = arith.constant 0 : i32
    %c0_i32_0 = arith.constant 0 : i32
    %c0_i32_1 = arith.constant 0 : i32
    return %c0_i32, %c0_i32_0 : i32, i32
  }
  func.func @transform_6(%arg0: i32, %arg1: i32) -> (i32, i32) {
    %c0_i32 = arith.constant 0 : i32
    %c0_i32_0 = arith.constant 0 : i32
    %c0_i32_1 = arith.constant 0 : i32
    return %c0_i32, %c0_i32_0 : i32, i32
  }
  func.func @transform_7(%arg0: i32, %arg1: i32) -> (i32, i32) {
    %c0_i32 = arith.constant 0 : i32
    %c0_i32_0 = arith.constant 0 : i32
    return %arg0, %c0_i32 : i32, i32
  }
}

module attributes {stable_mosaic.version = 11 : i64} {
  func.func @kernel(%arg0: i32, %arg1: i32, %arg2: memref<16x1280xf32, #tpu.memory_space<vmem>>, %arg3: memref<1280x256xbf16, #tpu.memory_space<vmem>>, %arg4: memref<1x256xf32, #tpu.memory_space<vmem>>, %arg5: memref<256x128xbf16, #tpu.memory_space<vmem>>, %arg6: memref<1x128xf32, #tpu.memory_space<vmem>>, %arg7: memref<128x128xbf16, #tpu.memory_space<vmem>>, %arg8: memref<1x128xf32, #tpu.memory_space<vmem>>, %arg9: memref<16x128xf32, #tpu.memory_space<vmem>>, %arg10: memref<16x256xf32, #tpu.memory_space<vmem>>) attributes {dimension_semantics = [#tpu.dimension_semantics<parallel>, #tpu.dimension_semantics<arbitrary>], iteration_bounds = array<i64: 1, 1>, scalar_prefetch = 0 : i64, scratch_operands = 1 : i64, tpu.core_type = #tpu.core_type<tc>, window_params = [{transform_indices = @transform_0, window_bounds = array<i64: 16, 1280>}, {pipeline_mode = #tpu.pipeline_mode<synchronous>, transform_indices = @transform_1, window_bounds = array<i64: 1280, 256>}, {pipeline_mode = #tpu.pipeline_mode<synchronous>, transform_indices = @transform_2, window_bounds = array<i64: 1, 256>}, {pipeline_mode = #tpu.pipeline_mode<synchronous>, transform_indices = @transform_3, window_bounds = array<i64: 256, 128>}, {pipeline_mode = #tpu.pipeline_mode<synchronous>, transform_indices = @transform_4, window_bounds = array<i64: 1, 128>}, {pipeline_mode = #tpu.pipeline_mode<synchronous>, transform_indices = @transform_5, window_bounds = array<i64: 128, 128>}, {pipeline_mode = #tpu.pipeline_mode<synchronous>, transform_indices = @transform_6, window_bounds = array<i64: 1, 128>}, {transform_indices = @transform_7, window_bounds = array<i64: 16, 128>}]} {
    %c0 = arith.constant 0 : index
    %c0_0 = arith.constant 0 : index
    %0 = vector.load %arg2[%c0, %c0_0] : memref<16x1280xf32, #tpu.memory_space<vmem>>, vector<16x1280xf32>
    %c0_1 = arith.constant 0 : index
    %c0_2 = arith.constant 0 : index
    %1 = vector.load %arg3[%c0_1, %c0_2] : memref<1280x256xbf16, #tpu.memory_space<vmem>>, vector<1280x256xbf16>
    %2 = arith.truncf %0 : vector<16x1280xf32> to vector<16x1280xbf16>
    %cst = arith.constant dense<0.000000e+00> : vector<16x256xf32>
    %3 = tpu.matmul %2, %1, %cst {dimension_numbers = #tpu.dot_dimension_numbers<[1], [0], [0], [1], [0, 0, 1, 1], [], []>} : vector<16x1280xbf16>, vector<1280x256xbf16>, vector<16x256xf32> -> vector<16x256xf32>
    %c0_i32 = arith.constant 0 : i32
    %4 = arith.cmpi eq, %arg1, %c0_i32 : i32
    %5 = arith.extui %4 : i1 to i32
    %c0_i32_3 = arith.constant 0 : i32
    %6 = arith.cmpi ne, %5, %c0_i32_3 : i32
    scf.if %6 {
      %cst_10 = arith.constant 0.000000e+00 : f32
      %13 = vector.broadcast %cst_10 : f32 to vector<16x256xf32>
      %c0_11 = arith.constant 0 : index
      %c0_12 = arith.constant 0 : index
      %14 = vector.load %arg10[%c0_11, %c0_12] : memref<16x256xf32, #tpu.memory_space<vmem>>, vector<16x256xf32>
      tpu.vector_store %arg10[%c0_11, %c0_12], %13 {strides = array<i32>} : memref<16x256xf32, #tpu.memory_space<vmem>>, vector<16x256xf32>,
    } else {
    }
    %c0_4 = arith.constant 0 : index
    %c0_5 = arith.constant 0 : index
    %7 = vector.load %arg10[%c0_4, %c0_5] : memref<16x256xf32, #tpu.memory_space<vmem>>, vector<16x256xf32>
    %8 = arith.addf %7, %3 : vector<16x256xf32>
    %c0_6 = arith.constant 0 : index
    %c0_7 = arith.constant 0 : index
    %9 = vector.load %arg10[%c0_6, %c0_7] : memref<16x256xf32, #tpu.memory_space<vmem>>, vector<16x256xf32>
    tpu.vector_store %arg10[%c0_6, %c0_7], %8 {strides = array<i32>} : memref<16x256xf32, #tpu.memory_space<vmem>>, vector<16x256xf32>,
    %c0_i32_8 = arith.constant 0 : i32
    %10 = arith.cmpi eq, %arg1, %c0_i32_8 : i32
    %11 = arith.extui %10 : i1 to i32
    %c0_i32_9 = arith.constant 0 : i32
    %12 = arith.cmpi ne, %11, %c0_i32_9 : i32
    scf.if %12 {
      %c0_10 = arith.constant 0 : index
      %c0_11 = arith.constant 0 : index
      %13 = vector.load %arg10[%c0_10, %c0_11] : memref<16x256xf32, #tpu.memory_space<vmem>>, vector<16x256xf32>
      %c0_12 = arith.constant 0 : index
      %c0_13 = arith.constant 0 : index
      %14 = vector.load %arg4[%c0_12, %c0_13] : memref<1x256xf32, #tpu.memory_space<vmem>>, vector<1x256xf32>
      %15 = vector.broadcast %14 : vector<1x256xf32> to vector<16x256xf32>
      %16 = arith.addf %13, %15 : vector<16x256xf32>
      %cst_14 = arith.constant 0.000000e+00 : f32
      %17 = vector.broadcast %cst_14 : f32 to vector<16x256xf32>
      %18 = arith.maximumf %16, %17 : vector<16x256xf32>
      %c0_15 = arith.constant 0 : index
      %c0_16 = arith.constant 0 : index
      %19 = vector.load %arg5[%c0_15, %c0_16] : memref<256x128xbf16, #tpu.memory_space<vmem>>, vector<256x128xbf16>
      %c0_17 = arith.constant 0 : index
      %c0_18 = arith.constant 0 : index
      %20 = vector.load %arg6[%c0_17, %c0_18] : memref<1x128xf32, #tpu.memory_space<vmem>>, vector<1x128xf32>
      %21 = arith.truncf %18 : vector<16x256xf32> to vector<16x256xbf16>
      %cst_19 = arith.constant dense<0.000000e+00> : vector<16x128xf32>
      %22 = tpu.matmul %21, %19, %cst_19 {dimension_numbers = #tpu.dot_dimension_numbers<[1], [0], [0], [1], [0, 0, 1, 1], [], []>} : vector<16x256xbf16>, vector<256x128xbf16>, vector<16x128xf32> -> vector<16x128xf32>
      %23 = vector.broadcast %20 : vector<1x128xf32> to vector<16x128xf32>
      %24 = arith.addf %22, %23 : vector<16x128xf32>
      %cst_20 = arith.constant 0.000000e+00 : f32
      %25 = vector.broadcast %cst_20 : f32 to vector<16x128xf32>
      %26 = arith.maximumf %24, %25 : vector<16x128xf32>
      %c0_21 = arith.constant 0 : index
      %c0_22 = arith.constant 0 : index
      %27 = vector.load %arg7[%c0_21, %c0_22] : memref<128x128xbf16, #tpu.memory_space<vmem>>, vector<128x128xbf16>
      %c0_23 = arith.constant 0 : index
      %c0_24 = arith.constant 0 : index
      %28 = vector.load %arg8[%c0_23, %c0_24] : memref<1x128xf32, #tpu.memory_space<vmem>>, vector<1x128xf32>
      %29 = arith.truncf %26 : vector<16x128xf32> to vector<16x128xbf16>
      %cst_25 = arith.constant dense<0.000000e+00> : vector<16x128xf32>
      %30 = tpu.matmul %29, %27, %cst_25 {dimension_numbers = #tpu.dot_dimension_numbers<[1], [0], [0], [1], [0, 0, 1, 1], [], []>} : vector<16x128xbf16>, vector<128x128xbf16>, vector<16x128xf32> -> vector<16x128xf32>
      %31 = vector.broadcast %28 : vector<1x128xf32> to vector<16x128xf32>
      %32 = arith.addf %30, %31 : vector<16x128xf32>
      %c0_26 = arith.constant 0 : index
      %c0_27 = arith.constant 0 : index
      %33 = vector.load %arg9[%c0_26, %c0_27] : memref<16x128xf32, #tpu.memory_space<vmem>>, vector<16x128xf32>
      tpu.vector_store %arg9[%c0_26, %c0_27], %32 {strides = array<i32>} : memref<16x128xf32, #tpu.memory_space<vmem>>, vector<16x128xf32>,
    } else {
    }
    return
  }
  func.func @transform_0(%arg0: i32, %arg1: i32) -> (i32, i32) {
    %c0_i32 = arith.constant 0 : i32
    return %arg0, %arg1 : i32, i32
  }
  func.func @transform_1(%arg0: i32, %arg1: i32) -> (i32, i32) {
    %c0_i32 = arith.constant 0 : i32
    %c0_i32_0 = arith.constant 0 : i32
    %c0_i32_1 = arith.constant 0 : i32
    return %c0_i32, %c0_i32_0 : i32, i32
  }
  func.func @transform_2(%arg0: i32, %arg1: i32) -> (i32, i32) {
    %c0_i32 = arith.constant 0 : i32
    %c0_i32_0 = arith.constant 0 : i32
    %c0_i32_1 = arith.constant 0 : i32
    return %c0_i32, %c0_i32_0 : i32, i32
  }
  func.func @transform_3(%arg0: i32, %arg1: i32) -> (i32, i32) {
    %c0_i32 = arith.constant 0 : i32
    %c0_i32_0 = arith.constant 0 : i32
    %c0_i32_1 = arith.constant 0 : i32
    return %c0_i32, %c0_i32_0 : i32, i32
  }
  func.func @transform_4(%arg0: i32, %arg1: i32) -> (i32, i32) {
    %c0_i32 = arith.constant 0 : i32
    %c0_i32_0 = arith.constant 0 : i32
    %c0_i32_1 = arith.constant 0 : i32
    return %c0_i32, %c0_i32_0 : i32, i32
  }
  func.func @transform_5(%arg0: i32, %arg1: i32) -> (i32, i32) {
    %c0_i32 = arith.constant 0 : i32
    %c0_i32_0 = arith.constant 0 : i32
    %c0_i32_1 = arith.constant 0 : i32
    return %c0_i32, %c0_i32_0 : i32, i32
  }
  func.func @transform_6(%arg0: i32, %arg1: i32) -> (i32, i32) {
    %c0_i32 = arith.constant 0 : i32
    %c0_i32_0 = arith.constant 0 : i32
    %c0_i32_1 = arith.constant 0 : i32
    return %c0_i32, %c0_i32_0 : i32, i32
  }
  func.func @transform_7(%arg0: i32, %arg1: i32) -> (i32, i32) {
    %c0_i32 = arith.constant 0 : i32
    %c0_i32_0 = arith.constant 0 : i32
    return %arg0, %c0_i32 : i32, i32
  }
}

</mosaic_0001>

<bundles_post_ra>
// kernel: tpu_custom_call.1
= control target key start
LH: loop header
LB: loop body
LE: loop exit
PB: predicated region body
PF: predicated region fallthrough
CT: control target
= control target key end

     0   :  { %12 = vsyncpa [#allocation4], 0  ;;  %s2896_s0 = inlined_call_operand.hbm [shape: f32[16,1280], index: 0, kind: input, shape index: {}]   ;;  %s2897_s1 = inlined_call_operand.hbm [shape: bf16[1280,256], index: 1, kind: input, shape index: {}]   ;;  %s2898_s2 = inlined_call_operand.hbm [shape: f32[1,256], index: 2, kind: input, shape index: {}]   ;;  %s2899_s3 = inlined_call_operand.hbm [shape: bf16[256,128], index: 3, kind: input, shape index: {}]   ;;  %s2900_s4 = inlined_call_operand.vmem [shape: f32[1,128], index: 4, kind: input, shape index: {}]   ;;  %s2901_s5 = inlined_call_operand.hbm [shape: bf16[128,128], index: 5, kind: input, shape index: {}]   ;;  %s2902_s6 = inlined_call_operand.vmem [shape: f32[1,128], index: 6, kind: input, shape index: {}]   ;;  %s2903_s7 = inlined_call_operand.hbm [shape: f32[16,128], index: 7, kind: output, shape index: {}]  }
   0x1   :  { %13 = vsyncpa [#allocation7], 0 }
   0x2   :  { %14 = vsyncpa [#allocation10], 0  ;;  %s33_s26 = sshll.u32 %s2897_s1, 4  ;;  %s34_s26 = int_to_ptr.hbm [resolvable:$true] %s33_s26 }
   0x3   :  { %15 = vsyncpa [#allocation5], 0  ;;  %s2770_s27 = smov [#allocation6]   ;;  %s57_s8 = sshll.u32 %s2899_s3, 4  ;;  %s58_s8 = int_to_ptr.hbm [resolvable:$true] %s57_s8 }
   0x4   :  { %s35_s28 = sshll.u32 %s2770_s27, 4  ;;  %s2771_s9 = smov 128   ;;  %s36_s28 = int_to_ptr.vmem [resolvable:$true] %s35_s28 }
   0x5   :  { %s2772_s10 = smov 8   ;;  %s2773_s11 = smov [#allocation9]  }
   0x6   :  { %41 = dma.hbm_to_vmem [thread:$0]  %s34_s26, 20480, %s36_s28, [#allocation7], %s2771_s9, %s2771_s9, %s2772_s10  }
   0x7   :  { %s59_s12 = sshll.u32 %s2773_s11, 4  ;;  %s2774_s1 = smov 64   ;;  %s60_s12 = int_to_ptr.vmem [resolvable:$true] %s59_s12 }
   0x8   :  { %s2775_s13 = smov 4   ;;  %s20_s16 = sshll.u32 %s2896_s0, 4  ;;  %s21_s16 = int_to_ptr.hbm [resolvable:$true] %s20_s16 }
   0x9   :  { %65 = dma.hbm_to_vmem [thread:$0]  %s58_s8, 2048, %s60_s12, [#allocation10], %s2774_s1, %s2774_s1, %s2775_s13  }
   0xa   :  { %s2776_s17 = smov [#allocation3]   ;;  %s47_s20 = sshll.u32 %s2898_s2, 4  ;;  %s48_s20 = int_to_ptr.hbm [resolvable:$true] %s47_s20 }
   0xb   :  { %s22_s3 = sshll.u32 %s2776_s17, 4  ;;  %s2777_s21 = smov 1280   ;;  %s23_s3 = int_to_ptr.vmem [resolvable:$true] %s22_s3 }
   0xc   :  { %s2778_s22 = smov 80   ;;  %s2779_s23 = smov [#allocation8]  }
   0xd   :  { %28 = dma.hbm_to_vmem [thread:$0]  %s21_s16, 2560, %s23_s3, [#allocation4], %s2777_s21, %s2777_s21, %s2778_s22  }
   0xe   :  { %s49_s24 = sshll.u32 %s2779_s23, 4  ;;  %s72_s27 = sshll.u32 %s2901_s5, 4  ;;  %s50_s24 = int_to_ptr.vmem [resolvable:$true] %s49_s24  ;;  %s73_s27 = int_to_ptr.hbm [resolvable:$true] %s72_s27 }
   0xf   :  { %52 = dma.hbm_to_vmem [thread:$0]  %s48_s20, 32, %s50_s24, [#allocation7]  }
  0x10   :  { %s2780_s0 = smov [#allocation11]  }
  0x11   :  { %s74_s28 = sshll.u32 %s2780_s0, 4  ;;  %s75_s28 = int_to_ptr.vmem [resolvable:$true] %s74_s28 }
  0x12   :  { %80 = dma.hbm_to_vmem [thread:$0]  %s73_s27, 1024, %s75_s28, [#allocation10], %s2774_s1, %s2774_s1, %s2775_s13  }
  0x13   :  { %2762 = dma.done.wait [#allocation4], 2560  }
  0x14   :  { %2763 = vsyncadd [#allocation4], 4294964736 }
  0x15   :  { %2764 = dma.done.wait [#allocation7], 20512  }
  0x16   :  { %2765 = vsyncadd [#allocation7], 4294946784 }
  0x17   :  { %2766 = dma.done.wait [#allocation10], 3072  }
  0x18   :  { %2767 = vsyncadd [#allocation10], 4294964224  ;;  %v1742_v0 = vld [vmem:[#allocation6 + $0x70] sm:$0xf]  ;;  %v2435_v1 = vld [vmem:[#allocation6 + $0x74] sm:$0xf0] }
  0x19   :  { %v1806_v2 = vld [vmem:[#allocation6 + $0xf0] sm:$0xf]  ;;  %v1743_v3 = vor.u32 %v2435_v1, %v1742_v0  ;;  %v2451_v4 = vld [vmem:[#allocation6 + $0xf4] sm:$0xf0]  ;;  %v1734_v11 = vld [vmem:[#allocation6 + $0x60] sm:$0xf] }
  0x1a   :  { %v1870_v5 = vld [vmem:[#allocation6 + $0x170] sm:$0xf]  ;;  %v2467_v6 = vld [vmem:[#allocation6 + $0x174] sm:$0xf0]  ;;  %v1807_v7 = vor.u32 %v2451_v4, %v1806_v2  ;;  %v2433_v13 = vld [vmem:[#allocation6 + $0x64] sm:$0xf0] }
  0x1b   :  { %v1871_v8 = vor.u32 %v2467_v6, %v1870_v5  ;;  %v1934_v9 = vld [vmem:[#allocation6 + $0x1f0] sm:$0xf]  ;;  %v2483_v10 = vld [vmem:[#allocation6 + $0x1f4] sm:$0xf0]  ;;  %1093 = vmatpush.bf16.msra.mxu0 %v1743_v3  ;;  %v1798_v14 = vld [vmem:[#allocation6 + $0xe0] sm:$0xf]  ;;  %v1735_v16 = vor.u32 %v2433_v13, %v1734_v11 }
  0x1c   :  { %v1935_v12 = vor.u32 %v2483_v10, %v1934_v9  ;;  %v2449_v15 = vld [vmem:[#allocation6 + $0xe4] sm:$0xf0]  ;;  %1107 = vmatpush.bf16.msra.mxu1 %v1807_v7  ;;  %v1862_v18 = vld [vmem:[#allocation6 + $0x160] sm:$0xf]  ;;  %v1726_v23 = vld [vmem:[#allocation6 + $0x50] sm:$0xf] }
  0x1d   :  { %1121 = vmatpush.bf16.msra.mxu2 %v1871_v8  ;;  %v1799_v17 = vor.u32 %v2449_v15, %v1798_v14  ;;  %v2465_v19 = vld [vmem:[#allocation6 + $0x164] sm:$0xf0]  ;;  %v1926_v20 = vld [vmem:[#allocation6 + $0x1e0] sm:$0xf]  ;;  %v2431_v24 = vld [vmem:[#allocation6 + $0x54] sm:$0xf0] }
  0x1e   :  { %1135 = vmatpush.bf16.msra.mxu3 %v1935_v12  ;;  %v1863_v21 = vor.u32 %v2465_v19, %v1862_v18  ;;  %v2481_v22 = vld [vmem:[#allocation6 + $0x1e4] sm:$0xf0]  ;;  %v1790_v26 = vld [vmem:[#allocation6 + $0xd0] sm:$0xf]  ;;  %v2447_v27 = vld [vmem:[#allocation6 + $0xd4] sm:$0xf0]  ;;  %v1727_v29 = vor.u32 %v2431_v24, %v1726_v23 }
  0x1f   :  { %v1927_v25 = vor.u32 %v2481_v22, %v1926_v20  ;;  %v1854_v28 = vld [vmem:[#allocation6 + $0x150] sm:$0xf]  ;;  %1094 = vmatpush.bf16.msra.mxu0 %v1735_v16  ;;  %v2463_v30 = vld [vmem:[#allocation6 + $0x154] sm:$0xf0]  ;;  %v1791_v33 = vor.u32 %v2447_v27, %v1790_v26  ;;  %v1718_v35 = vld [vmem:[#allocation6 + $0x40] sm:$0xf] }
  0x20   :  { %v1918_v31 = vld [vmem:[#allocation6 + $0x1d0] sm:$0xf]  ;;  %v2479_v32 = vld [vmem:[#allocation6 + $0x1d4] sm:$0xf0]  ;;  %1108 = vmatpush.bf16.msra.mxu1 %v1799_v17  ;;  %v1855_v34 = vor.u32 %v2463_v30, %v1854_v28  ;;  %v2429_v36 = vld [vmem:[#allocation6 + $0x44] sm:$0xf0] }
  0x21   :  { %1122 = vmatpush.bf16.msra.mxu2 %v1863_v21  ;;  %v1782_v37 = vld [vmem:[#allocation6 + $0xc0] sm:$0xf]  ;;  %v1919_v38 = vor.u32 %v2479_v32, %v1918_v31  ;;  %v2445_v39 = vld [vmem:[#allocation6 + $0xc4] sm:$0xf0]  ;;  %v1719_v44 = vor.u32 %v2429_v36, %v1718_v35  ;;  %v1710_v47 = vld [vmem:[#allocation6 + $0x30] sm:$0xf] }
  0x22   :  { %1136 = vmatpush.bf16.msra.mxu3 %v1927_v25  ;;  %v1846_v40 = vld [vmem:[#allocation6 + $0x140] sm:$0xf]  ;;  %v2461_v41 = vld [vmem:[#allocation6 + $0x144] sm:$0xf0]  ;;  %v1783_v45 = vor.u32 %v2445_v39, %v1782_v37  ;;  %v2427_v48 = vld [vmem:[#allocation6 + $0x34] sm:$0xf0] }
  0x23   :  { %v1910_v42 = vld [vmem:[#allocation6 + $0x1c0] sm:$0xf]  ;;  %v2477_v43 = vld [vmem:[#allocation6 + $0x1c4] sm:$0xf0]  ;;  %1095 = vmatpush.bf16.msra.mxu0 %v1727_v29  ;;  %v1847_v46 = vor.u32 %v2461_v41, %v1846_v40  ;;  %v1774_v49 = vld [vmem:[#allocation6 + $0xb0] sm:$0xf]  ;;  %v1711_v56 = vor.u32 %v2427_v48, %v1710_v47 }
  0x24   :  { %1109 = vmatpush.bf16.msra.mxu1 %v1791_v33  ;;  %v1911_v50 = vor.u32 %v2477_v43, %v1910_v42  ;;  %v2443_v51 = vld [vmem:[#allocation6 + $0xb4] sm:$0xf0]  ;;  %v1838_v52 = vld [vmem:[#allocation6 + $0x130] sm:$0xf]  ;;  %v1702_v59 = vld [vmem:[#allocation6 + $0x20] sm:$0xf] }
  0x25   :  { %1123 = vmatpush.bf16.msra.mxu2 %v1855_v34  ;;  %v2459_v53 = vld [vmem:[#allocation6 + $0x134] sm:$0xf0]  ;;  %v1902_v54 = vld [vmem:[#allocation6 + $0x1b0] sm:$0xf]  ;;  %v1775_v57 = vor.u32 %v2443_v51, %v1774_v49  ;;  %v2425_v60 = vld [vmem:[#allocation6 + $0x24] sm:$0xf0] }
  0x26   :  { %1137 = vmatpush.bf16.msra.mxu3 %v1919_v38  ;;  %v2475_v55 = vld [vmem:[#allocation6 + $0x1b4] sm:$0xf0]  ;;  %v1839_v58 = vor.u32 %v2459_v53, %v1838_v52  ;;  %v1766_v61 = vld [vmem:[#allocation6 + $0xa0] sm:$0xf]  ;;  %v2441_v63 = vld [vmem:[#allocation6 + $0xa4] sm:$0xf0]  ;;  %v1703_v4 = vor.u32 %v2425_v60, %v1702_v59 }
  0x27   :  { %1096 = vmatpush.bf16.msra.mxu0 %v1719_v44  ;;  %v1903_v62 = vor.u32 %v2475_v55, %v1902_v54  ;;  %v1830_v0 = vld [vmem:[#allocation6 + $0x120] sm:$0xf]  ;;  %v2457_v1 = vld [vmem:[#allocation6 + $0x124] sm:$0xf0]  ;;  %v1767_v5 = vor.u32 %v2441_v63, %v1766_v61  ;;  %v1694_v7 = vld [vmem:[#allocation6 + $0x10] sm:$0xf] }
  0x28   :  { %1110 = vmatpush.bf16.msra.mxu1 %v1783_v45  ;;  %v1894_v2 = vld [vmem:[#allocation6 + $0x1a0] sm:$0xf]  ;;  %v2473_v3 = vld [vmem:[#allocation6 + $0x1a4] sm:$0xf0]  ;;  %v1831_v6 = vor.u32 %v2457_v1, %v1830_v0  ;;  %v2423_v8 = vld [vmem:[#allocation6 + $0x14] sm:$0xf0] }
  0x29   :  { %1124 = vmatpush.bf16.msra.mxu2 %v1847_v46  ;;  %v1758_v9 = vld [vmem:[#allocation6 + $0x90] sm:$0xf]  ;;  %v1895_v10 = vor.u32 %v2473_v3, %v1894_v2  ;;  %v2439_v11 = vld [vmem:[#allocation6 + $0x94] sm:$0xf0]  ;;  %v1695_v16 = vor.u32 %v2423_v8, %v1694_v7  ;;  %v1686_v17 = vld [vmem:[#allocation6] sm:$0xf] }
  0x2a   :  { %1138 = vmatpush.bf16.msra.mxu3 %v1911_v50  ;;  %v1822_v12 = vld [vmem:[#allocation6 + $0x110] sm:$0xf]  ;;  %v2455_v13 = vld [vmem:[#allocation6 + $0x114] sm:$0xf0]  ;;  %v2421_v18 = vld [vmem:[#allocation6 + $0x4] sm:$0xf0]  ;;  %v1759_v19 = vor.u32 %v2439_v11, %v1758_v9 }
  0x2b   :  { %1097 = vmatpush.bf16.msra.mxu0 %v1711_v56  ;;  %v1886_v14 = vld [vmem:[#allocation6 + $0x190] sm:$0xf]  ;;  %v2471_v15 = vld [vmem:[#allocation6 + $0x194] sm:$0xf0]  ;;  %v1823_v20 = vor.u32 %v2455_v13, %v1822_v12  ;;  %v1750_v21 = vld [vmem:[#allocation6 + $0x80] sm:$0xf]  ;;  %v1687_v31 = vor.u32 %v2421_v18, %v1686_v17 }
  0x2c   :  { %1111 = vmatpush.bf16.msra.mxu1 %v1775_v57  ;;  %v2437_v22 = vld [vmem:[#allocation6 + $0x84] sm:$0xf0]  ;;  %v1814_v23 = vld [vmem:[#allocation6 + $0x100] sm:$0xf]  ;;  %v1887_v24 = vor.u32 %v2471_v15, %v1886_v14  ;;  %v1998_v28 = vld [vmem:[#allocation6 + $0x270] sm:$0xf] }
  0x2d   :  { %1125 = vmatpush.bf16.msra.mxu2 %v1839_v58  ;;  %v2453_v25 = vld [vmem:[#allocation6 + $0x104] sm:$0xf0]  ;;  %v1878_v26 = vld [vmem:[#allocation6 + $0x180] sm:$0xf]  ;;  %v2499_v29 = vld [vmem:[#allocation6 + $0x274] sm:$0xf0]  ;;  %v1751_v35 = vor.u32 %v2437_v22, %v1750_v21 }
  0x2e   :  { %1139 = vmatpush.bf16.msra.mxu3 %v1903_v62  ;;  %v2469_v27 = vld [vmem:[#allocation6 + $0x184] sm:$0xf0]  ;;  %v2062_v30 = vld [vmem:[#allocation6 + $0x2f0] sm:$0xf]  ;;  %v2515_v32 = vld [vmem:[#allocation6 + $0x2f4] sm:$0xf0]  ;;  %v1815_v36 = vor.u32 %v2453_v25, %v1814_v23  ;;  %v1999_v40 = vor.u32 %v2499_v29, %v1998_v28 }
  0x2f   :  { %1098 = vmatpush.bf16.msra.mxu0 %v1703_v4  ;;  %v2126_v33 = vld [vmem:[#allocation6 + $0x370] sm:$0xf]  ;;  %v2531_v34 = vld [vmem:[#allocation6 + $0x374] sm:$0xf0]  ;;  %v1879_v39 = vor.u32 %v2469_v27, %v1878_v26  ;;  %v1990_v41 = vld [vmem:[#allocation6 + $0x260] sm:$0xf]  ;;  %v2063_v43 = vor.u32 %v2515_v32, %v2062_v30 }
  0x30   :  { %1112 = vmatpush.bf16.msra.mxu1 %v1767_v5  ;;  %v2190_v37 = vld [vmem:[#allocation6 + $0x3f0] sm:$0xf]  ;;  %v2547_v38 = vld [vmem:[#allocation6 + $0x3f4] sm:$0xf0]  ;;  %v2497_v42 = vld [vmem:[#allocation6 + $0x264] sm:$0xf0]  ;;  %v2127_v44 = vor.u32 %v2531_v34, %v2126_v33 }
  0x31   :  { %1126 = vmatpush.bf16.msra.mxu2 %v1831_v6  ;;  %v2054_v45 = vld [vmem:[#allocation6 + $0x2e0] sm:$0xf]  ;;  %v2513_v46 = vld [vmem:[#allocation6 + $0x2e4] sm:$0xf0]  ;;  %v2191_v48 = vor.u32 %v2547_v38, %v2190_v37  ;;  %v113_v53 = vld [vmem:[#allocation3 + $0x50] sm:$0xff]  ;;  %v1991_v55 = vor.u32 %v2497_v42, %v1990_v41  ;;  %s2781_s8 = smov [#allocation12]  }
  0x32   :  { %1140 = vmatpush.bf16.msra.mxu3 %v1895_v10  ;;  %v2118_v47 = vld [vmem:[#allocation6 + $0x360] sm:$0xf]  ;;  %v2529_v49 = vld [vmem:[#allocation6 + $0x364] sm:$0xf0]  ;;  %v105_v54 = vld [vmem:[#allocation3 + $0x10] sm:$0xff]  ;;  %v2055_v60 = vor.u32 %v2513_v46, %v2054_v45  ;;  %s1667_s11 = sshll.u32 %s2781_s8, 4  ;;  %s1668_s11 = int_to_ptr.vmem [resolvable:$true] %s1667_s11 }
  0x33   :  { %1099 = vmatpush.bf16.msra.mxu0 %v1695_v16  ;;  %v2182_v50 = vld [vmem:[#allocation6 + $0x3e0] sm:$0xf]  ;;  %v2545_v51 = vld [vmem:[#allocation6 + $0x3e4] sm:$0xf0]  ;;  %v1982_v56 = vld [vmem:[#allocation6 + $0x250] sm:$0xf]  ;;  %v2119_v61 = vor.u32 %v2529_v49, %v2118_v47 }
  0x34   :  { %1113 = vmatpush.bf16.msra.mxu1 %v1759_v19  ;;  %v103_v52 = vld [vmem:[#allocation3] sm:$0xff]  ;;  %v2495_v57 = vld [vmem:[#allocation6 + $0x254] sm:$0xf0]  ;;  %v2046_v62 = vld [vmem:[#allocation6 + $0x2d0] sm:$0xf]  ;;  %v2183_v2 = vor.u32 %v2545_v51, %v2182_v50  ;;  %s1669_s1 = sshll.u32 %s2903_s7, 4  ;;  %s1670_s1 = int_to_ptr.hbm [resolvable:$true] %s1669_s1 }
  0x35   :  { %1127 = vmatpush.bf16.msra.mxu2 %v1823_v20  ;;  %v2840_v58 = vpack.c.bf16 %v113_v53, %v103_v52  ;;  %v115_v59 = vld [vmem:[#allocation3 + $0x60] sm:$0xff]  ;;  %v2511_v63 = vld [vmem:[#allocation6 + $0x2d4] sm:$0xf0]  ;;  %v2110_v0 = vld [vmem:[#allocation6 + $0x350] sm:$0xf]  ;;  %v1983_v9 = vor.u32 %v2495_v57, %v1982_v56 }
  0x36   :  { %1141 = vmatpush.bf16.msra.mxu3 %v1887_v24  ;;  %v2842_v1 = vpack.c.bf16 %v115_v59, %v105_v54  ;;  %v2527_v3 = vld [vmem:[#allocation6 + $0x354] sm:$0xf0]  ;;  %v2174_v4 = vld [vmem:[#allocation6 + $0x3d0] sm:$0xf]  ;;  %v104_v6 = vld [vmem:[#allocation3 + $0x8] sm:$0xff]  ;;  %v2047_v12 = vor.u32 %v2511_v63, %v2046_v62 }
  0x37   :  { %1100 = vmatpush.bf16.msra.mxu0 %v1687_v31  ;;  %v2543_v5 = vld [vmem:[#allocation6 + $0x3d4] sm:$0xf0]  ;;  %v116_v11 = vld [vmem:[#allocation3 + $0x68] sm:$0xff]  ;;  %v2111_v13 = vor.u32 %v2527_v3, %v2110_v0  ;;  %v1974_v14 = vld [vmem:[#allocation6 + $0x240] sm:$0xf] }
  0x38   :  { %1114 = vmatpush.bf16.msra.mxu1 %v1751_v35  ;;  %v114_v7 = vld [vmem:[#allocation3 + $0x58] sm:$0xff]  ;;  %v2493_v15 = vld [vmem:[#allocation6 + $0x244] sm:$0xf0]  ;;  %v2038_v16 = vld [vmem:[#allocation6 + $0x2c0] sm:$0xf]  ;;  %v2175_v18 = vor.u32 %v2543_v5, %v2174_v4 }
  0x39   :  { %1128 = vmatpush.bf16.msra.mxu2 %v1815_v36  ;;  %v106_v8 = vld [vmem:[#allocation3 + $0x18] sm:$0xff]  ;;  %v2846_v10 = vpack.c.bf16 %v114_v7, %v104_v6  ;;  %v2509_v19 = vld [vmem:[#allocation6 + $0x2c4] sm:$0xf0]  ;;  %v2102_v20 = vld [vmem:[#allocation6 + $0x340] sm:$0xf]  ;;  %v1975_v24 = vor.u32 %v2493_v15, %v1974_v14 }
  0x3a   :  { %1142 = vmatpush.bf16.msra.mxu3 %v1879_v39  ;;  %1101 = vmatmul.bf16.vlgmr.msra.gmra.mxu0 %v2840_v58  ;;  %v2848_v17 = vpack.c.bf16 %v116_v11, %v106_v8  ;;  %v2525_v21 = vld [vmem:[#allocation6 + $0x344] sm:$0xf0]  ;;  %v2166_v22 = vld [vmem:[#allocation6 + $0x3c0] sm:$0xf]  ;;  %v2039_v25 = vor.u32 %v2509_v19, %v2038_v16  ;;  %v1966_v27 = vld [vmem:[#allocation6 + $0x230] sm:$0xf] }
  0x3b   :  { %1149 = vmatpush.bf16.msrb.mxu0 %v1999_v40  ;;  %1115 = vmatmul.bf16.vlgmr.msra.gmra.mxu1 %v2846_v10  ;;  %v2541_v23 = vld [vmem:[#allocation6 + $0x3c4] sm:$0xf0]  ;;  %v2103_v26 = vor.u32 %v2525_v21, %v2102_v20  ;;  %v2491_v28 = vld [vmem:[#allocation6 + $0x234] sm:$0xf0]  ;;  %v2030_v29 = vld [vmem:[#allocation6 + $0x2b0] sm:$0xf] }
  0x3c   :  { %1163 = vmatpush.bf16.msrb.mxu1 %v2063_v43  ;;  %1129 = vmatmul.bf16.vlgmr.msra.gmra.mxu2 %v2842_v1  ;;  %v2167_v30 = vor.u32 %v2541_v23, %v2166_v22  ;;  %v2507_v31 = vld [vmem:[#allocation6 + $0x2b4] sm:$0xf0]  ;;  %v2094_v32 = vld [vmem:[#allocation6 + $0x330] sm:$0xf]  ;;  %v1967_v36 = vor.u32 %v2491_v28, %v1966_v27  ;;  %v1958_v39 = vld [vmem:[#allocation6 + $0x220] sm:$0xf] }
  0x3d   :  { %1177 = vmatpush.bf16.msrb.mxu2 %v2127_v44  ;;  %1143 = vmatmul.bf16.vlgmr.msra.gmra.mxu3 %v2848_v17  ;;  %v2523_v33 = vld [vmem:[#allocation6 + $0x334] sm:$0xf0]  ;;  %v2158_v34 = vld [vmem:[#allocation6 + $0x3b0] sm:$0xf]  ;;  %v2031_v37 = vor.u32 %v2507_v31, %v2030_v29  ;;  %v2489_v40 = vld [vmem:[#allocation6 + $0x224] sm:$0xf0] }
  0x3e   :  { %1191 = vmatpush.bf16.msrb.mxu3 %v2191_v48  ;;  %v2539_v35 = vld [vmem:[#allocation6 + $0x3b4] sm:$0xf0]  ;;  %v2095_v38 = vor.u32 %v2523_v33, %v2094_v32  ;;  %v2022_v41 = vld [vmem:[#allocation6 + $0x2a0] sm:$0xf]  ;;  %v2505_v43 = vld [vmem:[#allocation6 + $0x2a4] sm:$0xf0]  ;;  %v1959_v48 = vor.u32 %v2489_v40, %v1958_v39 }
  0x3f   :  { %1150 = vmatpush.bf16.msrb.mxu0 %v1991_v55  ;;  %v2159_v42 = vor.u32 %v2539_v35, %v2158_v34  ;;  %v2086_v44 = vld [vmem:[#allocation6 + $0x320] sm:$0xf]  ;;  %v2521_v45 = vld [vmem:[#allocation6 + $0x324] sm:$0xf0]  ;;  %v1950_v49 = vld [vmem:[#allocation6 + $0x210] sm:$0xf]  ;;  %v2023_v50 = vor.u32 %v2505_v43, %v2022_v41 }
  0x40   :  { %1164 = vmatpush.bf16.msrb.mxu1 %v2055_v60  ;;  %v2150_v46 = vld [vmem:[#allocation6 + $0x3a0] sm:$0xf]  ;;  %v2537_v47 = vld [vmem:[#allocation6 + $0x3a4] sm:$0xf0]  ;;  %v2087_v51 = vor.u32 %v2521_v45, %v2086_v44  ;;  %v2487_v52 = vld [vmem:[#allocation6 + $0x214] sm:$0xf0] }
  0x41   :  { %1178 = vmatpush.bf16.msrb.mxu2 %v2119_v61  ;;  %v2014_v53 = vld [vmem:[#allocation6 + $0x290] sm:$0xf]  ;;  %v2503_v54 = vld [vmem:[#allocation6 + $0x294] sm:$0xf0]  ;;  %v2151_v55 = vor.u32 %v2537_v47, %v2150_v46  ;;  %v1942_v61 = vld [vmem:[#allocation6 + $0x200] sm:$0xf]  ;;  %v1951_v63 = vor.u32 %v2487_v52, %v1950_v49 }
  0x42   :  { %1192 = vmatpush.bf16.msrb.mxu3 %v2183_v2  ;;  %v2078_v56 = vld [vmem:[#allocation6 + $0x310] sm:$0xf]  ;;  %v2519_v57 = vld [vmem:[#allocation6 + $0x314] sm:$0xf0]  ;;  %v2485_v62 = vld [vmem:[#allocation6 + $0x204] sm:$0xf0]  ;;  %v2015_v5 = vor.u32 %v2503_v54, %v2014_v53 }
  0x43   :  { %1151 = vmatpush.bf16.msrb.mxu0 %v1983_v9  ;;  %v2142_v59 = vld [vmem:[#allocation6 + $0x390] sm:$0xf]  ;;  %v2535_v60 = vld [vmem:[#allocation6 + $0x394] sm:$0xf0]  ;;  %v2006_v0 = vld [vmem:[#allocation6 + $0x280] sm:$0xf]  ;;  %v2079_v6 = vor.u32 %v2519_v57, %v2078_v56  ;;  %v1943_v19 = vor.u32 %v2485_v62, %v1942_v61 }
  0x44   :  { %1165 = vmatpush.bf16.msrb.mxu1 %v2047_v12  ;;  %v2501_v2 = vld [vmem:[#allocation6 + $0x284] sm:$0xf0]  ;;  %v2070_v3 = vld [vmem:[#allocation6 + $0x300] sm:$0xf]  ;;  %v2254_v9 = vld [vmem:[#allocation6 + $0x470] sm:$0xf]  ;;  %v2143_v11 = vor.u32 %v2535_v60, %v2142_v59 }
  0x45   :  { %1179 = vmatpush.bf16.msrb.mxu2 %v2111_v13  ;;  %v2517_v4 = vld [vmem:[#allocation6 + $0x304] sm:$0xf0]  ;;  %v2134_v7 = vld [vmem:[#allocation6 + $0x380] sm:$0xf]  ;;  %v2563_v12 = vld [vmem:[#allocation6 + $0x474] sm:$0xf0]  ;;  %v2007_v23 = vor.u32 %v2501_v2, %v2006_v0 }
  0x46   :  { %1193 = vmatpush.bf16.msrb.mxu3 %v2175_v18  ;;  %v2533_v8 = vld [vmem:[#allocation6 + $0x384] sm:$0xf0]  ;;  %v2318_v13 = vld [vmem:[#allocation6 + $0x4f0] sm:$0xf]  ;;  %v2579_v14 = vld [vmem:[#allocation6 + $0x4f4] sm:$0xf0]  ;;  %v2255_v29 = vor.u32 %v2563_v12, %v2254_v9 }
  0x47   :  { %1152 = vmatpush.bf16.msrb.mxu0 %v1975_v24  ;;  %v2434_v15 = vld [vmem:[#allocation6 + $0x74] sm:$0xf]  ;;  %v1744_v16 = vld [vmem:[#allocation6 + $0x78] sm:$0xf0]  ;;  %v107_v21 = vld [vmem:[#allocation3 + $0x20] sm:$0xff]  ;;  %v2071_v24 = vor.u32 %v2517_v4, %v2070_v3  ;;  %v2135_v28 = vor.u32 %v2533_v8, %v2134_v7  ;;  %v2319_v33 = vor.u32 %v2579_v14, %v2318_v13 }
  0x48   :  { %1166 = vmatpush.bf16.msrb.mxu1 %v2039_v25  ;;  %v2450_v18 = vld [vmem:[#allocation6 + $0xf4] sm:$0xf]  ;;  %v1808_v20 = vld [vmem:[#allocation6 + $0xf8] sm:$0xf0]  ;;  %v108_v27 = vld [vmem:[#allocation3 + $0x28] sm:$0xff]  ;;  %v1747_v34 = vor.u32 %v2434_v15, %v1744_v16 }
  0x49   :  { %1180 = vmatpush.bf16.msrb.mxu2 %v2103_v26  ;;  %v117_v22 = vld [vmem:[#allocation3 + $0x70] sm:$0xff]  ;;  %v119_v26 = vld [vmem:[#allocation3 + $0x80] sm:$0xff]  ;;  %v110_v31 = vld [vmem:[#allocation3 + $0x38] sm:$0xff] }
  0x4a   :  { %1194 = vmatpush.bf16.msrb.mxu3 %v2167_v30  ;;  %v109_v25 = vld [vmem:[#allocation3 + $0x30] sm:$0xff]  ;;  %v118_v30 = vld [vmem:[#allocation3 + $0x78] sm:$0xff]  ;;  %v120_v32 = vld [vmem:[#allocation3 + $0x88] sm:$0xff]  ;;  %v2852_v39 = vpack.c.bf16 %v117_v22, %v107_v21 }
  0x4b   :  { %1153 = vmatpush.bf16.msrb.mxu0 %v1967_v36  ;;  %v2246_v35 = vld [vmem:[#allocation6 + $0x460] sm:$0xf]  ;;  %v2561_v36 = vld [vmem:[#allocation6 + $0x464] sm:$0xf0]  ;;  %v2432_v41 = vld [vmem:[#allocation6 + $0x64] sm:$0xf]  ;;  %v2854_v43 = vpack.c.bf16 %v119_v26, %v109_v25  ;;  %v2856_v44 = vpack.c.bf16 %v118_v30, %v108_v27  ;;  %v2858_v47 = vpack.c.bf16 %v120_v32, %v110_v31 }
  0x4c   :  { %1167 = vmatpush.bf16.msrb.mxu1 %v2031_v37  ;;  %v2310_v37 = vld [vmem:[#allocation6 + $0x4e0] sm:$0xf]  ;;  %v2577_v40 = vld [vmem:[#allocation6 + $0x4e4] sm:$0xf0]  ;;  %v2448_v45 = vld [vmem:[#allocation6 + $0xe4] sm:$0xf] }
  0x4d   :  { %1181 = vmatpush.bf16.msrb.mxu2 %v2095_v38  ;;  %v1811_v38 = vor.u32 %v2450_v18, %v1808_v20  ;;  %v1800_v46 = vld [vmem:[#allocation6 + $0xe8] sm:$0xf0]  ;;  %v2311_v49 = vor.u32 %v2577_v40, %v2310_v37  ;;  %v2559_v52 = vld [vmem:[#allocation6 + $0x454] sm:$0xf0]  ;;  %v2302_v53 = vld [vmem:[#allocation6 + $0x4d0] sm:$0xf] }
  0x4e   :  { %1195 = vmatpush.bf16.msrb.mxu3 %v2159_v42  ;;  %v1736_v42 = vld [vmem:[#allocation6 + $0x68] sm:$0xf0]  ;;  %v1803_v54 = vor.u32 %v2448_v45, %v1800_v46  ;;  %v2430_v56 = vld [vmem:[#allocation6 + $0x54] sm:$0xf]  ;;  %v1728_v57 = vld [vmem:[#allocation6 + $0x58] sm:$0xf0] }
  0x4f   :  { %1154 = vmatpush.bf16.msrb.mxu0 %v1959_v48  ;;  %v2247_v48 = vor.u32 %v2561_v36, %v2246_v35  ;;  %v2446_v59 = vld [vmem:[#allocation6 + $0xd4] sm:$0xf]  ;;  %v1792_v60 = vld [vmem:[#allocation6 + $0xd8] sm:$0xf0]  ;;  %v2230_v0 = vld [vmem:[#allocation6 + $0x440] sm:$0xf] }
  0x50   :  { %1168 = vmatpush.bf16.msrb.mxu1 %v2023_v50  ;;  %v1739_v50 = vor.u32 %v2432_v41, %v1736_v42  ;;  %v2557_v2 = vld [vmem:[#allocation6 + $0x444] sm:$0xf0]  ;;  %v2294_v3 = vld [vmem:[#allocation6 + $0x4c0] sm:$0xf]  ;;  %v1795_v4 = vor.u32 %v2446_v59, %v1792_v60  ;;  %v1720_v7 = vld [vmem:[#allocation6 + $0x48] sm:$0xf0] }
  0x51   :  { %1182 = vmatpush.bf16.msrb.mxu2 %v2087_v51  ;;  %v2238_v51 = vld [vmem:[#allocation6 + $0x450] sm:$0xf]  ;;  %v2444_v8 = vld [vmem:[#allocation6 + $0xc4] sm:$0xf]  ;;  %v1784_v9 = vld [vmem:[#allocation6 + $0xc8] sm:$0xf0] }
  0x52   :  { %1196 = vmatpush.bf16.msrb.mxu3 %v2151_v55  ;;  %v2575_v55 = vld [vmem:[#allocation6 + $0x4d4] sm:$0xf0]  ;;  %v2239_v61 = vor.u32 %v2559_v52, %v2238_v51  ;;  %v2222_v14 = vld [vmem:[#allocation6 + $0x430] sm:$0xf]  ;;  %v1787_v18 = vor.u32 %v2444_v8, %v1784_v9  ;;  %v2426_v20 = vld [vmem:[#allocation6 + $0x34] sm:$0xf] }
  0x53   :  { %1155 = vmatpush.bf16.msrb.mxu0 %v1951_v63  ;;  %v2303_v62 = vor.u32 %v2575_v55, %v2302_v53  ;;  %v1731_v63 = vor.u32 %v2430_v56, %v1728_v57  ;;  %v2555_v15 = vld [vmem:[#allocation6 + $0x434] sm:$0xf0]  ;;  %v2286_v16 = vld [vmem:[#allocation6 + $0x4b0] sm:$0xf]  ;;  %v1712_v21 = vld [vmem:[#allocation6 + $0x38] sm:$0xf0] }
  0x54   :  { %1169 = vmatpush.bf16.msrb.mxu1 %v2015_v5  ;;  %v2573_v5 = vld [vmem:[#allocation6 + $0x4c4] sm:$0xf0]  ;;  %v2442_v22 = vld [vmem:[#allocation6 + $0xb4] sm:$0xf]  ;;  %v1715_v26 = vor.u32 %v2426_v20, %v1712_v21  ;;  %v2214_v27 = vld [vmem:[#allocation6 + $0x420] sm:$0xf] }
  0x55   :  { %1183 = vmatpush.bf16.msrb.mxu2 %v2079_v6  ;;  %v2428_v6 = vld [vmem:[#allocation6 + $0x44] sm:$0xf]  ;;  %v2295_v12 = vor.u32 %v2573_v5, %v2294_v3  ;;  %v2569_v31 = vld [vmem:[#allocation6 + $0x4a4] sm:$0xf0]  ;;  %v1768_v35 = vld [vmem:[#allocation6 + $0xa8] sm:$0xf0] }
  0x56   :  { %1197 = vmatpush.bf16.msrb.mxu3 %v2143_v11  ;;  %v2231_v11 = vor.u32 %v2557_v2, %v2230_v0  ;;  %v1723_v13 = vor.u32 %v2428_v6, %v1720_v7  ;;  %v2424_v32 = vld [vmem:[#allocation6 + $0x24] sm:$0xf]  ;;  %v2206_v40 = vld [vmem:[#allocation6 + $0x410] sm:$0xf]  ;;  %v2551_v41 = vld [vmem:[#allocation6 + $0x414] sm:$0xf0] }
  0x57   :  { %1156 = vmatpush.bf16.msrb.mxu0 %v1943_v19  ;;  %v2571_v19 = vld [vmem:[#allocation6 + $0x4b4] sm:$0xf0]  ;;  %v2270_v42 = vld [vmem:[#allocation6 + $0x490] sm:$0xf]  ;;  %v1760_v51 = vld [vmem:[#allocation6 + $0x98] sm:$0xf0]  ;;  %v2207_v52 = vor.u32 %v2551_v41, %v2206_v40 }
  0x58   :  { %1170 = vmatpush.bf16.msrb.mxu1 %v2007_v23  ;;  %v1776_v23 = vld [vmem:[#allocation6 + $0xb8] sm:$0xf0]  ;;  %v2287_v25 = vor.u32 %v2571_v19, %v2286_v16  ;;  %v2567_v46 = vld [vmem:[#allocation6 + $0x494] sm:$0xf0]  ;;  %v2198_v53 = vld [vmem:[#allocation6 + $0x400] sm:$0xf] }
  0x59   :  { %1184 = vmatpush.bf16.msrb.mxu2 %v2071_v24  ;;  %v2223_v24 = vor.u32 %v2555_v15, %v2222_v14  ;;  %v1779_v30 = vor.u32 %v2442_v22, %v1776_v23  ;;  %v2262_v55 = vld [vmem:[#allocation6 + $0x480] sm:$0xf]  ;;  %v2271_v56 = vor.u32 %v2567_v46, %v2270_v42  ;;  %v2565_v59 = vld [vmem:[#allocation6 + $0x484] sm:$0xf0]  ;;  %v2420_v60 = vld [vmem:[#allocation6 + $0x4] sm:$0xf] }
  0x5a   :  { %1198 = vmatpush.bf16.msrb.mxu3 %v2135_v28  ;;  %1157 = vmatmul.bf16.vlgmr.msrb.gmra.mxu0 %v2852_v39  ;;  %v2553_v28 = vld [vmem:[#allocation6 + $0x424] sm:$0xf0]  ;;  %v1752_v0 = vld [vmem:[#allocation6 + $0x88] sm:$0xf0]  ;;  %v2466_v2 = vld [vmem:[#allocation6 + $0x174] sm:$0xf] }
  0x5b   :  { %1205 = vmatpush.bf16.msra.mxu0 %v2255_v29  ;;  %1171 = vmatmul.bf16.vlgmr.msrb.gmra.mxu1 %v2856_v44  ;;  %v2278_v29 = vld [vmem:[#allocation6 + $0x4a0] sm:$0xf]  ;;  %v2215_v36 = vor.u32 %v2553_v28, %v2214_v27  ;;  %v1872_v3 = vld [vmem:[#allocation6 + $0x178] sm:$0xf0]  ;;  %v2498_v7 = vld [vmem:[#allocation6 + $0x274] sm:$0xf] }
  0x5c   :  { %1219 = vmatpush.bf16.msra.mxu1 %v2319_v33  ;;  %1185 = vmatmul.bf16.vlgmr.msrb.gmra.mxu2 %v2854_v43  ;;  %v1704_v33 = vld [vmem:[#allocation6 + $0x28] sm:$0xf0]  ;;  %v2279_v37 = vor.u32 %v2569_v31, %v2278_v29  ;;  %v1936_v5 = vld [vmem:[#allocation6 + $0x1f8] sm:$0xf0]  ;;  %v2514_v9 = vld [vmem:[#allocation6 + $0x2f4] sm:$0xf] }
  0x5d   :  { %1233 = vmatpush.bf16.msra.mxu2 %v1747_v34  ;;  %1199 = vmatmul.bf16.vlgmr.msrb.gmra.mxu3 %v2858_v47  ;;  %v2440_v34 = vld [vmem:[#allocation6 + $0xa4] sm:$0xf]  ;;  %v2000_v8 = vld [vmem:[#allocation6 + $0x278] sm:$0xf0]  ;;  %v121_v15 = vld [vmem:[#allocation3 + $0x90] sm:$0xff] }
  0x5e   :  { %1247 = vmatpush.bf16.msra.mxu3 %v1811_v38  ;;  %v1707_v38 = vor.u32 %v2424_v32, %v1704_v33  ;;  %v1771_v45 = vor.u32 %v2440_v34, %v1768_v35  ;;  %v111_v14 = vld [vmem:[#allocation3 + $0x40] sm:$0xff]  ;;  %v112_v19 = vld [vmem:[#allocation3 + $0x48] sm:$0xff]  ;;  %v122_v20 = vld [vmem:[#allocation3 + $0x98] sm:$0xff]  ;;  %v2003_v22 = vor.u32 %v2498_v7, %v2000_v8 }
  0x5f   :  { %1206 = vmatpush.bf16.msra.mxu0 %v2247_v48  ;;  %v2422_v48 = vld [vmem:[#allocation6 + $0x14] sm:$0xf]  ;;  %v2464_v23 = vld [vmem:[#allocation6 + $0x164] sm:$0xf]  ;;  %v2864_v27 = vpack.c.bf16 %v121_v15, %v111_v14  ;;  %v1928_v28 = vld [vmem:[#allocation6 + $0x1e8] sm:$0xf0]  ;;  %v2866_v31 = vpack.c.bf16 %v122_v20, %v112_v19 }
  0x60   :  { %1220 = vmatpush.bf16.msra.mxu1 %v2311_v49  ;;  %v1696_v49 = vld [vmem:[#allocation6 + $0x18] sm:$0xf0]  ;;  %v2496_v29 = vld [vmem:[#allocation6 + $0x264] sm:$0xf]  ;;  %v2056_v33 = vld [vmem:[#allocation6 + $0x2e8] sm:$0xf0] }
  0x61   :  { %1234 = vmatpush.bf16.msra.mxu2 %v1739_v50  ;;  %v2438_v50 = vld [vmem:[#allocation6 + $0x94] sm:$0xf]  ;;  %v1699_v57 = vor.u32 %v2422_v48, %v1696_v49  ;;  %v2512_v32 = vld [vmem:[#allocation6 + $0x2e4] sm:$0xf]  ;;  %v1920_v42 = vld [vmem:[#allocation6 + $0x1d8] sm:$0xf0] }
  0x62   :  { %1248 = vmatpush.bf16.msra.mxu3 %v1803_v54  ;;  %v2549_v54 = vld [vmem:[#allocation6 + $0x404] sm:$0xf0]  ;;  %v2478_v40 = vld [vmem:[#allocation6 + $0x1d4] sm:$0xf]  ;;  %v2059_v41 = vor.u32 %v2512_v32, %v2056_v33  ;;  %v1984_v46 = vld [vmem:[#allocation6 + $0x258] sm:$0xf0] }
  0x63   :  { %1207 = vmatpush.bf16.msra.mxu0 %v2239_v61  ;;  %v1688_v61 = vld [vmem:[#allocation6 + $0x8] sm:$0xf0]  ;;  %v2199_v6 = vor.u32 %v2549_v54, %v2198_v53  ;;  %v2510_v48 = vld [vmem:[#allocation6 + $0x2d4] sm:$0xf]  ;;  %v2048_v49 = vld [vmem:[#allocation6 + $0x2d8] sm:$0xf0] }
  0x64   :  { %1221 = vmatpush.bf16.msra.mxu1 %v2303_v62  ;;  %v1763_v62 = vor.u32 %v2438_v50, %v1760_v51  ;;  %v2460_v51 = vld [vmem:[#allocation6 + $0x144] sm:$0xf]  ;;  %v1848_v54 = vld [vmem:[#allocation6 + $0x148] sm:$0xf0]  ;;  %v1968_v7 = vld [vmem:[#allocation6 + $0x238] sm:$0xf0] }
  0x65   :  { %1235 = vmatpush.bf16.msra.mxu2 %v1731_v63  ;;  %v2436_v63 = vld [vmem:[#allocation6 + $0x84] sm:$0xf]  ;;  %v2506_v8 = vld [vmem:[#allocation6 + $0x2b4] sm:$0xf]  ;;  %v1832_v15 = vld [vmem:[#allocation6 + $0x128] sm:$0xf0] }
  0x66   :  { %1249 = vmatpush.bf16.msra.mxu3 %v1795_v4  ;;  %v2482_v4 = vld [vmem:[#allocation6 + $0x1f4] sm:$0xf]  ;;  %v1755_v16 = vor.u32 %v2436_v63, %v1752_v0  ;;  %v2456_v14 = vld [vmem:[#allocation6 + $0x124] sm:$0xf]  ;;  %v1896_v19 = vld [vmem:[#allocation6 + $0x1a8] sm:$0xf0] }
  0x67   :  { %1208 = vmatpush.bf16.msra.mxu0 %v2231_v11  ;;  %v2263_v11 = vor.u32 %v2565_v59, %v2262_v55  ;;  %v1939_v21 = vor.u32 %v2482_v4, %v1936_v5  ;;  %v2476_v55 = vld [vmem:[#allocation6 + $0x1c4] sm:$0xf]  ;;  %v1904_v5 = vld [vmem:[#allocation6 + $0x1b8] sm:$0xf0] }
  0x68   :  { %1222 = vmatpush.bf16.msra.mxu1 %v2295_v12  ;;  %v1691_v12 = vor.u32 %v2420_v60, %v1688_v61  ;;  %v2492_v59 = vld [vmem:[#allocation6 + $0x244] sm:$0xf]  ;;  %v1976_v60 = vld [vmem:[#allocation6 + $0x248] sm:$0xf0]  ;;  %v1888_v33 = vld [vmem:[#allocation6 + $0x198] sm:$0xf0] }
  0x69   :  { %1236 = vmatpush.bf16.msra.mxu2 %v1723_v13  ;;  %v2064_v13 = vld [vmem:[#allocation6 + $0x2f8] sm:$0xf0]  ;;  %v2508_v61 = vld [vmem:[#allocation6 + $0x2c4] sm:$0xf]  ;;  %v1979_v0 = vor.u32 %v2492_v59, %v1976_v60  ;;  %v2562_v60 = vld [vmem:[#allocation6 + $0x474] sm:$0xf] }
  0x6a   :  { %1250 = vmatpush.bf16.msra.mxu3 %v1787_v18  ;;  %v1875_v18 = vor.u32 %v2466_v2, %v1872_v3  ;;  %v1840_v2 = vld [vmem:[#allocation6 + $0x138] sm:$0xf0]  ;;  %v2474_v3 = vld [vmem:[#allocation6 + $0x1b4] sm:$0xf]  ;;  %v2488_v20 = vld [vmem:[#allocation6 + $0x224] sm:$0xf] }
  0x6b   :  { %1209 = vmatpush.bf16.msra.mxu0 %v2223_v24  ;;  %v1864_v24 = vld [vmem:[#allocation6 + $0x168] sm:$0xf0]  ;;  %v2192_v59 = vld [vmem:[#allocation6 + $0x3f8] sm:$0xf0] }
  0x6c   :  { %1223 = vmatpush.bf16.msra.mxu1 %v2287_v25  ;;  %v2480_v25 = vld [vmem:[#allocation6 + $0x1e4] sm:$0xf]  ;;  %v1867_v34 = vor.u32 %v2464_v23, %v1864_v24  ;;  %v2024_v23 = vld [vmem:[#allocation6 + $0x2a8] sm:$0xf0]  ;;  %v1835_v24 = vor.u32 %v2456_v14, %v1832_v15 }
  0x6d   :  { %1237 = vmatpush.bf16.msra.mxu2 %v1715_v26  ;;  %v2067_v26 = vor.u32 %v2514_v9, %v2064_v13  ;;  %v1931_v35 = vor.u32 %v2480_v25, %v1928_v28  ;;  %v2032_v9 = vld [vmem:[#allocation6 + $0x2b8] sm:$0xf0]  ;;  %v2454_v28 = vld [vmem:[#allocation6 + $0x114] sm:$0xf]  ;;  %v2312_v14 = vld [vmem:[#allocation6 + $0x4e8] sm:$0xf0] }
  0x6e   :  { %1251 = vmatpush.bf16.msra.mxu3 %v1779_v30  ;;  %v1992_v30 = vld [vmem:[#allocation6 + $0x268] sm:$0xf0] }
  0x6f   :  { %1210 = vmatpush.bf16.msra.mxu0 %v2215_v36  ;;  %v1995_v36 = vor.u32 %v2496_v29, %v1992_v30  ;;  %v1824_v29 = vld [vmem:[#allocation6 + $0x118] sm:$0xf0]  ;;  %v2470_v30 = vld [vmem:[#allocation6 + $0x194] sm:$0xf] }
  0x70   :  { %1224 = vmatpush.bf16.msra.mxu1 %v2279_v37  ;;  %v2462_v37 = vld [vmem:[#allocation6 + $0x154] sm:$0xf] }
  0x71   :  { %1238 = vmatpush.bf16.msra.mxu2 %v1707_v38  ;;  %v1856_v38 = vld [vmem:[#allocation6 + $0x158] sm:$0xf0] }
  0x72   :  { %1252 = vmatpush.bf16.msra.mxu3 %v1771_v45  ;;  %v2494_v45 = vld [vmem:[#allocation6 + $0x254] sm:$0xf]  ;;  %v1859_v50 = vor.u32 %v2462_v37, %v1856_v38  ;;  %v2016_v37 = vld [vmem:[#allocation6 + $0x298] sm:$0xf0]  ;;  %v1827_v38 = vor.u32 %v2454_v28, %v1824_v29 }
  0x73   :  { %1211 = vmatpush.bf16.msra.mxu0 %v2207_v52  ;;  %v1923_v52 = vor.u32 %v2478_v40, %v1920_v42  ;;  %v1987_v53 = vor.u32 %v2494_v45, %v1984_v46  ;;  %v2452_v40 = vld [vmem:[#allocation6 + $0x104] sm:$0xf]  ;;  %v1891_v42 = vor.u32 %v2470_v30, %v1888_v33  ;;  %v2304_v28 = vld [vmem:[#allocation6 + $0x4d8] sm:$0xf0] }
  0x74   :  { %1225 = vmatpush.bf16.msra.mxu1 %v2271_v56  ;;  %v1912_v56 = vld [vmem:[#allocation6 + $0x1c8] sm:$0xf0]  ;;  %v2468_v46 = vld [vmem:[#allocation6 + $0x184] sm:$0xf] }
  0x75   :  { %1239 = vmatpush.bf16.msra.mxu2 %v1699_v57  ;;  %v2051_v57 = vor.u32 %v2510_v48, %v2048_v49  ;;  %v1915_v63 = vor.u32 %v2476_v55, %v1912_v56  ;;  %v1880_v48 = vld [vmem:[#allocation6 + $0x188] sm:$0xf0]  ;;  %v2484_v49 = vld [vmem:[#allocation6 + $0x204] sm:$0xf]  ;;  %v2128_v55 = vld [vmem:[#allocation6 + $0x378] sm:$0xf0] }
  0x76   :  { %1253 = vmatpush.bf16.msra.mxu3 %v1763_v62  ;;  %v2040_v62 = vld [vmem:[#allocation6 + $0x2c8] sm:$0xf0]  ;;  %v2546_v56 = vld [vmem:[#allocation6 + $0x3f4] sm:$0xf]  ;;  %v2524_v33 = vld [vmem:[#allocation6 + $0x344] sm:$0xf] }
  0x77   :  { %1212 = vmatpush.bf16.msra.mxu0 %v2199_v6  ;;  %v2043_v4 = vor.u32 %v2508_v61, %v2040_v62  ;;  %v2490_v6 = vld [vmem:[#allocation6 + $0x234] sm:$0xf]  ;;  %v2256_v61 = vld [vmem:[#allocation6 + $0x478] sm:$0xf0]  ;;  %v1883_v62 = vor.u32 %v2468_v46, %v1880_v48 }
  0x78   :  { %1226 = vmatpush.bf16.msra.mxu1 %v2263_v11  ;;  %v1971_v13 = vor.u32 %v2490_v6, %v1968_v7  ;;  %v2120_v6 = vld [vmem:[#allocation6 + $0x368] sm:$0xf0]  ;;  %v2544_v7 = vld [vmem:[#allocation6 + $0x3e4] sm:$0xf]  ;;  %v2538_v46 = vld [vmem:[#allocation6 + $0x3b4] sm:$0xf] }
  0x79   :  { %1240 = vmatpush.bf16.msra.mxu2 %v1691_v12  ;;  %v1907_v12 = vor.u32 %v2474_v3, %v1904_v5  ;;  %v2195_v3 = vor.u32 %v2546_v56, %v2192_v59  ;;  %v2528_v5 = vld [vmem:[#allocation6 + $0x364] sm:$0xf]  ;;  %v2088_v59 = vld [vmem:[#allocation6 + $0x328] sm:$0xf0] }
  0x7a   :  { %1254 = vmatpush.bf16.msra.mxu3 %v1755_v16  ;;  %1213 = vmatmul.bf16.vlgmr.msra.gmra.mxu0 %v2864_v27  ;;  %v2472_v16 = vld [vmem:[#allocation6 + $0x1a4] sm:$0xf]  ;;  %v2123_v15 = vor.u32 %v2528_v5, %v2120_v6  ;;  %v2518_v5 = vld [vmem:[#allocation6 + $0x314] sm:$0xf]  ;;  %v2080_v6 = vld [vmem:[#allocation6 + $0x318] sm:$0xf0] }
  0x7b   :  { %1261 = vmatpush.bf16.msrb.mxu0 %v1875_v18  ;;  %1227 = vmatmul.bf16.vlgmr.msra.gmra.mxu1 %v2866_v31  ;;  %v2035_v18 = vor.u32 %v2506_v8, %v2032_v9  ;;  %v1899_v25 = vor.u32 %v2472_v16, %v1896_v19  ;;  %v2184_v9 = vld [vmem:[#allocation6 + $0x3e8] sm:$0xf0]  ;;  %v2526_v19 = vld [vmem:[#allocation6 + $0x354] sm:$0xf] }
  0x7c   :  { %1275 = vmatpush.bf16.msrb.mxu1 %v1939_v21  ;;  %1241 = vmatmul.bf16.vlgmr.msra.gmra.mxu2 %v2840_v58  ;;  %v1851_v58 = vor.u32 %v2460_v51, %v1848_v54  ;;  %v1960_v21 = vld [vmem:[#allocation6 + $0x228] sm:$0xf0]  ;;  %v2530_v54 = vld [vmem:[#allocation6 + $0x374] sm:$0xf]  ;;  %v2187_v16 = vor.u32 %v2544_v7, %v2184_v9  ;;  %v2144_v9 = vld [vmem:[#allocation6 + $0x398] sm:$0xf0] }
  0x7d   :  { %1289 = vmatpush.bf16.msrb.mxu2 %v2003_v22  ;;  %1255 = vmatmul.bf16.vlgmr.msra.gmra.mxu3 %v2846_v10  ;;  %v2458_v10 = vld [vmem:[#allocation6 + $0x134] sm:$0xf]  ;;  %v2504_v22 = vld [vmem:[#allocation6 + $0x2a4] sm:$0xf]  ;;  %v1944_v51 = vld [vmem:[#allocation6 + $0x208] sm:$0xf0] }
  0x7e   :  { %1303 = vmatpush.bf16.msrb.mxu3 %v2067_v26  ;;  %v1843_v11 = vor.u32 %v2458_v10, %v1840_v2  ;;  %v1963_v26 = vor.u32 %v2488_v20, %v1960_v21  ;;  %v2027_v32 = vor.u32 %v2504_v22, %v2024_v23  ;;  %v2131_v2 = vor.u32 %v2530_v54, %v2128_v55  ;;  %v2112_v20 = vld [vmem:[#allocation6 + $0x358] sm:$0xf0]  ;;  %v2542_v21 = vld [vmem:[#allocation6 + $0x3d4] sm:$0xf] }
  0x7f   :  { %1262 = vmatpush.bf16.msrb.mxu0 %v1867_v34  ;;  %v2486_v34 = vld [vmem:[#allocation6 + $0x214] sm:$0xf]  ;;  %v2176_v23 = vld [vmem:[#allocation6 + $0x3d8] sm:$0xf0]  ;;  %v2115_v29 = vor.u32 %v2526_v19, %v2112_v20  ;;  %v2516_v19 = vld [vmem:[#allocation6 + $0x304] sm:$0xf] }
  0x80   :  { %1276 = vmatpush.bf16.msrb.mxu1 %v1931_v35  ;;  %v1952_v35 = vld [vmem:[#allocation6 + $0x218] sm:$0xf0]  ;;  %v2179_v30 = vor.u32 %v2542_v21, %v2176_v23  ;;  %v2534_v7 = vld [vmem:[#allocation6 + $0x394] sm:$0xf]  ;;  %v2072_v20 = vld [vmem:[#allocation6 + $0x308] sm:$0xf0] }
  0x81   :  { %1290 = vmatpush.bf16.msrb.mxu2 %v1995_v36  ;;  %v2502_v36 = vld [vmem:[#allocation6 + $0x294] sm:$0xf]  ;;  %v1955_v45 = vor.u32 %v2486_v34, %v1952_v35  ;;  %v2540_v34 = vld [vmem:[#allocation6 + $0x3c4] sm:$0xf]  ;;  %v2136_v23 = vld [vmem:[#allocation6 + $0x388] sm:$0xf0] }
  0x82   :  { %1304 = vmatpush.bf16.msrb.mxu3 %v2059_v41  ;;  %v1816_v41 = vld [vmem:[#allocation6 + $0x108] sm:$0xf0]  ;;  %v2532_v21 = vld [vmem:[#allocation6 + $0x384] sm:$0xf] }
  0x83   :  { %1263 = vmatpush.bf16.msrb.mxu0 %v1859_v50  ;;  %v2019_v50 = vor.u32 %v2502_v36, %v2016_v37  ;;  %v2168_v36 = vld [vmem:[#allocation6 + $0x3c8] sm:$0xf0]  ;;  %v2556_v37 = vld [vmem:[#allocation6 + $0x444] sm:$0xf] }
  0x84   :  { %1277 = vmatpush.bf16.msrb.mxu1 %v1923_v52  ;;  %v2500_v52 = vld [vmem:[#allocation6 + $0x284] sm:$0xf] }
  0x85   :  { %1291 = vmatpush.bf16.msrb.mxu2 %v1987_v53  ;;  %v2008_v53 = vld [vmem:[#allocation6 + $0x288] sm:$0xf0] }
  0x86   :  { %1305 = vmatpush.bf16.msrb.mxu3 %v2051_v57  ;;  %v1819_v57 = vor.u32 %v2452_v40, %v1816_v41  ;;  %v2011_v10 = vor.u32 %v2500_v52, %v2008_v53  ;;  %v2570_v52 = vld [vmem:[#allocation6 + $0x4b4] sm:$0xf]  ;;  %v2288_v53 = vld [vmem:[#allocation6 + $0x4b8] sm:$0xf0] }
  0x87   :  { %1264 = vmatpush.bf16.msrb.mxu0 %v1851_v58  ;;  %v1947_v58 = vor.u32 %v2484_v49, %v1944_v51  ;;  %v2160_v49 = vld [vmem:[#allocation6 + $0x3b8] sm:$0xf0] }
  0x88   :  { %1278 = vmatpush.bf16.msrb.mxu1 %v1915_v63  ;;  %v2578_v63 = vld [vmem:[#allocation6 + $0x4f4] sm:$0xf]  ;;  %v2224_v51 = vld [vmem:[#allocation6 + $0x438] sm:$0xf0]  ;;  %v2163_v55 = vor.u32 %v2538_v46, %v2160_v49 }
  0x89   :  { %1292 = vmatpush.bf16.msrb.mxu2 %v1979_v0  ;;  %v2320_v0 = vld [vmem:[#allocation6 + $0x4f8] sm:$0xf0] }
  0x8a   :  { %1306 = vmatpush.bf16.msrb.mxu3 %v2043_v4  ;;  %v2259_v4 = vor.u32 %v2562_v60, %v2256_v61  ;;  %v2323_v8 = vor.u32 %v2578_v63, %v2320_v0  ;;  %v2536_v60 = vld [vmem:[#allocation6 + $0x3a4] sm:$0xf]  ;;  %v2291_v61 = vor.u32 %v2570_v52, %v2288_v53  ;;  %v2216_v63 = vld [vmem:[#allocation6 + $0x428] sm:$0xf0] }
  0x8b   :  { %1265 = vmatpush.bf16.msrb.mxu0 %v1843_v11  ;;  %v2560_v11 = vld [vmem:[#allocation6 + $0x464] sm:$0xf] }
  0x8c   :  { %1279 = vmatpush.bf16.msrb.mxu1 %v1907_v12  ;;  %v2248_v12 = vld [vmem:[#allocation6 + $0x468] sm:$0xf0]  ;;  %v2568_v0 = vld [vmem:[#allocation6 + $0x4a4] sm:$0xf] }
  0x8d   :  { %1293 = vmatpush.bf16.msrb.mxu2 %v1971_v13  ;;  %v2576_v13 = vld [vmem:[#allocation6 + $0x4e4] sm:$0xf] }
  0x8e   :  { %1307 = vmatpush.bf16.msrb.mxu3 %v2035_v18  ;;  %v2251_v18 = vor.u32 %v2560_v11, %v2248_v12  ;;  %v2315_v22 = vor.u32 %v2576_v13, %v2312_v14  ;;  %v2550_v11 = vld [vmem:[#allocation6 + $0x414] sm:$0xf]  ;;  %v2208_v12 = vld [vmem:[#allocation6 + $0x418] sm:$0xf0] }
  0x8f   :  { %1266 = vmatpush.bf16.msrb.mxu0 %v1835_v24  ;;  %v2558_v24 = vld [vmem:[#allocation6 + $0x454] sm:$0xf]  ;;  %v2272_v14 = vld [vmem:[#allocation6 + $0x498] sm:$0xf0] }
  0x90   :  { %1280 = vmatpush.bf16.msrb.mxu1 %v1899_v25  ;;  %v2240_v25 = vld [vmem:[#allocation6 + $0x458] sm:$0xf0]  ;;  %v2566_v13 = vld [vmem:[#allocation6 + $0x494] sm:$0xf] }
  0x91   :  { %1294 = vmatpush.bf16.msrb.mxu2 %v1963_v26  ;;  %v2574_v26 = vld [vmem:[#allocation6 + $0x4d4] sm:$0xf] }
  0x92   :  { %1308 = vmatpush.bf16.msrb.mxu3 %v2027_v32  ;;  %v2243_v32 = vor.u32 %v2558_v24, %v2240_v25  ;;  %v2307_v35 = vor.u32 %v2574_v26, %v2304_v28  ;;  %v2548_v24 = vld [vmem:[#allocation6 + $0x404] sm:$0xf]  ;;  %v2200_v25 = vld [vmem:[#allocation6 + $0x408] sm:$0xf0] }
  0x93   :  { %1267 = vmatpush.bf16.msrb.mxu0 %v1827_v38  ;;  %v2572_v38 = vld [vmem:[#allocation6 + $0x4c4] sm:$0xf]  ;;  %v2264_v28 = vld [vmem:[#allocation6 + $0x488] sm:$0xf0] }
  0x94   :  { %1281 = vmatpush.bf16.msrb.mxu1 %v1891_v42  ;;  %v2522_v42 = vld [vmem:[#allocation6 + $0x334] sm:$0xf]  ;;  %v2564_v26 = vld [vmem:[#allocation6 + $0x484] sm:$0xf] }
  0x95   :  { %1295 = vmatpush.bf16.msrb.mxu2 %v1955_v45  ;;  %v2096_v45 = vld [vmem:[#allocation6 + $0x338] sm:$0xf0] }
  0x96   :  { %1309 = vmatpush.bf16.msrb.mxu3 %v2019_v50  ;;  %v2554_v50 = vld [vmem:[#allocation6 + $0x434] sm:$0xf]  ;;  %v2099_v54 = vor.u32 %v2522_v42, %v2096_v45  ;;  %v2581_v42 = vld [vmem:[#allocation9 + $0x8] sm:$0xff] }
  0x97   :  { %1268 = vmatpush.bf16.msrb.mxu0 %v1819_v57  ;;  %v2227_v56 = vor.u32 %v2554_v50, %v2224_v51  ;;  %v2520_v57 = vld [vmem:[#allocation6 + $0x324] sm:$0xf] }
  0x98   :  { %1282 = vmatpush.bf16.msrb.mxu1 %v1883_v62  ;;  %v2152_v62 = vld [vmem:[#allocation6 + $0x3a8] sm:$0xf0]  ;;  %v2580_v50 = vld [vmem:[#allocation9] sm:$0xff] }
  0x99   :  { %1296 = vmatpush.bf16.msrb.mxu2 %v1947_v58  ;;  %v2552_v58 = vld [vmem:[#allocation6 + $0x424] sm:$0xf] }
  0x9a   :  { %1310 = vmatpush.bf16.msrb.mxu3 %v2011_v10  ;;  %1269 = vmatmul.bf16.vlgmr.msrb.gmra.mxu0 %v2842_v1  ;;  %v2104_v1 = vld [vmem:[#allocation6 + $0x348] sm:$0xf0] }
  0x9b   :  { %1317 = vmatpush.bf16.msra.mxu0 %v2131_v2  ;;  %1283 = vmatmul.bf16.vlgmr.msrb.gmra.mxu1 %v2848_v17  ;;  %v2296_v17 = vld [vmem:[#allocation6 + $0x4c8] sm:$0xf0]  ;;  %v2107_v40 = vor.u32 %v2524_v33, %v2104_v1  ;;  %v2091_v2 = vor.u32 %v2520_v57, %v2088_v59  ;;  %v2267_v33 = vor.u32 %v2564_v26, %v2264_v28  ;;  %v2587_v1 = vld [vmem:[#allocation9 + $0x38] sm:$0xff]  ;;  %v2592_v26 = vld [vmem:[#allocation9 + $0x60] sm:$0xff] }
  0x9c   :  { %1331 = vmatpush.bf16.msra.mxu1 %v2195_v3  ;;  %1297 = vmatmul.bf16.vlgmr.msrb.gmra.mxu2 %v2852_v39  ;;  %v2232_v39 = vld [vmem:[#allocation6 + $0x448] sm:$0xf0]  ;;  %v2299_v48 = vor.u32 %v2572_v38, %v2296_v17  ;;  %v2155_v3 = vor.u32 %v2536_v60, %v2152_v62  ;;  %v2591_v28 = vld [vmem:[#allocation9 + $0x58] sm:$0xff] }
  0x9d   :  { %1345 = vmatpush.bf16.msra.mxu2 %v2259_v4  ;;  %1311 = vmatmul.bf16.vlgmr.msrb.gmra.mxu3 %v2856_v44  ;;  %v2171_v44 = vor.u32 %v2540_v34, %v2168_v36  ;;  %v2235_v41 = vor.u32 %v2556_v37, %v2232_v39  ;;  %v2280_v10 = vld [vmem:[#allocation6 + $0x4a8] sm:$0xf0]  ;;  %v2219_v4 = vor.u32 %v2552_v58, %v2216_v63  ;;  %v2586_v34 = vld [vmem:[#allocation9 + $0x30] sm:$0xff]  ;;  %v2584_v39 = vld [vmem:[#allocation9 + $0x20] sm:$0xff] }
  0x9e   :  { %1359 = vmatpush.bf16.msra.mxu3 %v2323_v8  ;;  %v2283_v8 = vor.u32 %v2568_v0, %v2280_v10  ;;  %v2585_v36 = vld [vmem:[#allocation9 + $0x28] sm:$0xff] }
  0x9f   :  { %1318 = vmatpush.bf16.msra.mxu0 %v2123_v15  ;;  %v2083_v15 = vor.u32 %v2518_v5, %v2080_v6  ;;  %v2880_v6 = vld [vmem:[#allocation8] sm:$0x3] }
  0xa0   :  { %1332 = vmatpush.bf16.msra.mxu1 %v2187_v16  ;;  %v2147_v16 = vor.u32 %v2534_v7, %v2144_v9  ;;  %v1402_v9 = vperm.slane %v2880_v6, 0 }
  0xa1   :  { %1346 = vmatpush.bf16.msra.mxu2 %v2251_v18  ;;  %v2211_v18 = vor.u32 %v2550_v11, %v2208_v12 }
  0xa2   :  { %1360 = vmatpush.bf16.msra.mxu3 %v2315_v22  ;;  %v2275_v22 = vor.u32 %v2566_v13, %v2272_v14 }
  0xa3   :  { %1319 = vmatpush.bf16.msra.mxu0 %v2115_v29  ;;  %v2075_v29 = vor.u32 %v2516_v19, %v2072_v20  ;;  %v2595_v20 = vld [vmem:[#allocation9 + $0x78] sm:$0xff] }
  0xa4   :  { %1333 = vmatpush.bf16.msra.mxu1 %v2179_v30  ;;  %v2139_v30 = vor.u32 %v2532_v21, %v2136_v23 }
  0xa5   :  { %1347 = vmatpush.bf16.msra.mxu2 %v2243_v32  ;;  %v2203_v32 = vor.u32 %v2548_v24, %v2200_v25  ;;  %v2593_v25 = vld [vmem:[#allocation9 + $0x68] sm:$0xff] }
  0xa6   :  { %1361 = vmatpush.bf16.msra.mxu3 %v2307_v35 }
  0xa7   :  { %1320 = vmatpush.bf16.msra.mxu0 %v2107_v40 }
  0xa8   :  { %1334 = vmatpush.bf16.msra.mxu1 %v2171_v44 }
  0xa9   :  { %1348 = vmatpush.bf16.msra.mxu2 %v2235_v41 }
  0xaa   :  { %1362 = vmatpush.bf16.msra.mxu3 %v2299_v48 }
  0xab   :  { %1321 = vmatpush.bf16.msra.mxu0 %v2099_v54 }
  0xac   :  { %1335 = vmatpush.bf16.msra.mxu1 %v2163_v55 }
  0xad   :  { %1349 = vmatpush.bf16.msra.mxu2 %v2227_v56 }
  0xae   :  { %1363 = vmatpush.bf16.msra.mxu3 %v2291_v61 }
  0xaf   :  { %1322 = vmatpush.bf16.msra.mxu0 %v2091_v2 }
  0xb0   :  { %1336 = vmatpush.bf16.msra.mxu1 %v2155_v3 }
  0xb1   :  { %1350 = vmatpush.bf16.msra.mxu2 %v2219_v4 }
  0xb2   :  { %1364 = vmatpush.bf16.msra.mxu3 %v2283_v8 }
  0xb3   :  { %1323 = vmatpush.bf16.msra.mxu0 %v2083_v15 }
  0xb4   :  { %1337 = vmatpush.bf16.msra.mxu1 %v2147_v16 }
  0xb5   :  { %1351 = vmatpush.bf16.msra.mxu2 %v2211_v18 }
  0xb6   :  { %1365 = vmatpush.bf16.msra.mxu3 %v2275_v22  ;;  %v2594_v22 = vld [vmem:[#allocation9 + $0x70] sm:$0xff] }
  0xb7   :  { %1324 = vmatpush.bf16.msra.mxu0 %v2075_v29  ;;  %v1102_v35 = vpop.f32.mrf.mxu0 }
  0xb8   :  { %1338 = vmatpush.bf16.msra.mxu1 %v2139_v30  ;;  %v1116_v37 = vpop.f32.mrf.mxu1 }
  0xb9   :  { %1352 = vmatpush.bf16.msra.mxu2 %v2203_v32 }
  0xba   :  { %1366 = vmatpush.bf16.msra.mxu3 %v2267_v33  ;;  %1325 = vmatmul.bf16.vlgmr.msra.gmra.mxu0 %v2854_v43  ;;  %v2583_v43 = vld [vmem:[#allocation9 + $0x18] sm:$0xff]  ;;  %v2590_v33 = vld [vmem:[#allocation9 + $0x50] sm:$0xff] }
  0xbb   :  { %1339 = vmatmul.bf16.vlgmr.msra.gmra.mxu1 %v2858_v47  ;;  %1548 = vmatpush.bf16.msrb.mxu0 %v2587_v1  ;;  %v1117_v47 = vadd.f32 %v1116_v37, %v1102_v35  ;;  %v2589_v35 = vld [vmem:[#allocation9 + $0x48] sm:$0xff] }
  0xbc   :  { %1353 = vmatmul.bf16.vlgmr.msra.gmra.mxu2 %v2864_v27  ;;  %v2582_v27 = vld [vmem:[#allocation9 + $0x10] sm:$0xff]  ;;  %1562 = vmatpush.bf16.msrb.mxu1 %v2595_v20 }
  0xbd   :  { %1367 = vmatmul.bf16.vlgmr.msra.gmra.mxu3 %v2866_v31 }
  0xbf   :  { %1549 = vmatpush.bf16.msrb.mxu0 %v2586_v34  ;;  %v1130_v38 = vpop.f32.mrf.mxu2  ;;  %v1104_v17 = vpop.f32.mrf.mxu0 }
  0xc0   :  { %v1118_v40 = vpop.f32.mrf.mxu1  ;;  %v1144_v44 = vpop.f32.mrf.mxu3  ;;  %v1131_v41 = vadd.f32 %v1130_v38, %v1117_v47  ;;  %1563 = vmatpush.bf16.msrb.mxu1 %v2594_v22  ;;  %v2588_v38 = vld [vmem:[#allocation9 + $0x40] sm:$0xff] }
  0xc1   :  { %v1119_v51 = vadd.f32 %v1118_v40, %v1104_v17 }
  0xc2   :  { %v1145_v49 = vadd.f32 %v1144_v44, %v1131_v41 }
  0xc3   :  { %1550 = vmatpush.bf16.msrb.mxu0 %v2585_v36 }
  0xc4   :  { %1564 = vmatpush.bf16.msrb.mxu1 %v2593_v25 }
  0xc7   :  { %1551 = vmatpush.bf16.msrb.mxu0 %v2584_v39  ;;  %v1132_v31 = vpop.f32.mrf.mxu2 }
  0xc8   :  { %v1146_v48 = vpop.f32.mrf.mxu3  ;;  %v1133_v54 = vadd.f32 %v1132_v31, %v1119_v51  ;;  %1565 = vmatpush.bf16.msrb.mxu1 %v2592_v26 }
  0xca   :  { %v1147_v60 = vadd.f32 %v1146_v48, %v1133_v54 }
  0xcb   :  { %1552 = vmatpush.bf16.msrb.mxu0 %v2583_v43 }
  0xcc   :  { %1566 = vmatpush.bf16.msrb.mxu1 %v2591_v28 }
  0xcf   :  { %1553 = vmatpush.bf16.msrb.mxu0 %v2582_v27 }
  0xd0   :  { %1567 = vmatpush.bf16.msrb.mxu1 %v2590_v33 }
  0xd3   :  { %1554 = vmatpush.bf16.msrb.mxu0 %v2581_v42 }
  0xd4   :  { %1568 = vmatpush.bf16.msrb.mxu1 %v2589_v35 }
  0xd7   :  { %v1158_v45 = vpop.f32.mrf.mxu0  ;;  %1555 = vmatpush.bf16.msrb.mxu0 %v2580_v50 }
  0xd8   :  { %v1172_v46 = vpop.f32.mrf.mxu1  ;;  %v1159_v52 = vadd.f32 %v1158_v45, %v1145_v49  ;;  %1569 = vmatpush.bf16.msrb.mxu1 %v2588_v38 }
  0xda   :  { %v1173_v56 = vadd.f32 %v1172_v46, %v1159_v52 }
  0xdf   :  { %v1186_v53 = vpop.f32.mrf.mxu2  ;;  %v1160_v55 = vpop.f32.mrf.mxu0 }
  0xe0   :  { %v1174_v57 = vpop.f32.mrf.mxu1  ;;  %v1200_v59 = vpop.f32.mrf.mxu3  ;;  %v1187_v61 = vadd.f32 %v1186_v53, %v1173_v56  ;;  %v1161_v62 = vadd.f32 %v1160_v55, %v1147_v60 }
  0xe2   :  { %v1201_v0 = vadd.f32 %v1200_v59, %v1187_v61  ;;  %v1175_v10 = vadd.f32 %v1174_v57, %v1161_v62  ;;  %v1403_v61 = vperm.slane %v2880_v6, 1  ;;  %v2599_v6 = vld [vmem:[#allocation11 + $0x18] sm:$0xff] }
  0xe7   :  { %v1188_v58 = vpop.f32.mrf.mxu2 }
  0xe8   :  { %v1189_v3 = vadd.f32 %v1188_v58, %v1175_v10  ;;  %v1202_v5 = vpop.f32.mrf.mxu3 }
  0xea   :  { %v1203_v7 = vadd.f32 %v1202_v5, %v1189_v3 }
  0xf7   :  { %v1214_v63 = vpop.f32.mrf.mxu0 }
  0xf8   :  { %v1228_v2 = vpop.f32.mrf.mxu1  ;;  %v1215_v4 = vadd.f32 %v1214_v63, %v1201_v0 }
  0xfa   :  { %v1229_v8 = vadd.f32 %v1228_v2, %v1215_v4 }
  0xfc   :  { %v1406_v14 = vadd.f32 %v1402_v9, %v1229_v8  ;;  %v2603_v8 = vld [vmem:[#allocation11 + $0x38] sm:$0xff] }
  0xfd   :  { %1647 = vmatpush.bf16.msrb.mxu2 %v2603_v8 }
  0xfe   :  { %v1410_v18 = vmax.f32 %v1406_v14, 0.0  ;;  %v2597_v14 = vld [vmem:[#allocation11 + $0x8] sm:$0xff] }
  0xff   :  { %v1216_v11 = vpop.f32.mrf.mxu0  ;;  %v1242_v23 = vpop.f32.mrf.mxu2 }
 0x100   :  { %v1217_v12 = vadd.f32 %v1216_v11, %v1203_v7  ;;  %v1230_v13 = vpop.f32.mrf.mxu1  ;;  %v1256_v24 = vpop.f32.mrf.mxu3  ;;  %v2601_v11 = vld [vmem:[#allocation11 + $0x28] sm:$0xff] }
 0x101   :  { %v1257_v34 = vadd.f32 %v1256_v24, %v1242_v23 }
 0x102   :  { %v1231_v15 = vadd.f32 %v1230_v13, %v1217_v12  ;;  %v2600_v12 = vld [vmem:[#allocation11 + $0x20] sm:$0xff]  ;;  %v2598_v13 = vld [vmem:[#allocation11 + $0x10] sm:$0xff] }
 0x104   :  { %v1408_v16 = vadd.f32 %v1402_v9, %v1231_v15  ;;  %v2602_v9 = vld [vmem:[#allocation11 + $0x30] sm:$0xff]  ;;  %v2596_v15 = vld [vmem:[#allocation11] sm:$0xff] }
 0x105   :  { %1648 = vmatpush.bf16.msrb.mxu2 %v2602_v9 }
 0x106   :  { %v1412_v19 = vmax.f32 %v1408_v16, 0.0 }
 0x107   :  { %v1244_v29 = vpop.f32.mrf.mxu2 }
 0x108   :  { %v1447_v21 = vpack.c.bf16 %v1412_v19, %v1410_v18  ;;  %v1258_v30 = vpop.f32.mrf.mxu3  ;;  %v2616_v19 = vld [vmem:[%s2900_s4] ss:$0 sm:$0xff] }
 0x109   :  { %v1259_v44 = vadd.f32 %v1258_v30, %v1244_v29  ;;  %1649 = vmatpush.bf16.msrb.mxu2 %v2601_v11  ;;  %v2617_v30 = vld [vmem:[%s2902_s6] ss:$0 sm:$0xff] }
 0x10a   :  { %1556 = vmatmul.bf16.vlgmr.msrb.gmra.mxu0 %v1447_v21 }
 0x10d   :  { %1650 = vmatpush.bf16.msrb.mxu2 %v2600_v12 }
 0x111   :  { %1651 = vmatpush.bf16.msrb.mxu2 %v2599_v6 }
 0x115   :  { %1652 = vmatpush.bf16.msrb.mxu2 %v2598_v13 }
 0x117   :  { %v1270_v32 = vpop.f32.mrf.mxu0 }
 0x118   :  { %v1284_v1 = vpop.f32.mrf.mxu1  ;;  %v1271_v37 = vadd.f32 %v1270_v32, %v1257_v34 }
 0x119   :  { %1653 = vmatpush.bf16.msrb.mxu2 %v2597_v14 }
 0x11a   :  { %v1285_v40 = vadd.f32 %v1284_v1, %v1271_v37 }
 0x11d   :  { %1654 = vmatpush.bf16.msrb.mxu2 %v2596_v15 }
 0x11f   :  { %v1298_v36 = vpop.f32.mrf.mxu2  ;;  %v1272_v17 = vpop.f32.mrf.mxu0 }
 0x120   :  { %v1312_v39 = vpop.f32.mrf.mxu3  ;;  %v1286_v43 = vpop.f32.mrf.mxu1  ;;  %v1299_v47 = vadd.f32 %v1298_v36, %v1285_v40  ;;  %v1273_v27 = vadd.f32 %v1272_v17, %v1259_v44 }
 0x122   :  { %v1313_v45 = vadd.f32 %v1312_v39, %v1299_v47  ;;  %v1287_v46 = vadd.f32 %v1286_v43, %v1273_v27 }
 0x127   :  { %v1300_v31 = vpop.f32.mrf.mxu2 }
 0x128   :  { %v1314_v41 = vpop.f32.mrf.mxu3  ;;  %v1301_v49 = vadd.f32 %v1300_v31, %v1287_v46 }
 0x12a   :  { %v1315_v52 = vadd.f32 %v1314_v41, %v1301_v49 }
 0x137   :  { %v1326_v42 = vpop.f32.mrf.mxu0 }
 0x138   :  { %v1340_v48 = vpop.f32.mrf.mxu1  ;;  %v1327_v50 = vadd.f32 %v1326_v42, %v1313_v45 }
 0x13a   :  { %v1341_v53 = vadd.f32 %v1340_v48, %v1327_v50 }
 0x13f   :  { %v1354_v51 = vpop.f32.mrf.mxu2  ;;  %v1328_v55 = vpop.f32.mrf.mxu0 }
 0x140   :  { %v1368_v54 = vpop.f32.mrf.mxu3  ;;  %v1355_v56 = vadd.f32 %v1354_v51, %v1341_v53  ;;  %v1329_v57 = vadd.f32 %v1328_v55, %v1315_v52  ;;  %v1342_v59 = vpop.f32.mrf.mxu1 }
 0x142   :  { %v1369_v60 = vadd.f32 %v1368_v54, %v1355_v56  ;;  %v1343_v62 = vadd.f32 %v1342_v59, %v1329_v57 }
 0x144   :  { %v1407_v10 = vadd.f32 %v1403_v61, %v1369_v60 }
 0x146   :  { %v1411_v4 = vmax.f32 %v1407_v10, 0.0 }
 0x147   :  { %v1356_v58 = vpop.f32.mrf.mxu2 }
 0x148   :  { %v1357_v63 = vadd.f32 %v1356_v58, %v1343_v62  ;;  %v1370_v0 = vpop.f32.mrf.mxu3 }
 0x14a   :  { %v1371_v2 = vadd.f32 %v1370_v0, %v1357_v63 }
 0x14c   :  { %v1409_v3 = vadd.f32 %v1403_v61, %v1371_v2 }
 0x14e   :  { %v1413_v5 = vmax.f32 %v1409_v3, 0.0 }
 0x150   :  { %v1448_v7 = vpack.c.bf16 %v1413_v5, %v1411_v4 }
 0x152   :  { %1570 = vmatmul.bf16.vlgmr.msrb.gmra.mxu1 %v1448_v7 }
 0x187   :  { %v1557_v16 = vpop.f32.mrf.mxu0 }
 0x188   :  { %v1558_v21 = vadd.f32 %v2616_v19, %v1557_v16 }
 0x18f   :  { %v1559_v20 = vpop.f32.mrf.mxu0 }
 0x190   :  { %v1560_v22 = vadd.f32 %v2616_v19, %v1559_v20 }
 0x1cf   :  { %v1571_v18 = vpop.f32.mrf.mxu1 }
 0x1d0   :  { %v1572_v23 = vadd.f32 %v1571_v18, %v1558_v21 }
 0x1d2   :  { %v1576_v26 = vmax.f32 %v1572_v23, 0.0 }
 0x1d7   :  { %v1573_v24 = vpop.f32.mrf.mxu1 }
 0x1d8   :  { %v1574_v25 = vadd.f32 %v1573_v24, %v1560_v22 }
 0x1da   :  { %v1577_v28 = vmax.f32 %v1574_v25, 0.0 }
 0x1dc   :  { %v1595_v29 = vpack.c.bf16 %v1577_v28, %v1576_v26 }
 0x1de   :  { %1655 = vmatmul.bf16.vlgmr.msrb.gmra.mxu2 %v1595_v29 }
 0x261   :  { %v1656_v32 = vpop.f32.mrf.mxu2 }
 0x262   :  { %v1657_v33 = vadd.f32 %v2617_v30, %v1656_v32 }
 0x264   :  { %1661 = vst [vmem:[#allocation12] sm:$0xff] %v1657_v33 }
 0x269   :  { %v1658_v1 = vpop.f32.mrf.mxu2 }
 0x26a   :  { %v1659_v34 = vadd.f32 %v2617_v30, %v1658_v1 }
 0x26c   :  { %1662 = vst [vmem:[#allocation12 + $0x8] sm:$0xff] %v1659_v34 }
 0x26d   :  { %1675 = dma.vmem_to_hbm [thread:$0]  %s1668_s11, 256, %s1670_s1, [#allocation5], %s2771_s9, %s2771_s9, %s2772_s10  }
 0x26e   :  { %2768 = dma.done.wait [#allocation5], 256  }
 0x26f   :  { %2769 = vsyncadd [#allocation5], 4294967040 }
 0x270   :  { %1680 = vsyncpa [#allocation4], 1 }
 0x271   :  { %1681 = vsyncpa [#allocation7], 1 }
 0x272   :  { %1682 = vsyncpa [#allocation10], 1 }
 0x273   :  { %1683 = vsyncpa [#allocation5], 1 }

// kernel: tpu_custom_call.1
= control target key start
LH: loop header
LB: loop body
LE: loop exit
PB: predicated region body
PF: predicated region fallthrough
CT: control target
= control target key end

     0   :  { %12 = vsyncpa [#allocation4], 0  ;;  %s2896_s0 = inlined_call_operand.hbm [shape: f32[16,1280], index: 0, kind: input, shape index: {}]   ;;  %s2897_s1 = inlined_call_operand.hbm [shape: bf16[1280,256], index: 1, kind: input, shape index: {}]   ;;  %s2898_s2 = inlined_call_operand.hbm [shape: f32[1,256], index: 2, kind: input, shape index: {}]   ;;  %s2899_s3 = inlined_call_operand.hbm [shape: bf16[256,128], index: 3, kind: input, shape index: {}]   ;;  %s2900_s4 = inlined_call_operand.vmem [shape: f32[1,128], index: 4, kind: input, shape index: {}]   ;;  %s2901_s5 = inlined_call_operand.hbm [shape: bf16[128,128], index: 5, kind: input, shape index: {}]   ;;  %s2902_s6 = inlined_call_operand.vmem [shape: f32[1,128], index: 6, kind: input, shape index: {}]   ;;  %s2903_s7 = inlined_call_operand.hbm [shape: f32[16,128], index: 7, kind: output, shape index: {}]  }
   0x1   :  { %13 = vsyncpa [#allocation7], 0 }
   0x2   :  { %14 = vsyncpa [#allocation10], 0  ;;  %s33_s26 = sshll.u32 %s2897_s1, 4  ;;  %s34_s26 = int_to_ptr.hbm [resolvable:$true] %s33_s26 }
   0x3   :  { %15 = vsyncpa [#allocation5], 0  ;;  %s2770_s27 = smov [#allocation6]   ;;  %s57_s8 = sshll.u32 %s2899_s3, 4  ;;  %s58_s8 = int_to_ptr.hbm [resolvable:$true] %s57_s8 }
   0x4   :  { %s35_s28 = sshll.u32 %s2770_s27, 4  ;;  %s2771_s9 = smov 128   ;;  %s36_s28 = int_to_ptr.vmem [resolvable:$true] %s35_s28 }
   0x5   :  { %s2772_s10 = smov 8   ;;  %s2773_s11 = smov [#allocation9]  }
   0x6   :  { %41 = dma.hbm_to_vmem [thread:$0]  %s34_s26, 20480, %s36_s28, [#allocation7], %s2771_s9, %s2771_s9, %s2772_s10  }
   0x7   :  { %s59_s12 = sshll.u32 %s2773_s11, 4  ;;  %s2774_s1 = smov 64   ;;  %s60_s12 = int_to_ptr.vmem [resolvable:$true] %s59_s12 }
   0x8   :  { %s2775_s13 = smov 4   ;;  %s20_s16 = sshll.u32 %s2896_s0, 4  ;;  %s21_s16 = int_to_ptr.hbm [resolvable:$true] %s20_s16 }
   0x9   :  { %65 = dma.hbm_to_vmem [thread:$0]  %s58_s8, 2048, %s60_s12, [#allocation10], %s2774_s1, %s2774_s1, %s2775_s13  }
   0xa   :  { %s2776_s17 = smov [#allocation3]   ;;  %s47_s20 = sshll.u32 %s2898_s2, 4  ;;  %s48_s20 = int_to_ptr.hbm [resolvable:$true] %s47_s20 }
   0xb   :  { %s22_s3 = sshll.u32 %s2776_s17, 4  ;;  %s2777_s21 = smov 1280   ;;  %s23_s3 = int_to_ptr.vmem [resolvable:$true] %s22_s3 }
   0xc   :  { %s2778_s22 = smov 80   ;;  %s2779_s23 = smov [#allocation8]  }
   0xd   :  { %28 = dma.hbm_to_vmem [thread:$0]  %s21_s16, 2560, %s23_s3, [#allocation4], %s2777_s21, %s2777_s21, %s2778_s22  }
   0xe   :  { %s49_s24 = sshll.u32 %s2779_s23, 4  ;;  %s72_s27 = sshll.u32 %s2901_s5, 4  ;;  %s50_s24 = int_to_ptr.vmem [resolvable:$true] %s49_s24  ;;  %s73_s27 = int_to_ptr.hbm [resolvable:$true] %s72_s27 }
   0xf   :  { %52 = dma.hbm_to_vmem [thread:$0]  %s48_s20, 32, %s50_s24, [#allocation7]  }
  0x10   :  { %s2780_s0 = smov [#allocation11]  }
  0x11   :  { %s74_s28 = sshll.u32 %s2780_s0, 4  ;;  %s75_s28 = int_to_ptr.vmem [resolvable:$true] %s74_s28 }
  0x12   :  { %80 = dma.hbm_to_vmem [thread:$0]  %s73_s27, 1024, %s75_s28, [#allocation10], %s2774_s1, %s2774_s1, %s2775_s13  }
  0x13   :  { %2762 = dma.done.wait [#allocation4], 2560  }
  0x14   :  { %2763 = vsyncadd [#allocation4], 4294964736 }
  0x15   :  { %2764 = dma.done.wait [#allocation7], 20512  }
  0x16   :  { %2765 = vsyncadd [#allocation7], 4294946784 }
  0x17   :  { %2766 = dma.done.wait [#allocation10], 3072  }
  0x18   :  { %2767 = vsyncadd [#allocation10], 4294964224  ;;  %v1742_v0 = vld [vmem:[#allocation6 + $0x70] sm:$0xf]  ;;  %v2435_v1 = vld [vmem:[#allocation6 + $0x74] sm:$0xf0] }
  0x19   :  { %v1806_v2 = vld [vmem:[#allocation6 + $0xf0] sm:$0xf]  ;;  %v1743_v3 = vor.u32 %v2435_v1, %v1742_v0  ;;  %v2451_v4 = vld [vmem:[#allocation6 + $0xf4] sm:$0xf0]  ;;  %v1734_v11 = vld [vmem:[#allocation6 + $0x60] sm:$0xf] }
  0x1a   :  { %v1870_v5 = vld [vmem:[#allocation6 + $0x170] sm:$0xf]  ;;  %v2467_v6 = vld [vmem:[#allocation6 + $0x174] sm:$0xf0]  ;;  %v1807_v7 = vor.u32 %v2451_v4, %v1806_v2  ;;  %v2433_v13 = vld [vmem:[#allocation6 + $0x64] sm:$0xf0] }
  0x1b   :  { %v1871_v8 = vor.u32 %v2467_v6, %v1870_v5  ;;  %v1934_v9 = vld [vmem:[#allocation6 + $0x1f0] sm:$0xf]  ;;  %v2483_v10 = vld [vmem:[#allocation6 + $0x1f4] sm:$0xf0]  ;;  %1093 = vmatpush.bf16.msra.mxu0 %v1743_v3  ;;  %v1798_v14 = vld [vmem:[#allocation6 + $0xe0] sm:$0xf]  ;;  %v1735_v16 = vor.u32 %v2433_v13, %v1734_v11 }
  0x1c   :  { %v1935_v12 = vor.u32 %v2483_v10, %v1934_v9  ;;  %v2449_v15 = vld [vmem:[#allocation6 + $0xe4] sm:$0xf0]  ;;  %1107 = vmatpush.bf16.msra.mxu1 %v1807_v7  ;;  %v1862_v18 = vld [vmem:[#allocation6 + $0x160] sm:$0xf]  ;;  %v1726_v23 = vld [vmem:[#allocation6 + $0x50] sm:$0xf] }
  0x1d   :  { %1121 = vmatpush.bf16.msra.mxu2 %v1871_v8  ;;  %v1799_v17 = vor.u32 %v2449_v15, %v1798_v14  ;;  %v2465_v19 = vld [vmem:[#allocation6 + $0x164] sm:$0xf0]  ;;  %v1926_v20 = vld [vmem:[#allocation6 + $0x1e0] sm:$0xf]  ;;  %v2431_v24 = vld [vmem:[#allocation6 + $0x54] sm:$0xf0] }
  0x1e   :  { %1135 = vmatpush.bf16.msra.mxu3 %v1935_v12  ;;  %v1863_v21 = vor.u32 %v2465_v19, %v1862_v18  ;;  %v2481_v22 = vld [vmem:[#allocation6 + $0x1e4] sm:$0xf0]  ;;  %v1790_v26 = vld [vmem:[#allocation6 + $0xd0] sm:$0xf]  ;;  %v2447_v27 = vld [vmem:[#allocation6 + $0xd4] sm:$0xf0]  ;;  %v1727_v29 = vor.u32 %v2431_v24, %v1726_v23 }
  0x1f   :  { %v1927_v25 = vor.u32 %v2481_v22, %v1926_v20  ;;  %v1854_v28 = vld [vmem:[#allocation6 + $0x150] sm:$0xf]  ;;  %1094 = vmatpush.bf16.msra.mxu0 %v1735_v16  ;;  %v2463_v30 = vld [vmem:[#allocation6 + $0x154] sm:$0xf0]  ;;  %v1791_v33 = vor.u32 %v2447_v27, %v1790_v26  ;;  %v1718_v35 = vld [vmem:[#allocation6 + $0x40] sm:$0xf] }
  0x20   :  { %v1918_v31 = vld [vmem:[#allocation6 + $0x1d0] sm:$0xf]  ;;  %v2479_v32 = vld [vmem:[#allocation6 + $0x1d4] sm:$0xf0]  ;;  %1108 = vmatpush.bf16.msra.mxu1 %v1799_v17  ;;  %v1855_v34 = vor.u32 %v2463_v30, %v1854_v28  ;;  %v2429_v36 = vld [vmem:[#allocation6 + $0x44] sm:$0xf0] }
  0x21   :  { %1122 = vmatpush.bf16.msra.mxu2 %v1863_v21  ;;  %v1782_v37 = vld [vmem:[#allocation6 + $0xc0] sm:$0xf]  ;;  %v1919_v38 = vor.u32 %v2479_v32, %v1918_v31  ;;  %v2445_v39 = vld [vmem:[#allocation6 + $0xc4] sm:$0xf0]  ;;  %v1719_v44 = vor.u32 %v2429_v36, %v1718_v35  ;;  %v1710_v47 = vld [vmem:[#allocation6 + $0x30] sm:$0xf] }
  0x22   :  { %1136 = vmatpush.bf16.msra.mxu3 %v1927_v25  ;;  %v1846_v40 = vld [vmem:[#allocation6 + $0x140] sm:$0xf]  ;;  %v2461_v41 = vld [vmem:[#allocation6 + $0x144] sm:$0xf0]  ;;  %v1783_v45 = vor.u32 %v2445_v39, %v1782_v37  ;;  %v2427_v48 = vld [vmem:[#allocation6 + $0x34] sm:$0xf0] }
  0x23   :  { %v1910_v42 = vld [vmem:[#allocation6 + $0x1c0] sm:$0xf]  ;;  %v2477_v43 = vld [vmem:[#allocation6 + $0x1c4] sm:$0xf0]  ;;  %1095 = vmatpush.bf16.msra.mxu0 %v1727_v29  ;;  %v1847_v46 = vor.u32 %v2461_v41, %v1846_v40  ;;  %v1774_v49 = vld [vmem:[#allocation6 + $0xb0] sm:$0xf]  ;;  %v1711_v56 = vor.u32 %v2427_v48, %v1710_v47 }
  0x24   :  { %1109 = vmatpush.bf16.msra.mxu1 %v1791_v33  ;;  %v1911_v50 = vor.u32 %v2477_v43, %v1910_v42  ;;  %v2443_v51 = vld [vmem:[#allocation6 + $0xb4] sm:$0xf0]  ;;  %v1838_v52 = vld [vmem:[#allocation6 + $0x130] sm:$0xf]  ;;  %v1702_v59 = vld [vmem:[#allocation6 + $0x20] sm:$0xf] }
  0x25   :  { %1123 = vmatpush.bf16.msra.mxu2 %v1855_v34  ;;  %v2459_v53 = vld [vmem:[#allocation6 + $0x134] sm:$0xf0]  ;;  %v1902_v54 = vld [vmem:[#allocation6 + $0x1b0] sm:$0xf]  ;;  %v1775_v57 = vor.u32 %v2443_v51, %v1774_v49  ;;  %v2425_v60 = vld [vmem:[#allocation6 + $0x24] sm:$0xf0] }
  0x26   :  { %1137 = vmatpush.bf16.msra.mxu3 %v1919_v38  ;;  %v2475_v55 = vld [vmem:[#allocation6 + $0x1b4] sm:$0xf0]  ;;  %v1839_v58 = vor.u32 %v2459_v53, %v1838_v52  ;;  %v1766_v61 = vld [vmem:[#allocation6 + $0xa0] sm:$0xf]  ;;  %v2441_v63 = vld [vmem:[#allocation6 + $0xa4] sm:$0xf0]  ;;  %v1703_v4 = vor.u32 %v2425_v60, %v1702_v59 }
  0x27   :  { %1096 = vmatpush.bf16.msra.mxu0 %v1719_v44  ;;  %v1903_v62 = vor.u32 %v2475_v55, %v1902_v54  ;;  %v1830_v0 = vld [vmem:[#allocation6 + $0x120] sm:$0xf]  ;;  %v2457_v1 = vld [vmem:[#allocation6 + $0x124] sm:$0xf0]  ;;  %v1767_v5 = vor.u32 %v2441_v63, %v1766_v61  ;;  %v1694_v7 = vld [vmem:[#allocation6 + $0x10] sm:$0xf] }
  0x28   :  { %1110 = vmatpush.bf16.msra.mxu1 %v1783_v45  ;;  %v1894_v2 = vld [vmem:[#allocation6 + $0x1a0] sm:$0xf]  ;;  %v2473_v3 = vld [vmem:[#allocation6 + $0x1a4] sm:$0xf0]  ;;  %v1831_v6 = vor.u32 %v2457_v1, %v1830_v0  ;;  %v2423_v8 = vld [vmem:[#allocation6 + $0x14] sm:$0xf0] }
  0x29   :  { %1124 = vmatpush.bf16.msra.mxu2 %v1847_v46  ;;  %v1758_v9 = vld [vmem:[#allocation6 + $0x90] sm:$0xf]  ;;  %v1895_v10 = vor.u32 %v2473_v3, %v1894_v2  ;;  %v2439_v11 = vld [vmem:[#allocation6 + $0x94] sm:$0xf0]  ;;  %v1695_v16 = vor.u32 %v2423_v8, %v1694_v7  ;;  %v1686_v17 = vld [vmem:[#allocation6] sm:$0xf] }
  0x2a   :  { %1138 = vmatpush.bf16.msra.mxu3 %v1911_v50  ;;  %v1822_v12 = vld [vmem:[#allocation6 + $0x110] sm:$0xf]  ;;  %v2455_v13 = vld [vmem:[#allocation6 + $0x114] sm:$0xf0]  ;;  %v2421_v18 = vld [vmem:[#allocation6 + $0x4] sm:$0xf0]  ;;  %v1759_v19 = vor.u32 %v2439_v11, %v1758_v9 }
  0x2b   :  { %1097 = vmatpush.bf16.msra.mxu0 %v1711_v56  ;;  %v1886_v14 = vld [vmem:[#allocation6 + $0x190] sm:$0xf]  ;;  %v2471_v15 = vld [vmem:[#allocation6 + $0x194] sm:$0xf0]  ;;  %v1823_v20 = vor.u32 %v2455_v13, %v1822_v12  ;;  %v1750_v21 = vld [vmem:[#allocation6 + $0x80] sm:$0xf]  ;;  %v1687_v31 = vor.u32 %v2421_v18, %v1686_v17 }
  0x2c   :  { %1111 = vmatpush.bf16.msra.mxu1 %v1775_v57  ;;  %v2437_v22 = vld [vmem:[#allocation6 + $0x84] sm:$0xf0]  ;;  %v1814_v23 = vld [vmem:[#allocation6 + $0x100] sm:$0xf]  ;;  %v1887_v24 = vor.u32 %v2471_v15, %v1886_v14  ;;  %v1998_v28 = vld [vmem:[#allocation6 + $0x270] sm:$0xf] }
  0x2d   :  { %1125 = vmatpush.bf16.msra.mxu2 %v1839_v58  ;;  %v2453_v25 = vld [vmem:[#allocation6 + $0x104] sm:$0xf0]  ;;  %v1878_v26 = vld [vmem:[#allocation6 + $0x180] sm:$0xf]  ;;  %v2499_v29 = vld [vmem:[#allocation6 + $0x274] sm:$0xf0]  ;;  %v1751_v35 = vor.u32 %v2437_v22, %v1750_v21 }
  0x2e   :  { %1139 = vmatpush.bf16.msra.mxu3 %v1903_v62  ;;  %v2469_v27 = vld [vmem:[#allocation6 + $0x184] sm:$0xf0]  ;;  %v2062_v30 = vld [vmem:[#allocation6 + $0x2f0] sm:$0xf]  ;;  %v2515_v32 = vld [vmem:[#allocation6 + $0x2f4] sm:$0xf0]  ;;  %v1815_v36 = vor.u32 %v2453_v25, %v1814_v23  ;;  %v1999_v40 = vor.u32 %v2499_v29, %v1998_v28 }
  0x2f   :  { %1098 = vmatpush.bf16.msra.mxu0 %v1703_v4  ;;  %v2126_v33 = vld [vmem:[#allocation6 + $0x370] sm:$0xf]  ;;  %v2531_v34 = vld [vmem:[#allocation6 + $0x374] sm:$0xf0]  ;;  %v1879_v39 = vor.u32 %v2469_v27, %v1878_v26  ;;  %v1990_v41 = vld [vmem:[#allocation6 + $0x260] sm:$0xf]  ;;  %v2063_v43 = vor.u32 %v2515_v32, %v2062_v30 }
  0x30   :  { %1112 = vmatpush.bf16.msra.mxu1 %v1767_v5  ;;  %v2190_v37 = vld [vmem:[#allocation6 + $0x3f0] sm:$0xf]  ;;  %v2547_v38 = vld [vmem:[#allocation6 + $0x3f4] sm:$0xf0]  ;;  %v2497_v42 = vld [vmem:[#allocation6 + $0x264] sm:$0xf0]  ;;  %v2127_v44 = vor.u32 %v2531_v34, %v2126_v33 }
  0x31   :  { %1126 = vmatpush.bf16.msra.mxu2 %v1831_v6  ;;  %v2054_v45 = vld [vmem:[#allocation6 + $0x2e0] sm:$0xf]  ;;  %v2513_v46 = vld [vmem:[#allocation6 + $0x2e4] sm:$0xf0]  ;;  %v2191_v48 = vor.u32 %v2547_v38, %v2190_v37  ;;  %v113_v53 = vld [vmem:[#allocation3 + $0x50] sm:$0xff]  ;;  %v1991_v55 = vor.u32 %v2497_v42, %v1990_v41  ;;  %s2781_s8 = smov [#allocation12]  }
  0x32   :  { %1140 = vmatpush.bf16.msra.mxu3 %v1895_v10  ;;  %v2118_v47 = vld [vmem:[#allocation6 + $0x360] sm:$0xf]  ;;  %v2529_v49 = vld [vmem:[#allocation6 + $0x364] sm:$0xf0]  ;;  %v105_v54 = vld [vmem:[#allocation3 + $0x10] sm:$0xff]  ;;  %v2055_v60 = vor.u32 %v2513_v46, %v2054_v45  ;;  %s1667_s11 = sshll.u32 %s2781_s8, 4  ;;  %s1668_s11 = int_to_ptr.vmem [resolvable:$true] %s1667_s11 }
  0x33   :  { %1099 = vmatpush.bf16.msra.mxu0 %v1695_v16  ;;  %v2182_v50 = vld [vmem:[#allocation6 + $0x3e0] sm:$0xf]  ;;  %v2545_v51 = vld [vmem:[#allocation6 + $0x3e4] sm:$0xf0]  ;;  %v1982_v56 = vld [vmem:[#allocation6 + $0x250] sm:$0xf]  ;;  %v2119_v61 = vor.u32 %v2529_v49, %v2118_v47 }
  0x34   :  { %1113 = vmatpush.bf16.msra.mxu1 %v1759_v19  ;;  %v103_v52 = vld [vmem:[#allocation3] sm:$0xff]  ;;  %v2495_v57 = vld [vmem:[#allocation6 + $0x254] sm:$0xf0]  ;;  %v2046_v62 = vld [vmem:[#allocation6 + $0x2d0] sm:$0xf]  ;;  %v2183_v2 = vor.u32 %v2545_v51, %v2182_v50  ;;  %s1669_s1 = sshll.u32 %s2903_s7, 4  ;;  %s1670_s1 = int_to_ptr.hbm [resolvable:$true] %s1669_s1 }
  0x35   :  { %1127 = vmatpush.bf16.msra.mxu2 %v1823_v20  ;;  %v2840_v58 = vpack.c.bf16 %v113_v53, %v103_v52  ;;  %v115_v59 = vld [vmem:[#allocation3 + $0x60] sm:$0xff]  ;;  %v2511_v63 = vld [vmem:[#allocation6 + $0x2d4] sm:$0xf0]  ;;  %v2110_v0 = vld [vmem:[#allocation6 + $0x350] sm:$0xf]  ;;  %v1983_v9 = vor.u32 %v2495_v57, %v1982_v56 }
  0x36   :  { %1141 = vmatpush.bf16.msra.mxu3 %v1887_v24  ;;  %v2842_v1 = vpack.c.bf16 %v115_v59, %v105_v54  ;;  %v2527_v3 = vld [vmem:[#allocation6 + $0x354] sm:$0xf0]  ;;  %v2174_v4 = vld [vmem:[#allocation6 + $0x3d0] sm:$0xf]  ;;  %v104_v6 = vld [vmem:[#allocation3 + $0x8] sm:$0xff]  ;;  %v2047_v12 = vor.u32 %v2511_v63, %v2046_v62 }
  0x37   :  { %1100 = vmatpush.bf16.msra.mxu0 %v1687_v31  ;;  %v2543_v5 = vld [vmem:[#allocation6 + $0x3d4] sm:$0xf0]  ;;  %v116_v11 = vld [vmem:[#allocation3 + $0x68] sm:$0xff]  ;;  %v2111_v13 = vor.u32 %v2527_v3, %v2110_v0  ;;  %v1974_v14 = vld [vmem:[#allocation6 + $0x240] sm:$0xf] }
  0x38   :  { %1114 = vmatpush.bf16.msra.mxu1 %v1751_v35  ;;  %v114_v7 = vld [vmem:[#allocation3 + $0x58] sm:$0xff]  ;;  %v2493_v15 = vld [vmem:[#allocation6 + $0x244] sm:$0xf0]  ;;  %v2038_v16 = vld [vmem:[#allocation6 + $0x2c0] sm:$0xf]  ;;  %v2175_v18 = vor.u32 %v2543_v5, %v2174_v4 }
  0x39   :  { %1128 = vmatpush.bf16.msra.mxu2 %v1815_v36  ;;  %v106_v8 = vld [vmem:[#allocation3 + $0x18] sm:$0xff]  ;;  %v2846_v10 = vpack.c.bf16 %v114_v7, %v104_v6  ;;  %v2509_v19 = vld [vmem:[#allocation6 + $0x2c4] sm:$0xf0]  ;;  %v2102_v20 = vld [vmem:[#allocation6 + $0x340] sm:$0xf]  ;;  %v1975_v24 = vor.u32 %v2493_v15, %v1974_v14 }
  0x3a   :  { %1142 = vmatpush.bf16.msra.mxu3 %v1879_v39  ;;  %1101 = vmatmul.bf16.vlgmr.msra.gmra.mxu0 %v2840_v58  ;;  %v2848_v17 = vpack.c.bf16 %v116_v11, %v106_v8  ;;  %v2525_v21 = vld [vmem:[#allocation6 + $0x344] sm:$0xf0]  ;;  %v2166_v22 = vld [vmem:[#allocation6 + $0x3c0] sm:$0xf]  ;;  %v2039_v25 = vor.u32 %v2509_v19, %v2038_v16  ;;  %v1966_v27 = vld [vmem:[#allocation6 + $0x230] sm:$0xf] }
  0x3b   :  { %1149 = vmatpush.bf16.msrb.mxu0 %v1999_v40  ;;  %1115 = vmatmul.bf16.vlgmr.msra.gmra.mxu1 %v2846_v10  ;;  %v2541_v23 = vld [vmem:[#allocation6 + $0x3c4] sm:$0xf0]  ;;  %v2103_v26 = vor.u32 %v2525_v21, %v2102_v20  ;;  %v2491_v28 = vld [vmem:[#allocation6 + $0x234] sm:$0xf0]  ;;  %v2030_v29 = vld [vmem:[#allocation6 + $0x2b0] sm:$0xf] }
  0x3c   :  { %1163 = vmatpush.bf16.msrb.mxu1 %v2063_v43  ;;  %1129 = vmatmul.bf16.vlgmr.msra.gmra.mxu2 %v2842_v1  ;;  %v2167_v30 = vor.u32 %v2541_v23, %v2166_v22  ;;  %v2507_v31 = vld [vmem:[#allocation6 + $0x2b4] sm:$0xf0]  ;;  %v2094_v32 = vld [vmem:[#allocation6 + $0x330] sm:$0xf]  ;;  %v1967_v36 = vor.u32 %v2491_v28, %v1966_v27  ;;  %v1958_v39 = vld [vmem:[#allocation6 + $0x220] sm:$0xf] }
  0x3d   :  { %1177 = vmatpush.bf16.msrb.mxu2 %v2127_v44  ;;  %1143 = vmatmul.bf16.vlgmr.msra.gmra.mxu3 %v2848_v17  ;;  %v2523_v33 = vld [vmem:[#allocation6 + $0x334] sm:$0xf0]  ;;  %v2158_v34 = vld [vmem:[#allocation6 + $0x3b0] sm:$0xf]  ;;  %v2031_v37 = vor.u32 %v2507_v31, %v2030_v29  ;;  %v2489_v40 = vld [vmem:[#allocation6 + $0x224] sm:$0xf0] }
  0x3e   :  { %1191 = vmatpush.bf16.msrb.mxu3 %v2191_v48  ;;  %v2539_v35 = vld [vmem:[#allocation6 + $0x3b4] sm:$0xf0]  ;;  %v2095_v38 = vor.u32 %v2523_v33, %v2094_v32  ;;  %v2022_v41 = vld [vmem:[#allocation6 + $0x2a0] sm:$0xf]  ;;  %v2505_v43 = vld [vmem:[#allocation6 + $0x2a4] sm:$0xf0]  ;;  %v1959_v48 = vor.u32 %v2489_v40, %v1958_v39 }
  0x3f   :  { %1150 = vmatpush.bf16.msrb.mxu0 %v1991_v55  ;;  %v2159_v42 = vor.u32 %v2539_v35, %v2158_v34  ;;  %v2086_v44 = vld [vmem:[#allocation6 + $0x320] sm:$0xf]  ;;  %v2521_v45 = vld [vmem:[#allocation6 + $0x324] sm:$0xf0]  ;;  %v1950_v49 = vld [vmem:[#allocation6 + $0x210] sm:$0xf]  ;;  %v2023_v50 = vor.u32 %v2505_v43, %v2022_v41 }
  0x40   :  { %1164 = vmatpush.bf16.msrb.mxu1 %v2055_v60  ;;  %v2150_v46 = vld [vmem:[#allocation6 + $0x3a0] sm:$0xf]  ;;  %v2537_v47 = vld [vmem:[#allocation6 + $0x3a4] sm:$0xf0]  ;;  %v2087_v51 = vor.u32 %v2521_v45, %v2086_v44  ;;  %v2487_v52 = vld [vmem:[#allocation6 + $0x214] sm:$0xf0] }
  0x41   :  { %1178 = vmatpush.bf16.msrb.mxu2 %v2119_v61  ;;  %v2014_v53 = vld [vmem:[#allocation6 + $0x290] sm:$0xf]  ;;  %v2503_v54 = vld [vmem:[#allocation6 + $0x294] sm:$0xf0]  ;;  %v2151_v55 = vor.u32 %v2537_v47, %v2150_v46  ;;  %v1942_v61 = vld [vmem:[#allocation6 + $0x200] sm:$0xf]  ;;  %v1951_v63 = vor.u32 %v2487_v52, %v1950_v49 }
  0x42   :  { %1192 = vmatpush.bf16.msrb.mxu3 %v2183_v2  ;;  %v2078_v56 = vld [vmem:[#allocation6 + $0x310] sm:$0xf]  ;;  %v2519_v57 = vld [vmem:[#allocation6 + $0x314] sm:$0xf0]  ;;  %v2485_v62 = vld [vmem:[#allocation6 + $0x204] sm:$0xf0]  ;;  %v2015_v5 = vor.u32 %v2503_v54, %v2014_v53 }
  0x43   :  { %1151 = vmatpush.bf16.msrb.mxu0 %v1983_v9  ;;  %v2142_v59 = vld [vmem:[#allocation6 + $0x390] sm:$0xf]  ;;  %v2535_v60 = vld [vmem:[#allocation6 + $0x394] sm:$0xf0]  ;;  %v2006_v0 = vld [vmem:[#allocation6 + $0x280] sm:$0xf]  ;;  %v2079_v6 = vor.u32 %v2519_v57, %v2078_v56  ;;  %v1943_v19 = vor.u32 %v2485_v62, %v1942_v61 }
  0x44   :  { %1165 = vmatpush.bf16.msrb.mxu1 %v2047_v12  ;;  %v2501_v2 = vld [vmem:[#allocation6 + $0x284] sm:$0xf0]  ;;  %v2070_v3 = vld [vmem:[#allocation6 + $0x300] sm:$0xf]  ;;  %v2254_v9 = vld [vmem:[#allocation6 + $0x470] sm:$0xf]  ;;  %v2143_v11 = vor.u32 %v2535_v60, %v2142_v59 }
  0x45   :  { %1179 = vmatpush.bf16.msrb.mxu2 %v2111_v13  ;;  %v2517_v4 = vld [vmem:[#allocation6 + $0x304] sm:$0xf0]  ;;  %v2134_v7 = vld [vmem:[#allocation6 + $0x380] sm:$0xf]  ;;  %v2563_v12 = vld [vmem:[#allocation6 + $0x474] sm:$0xf0]  ;;  %v2007_v23 = vor.u32 %v2501_v2, %v2006_v0 }
  0x46   :  { %1193 = vmatpush.bf16.msrb.mxu3 %v2175_v18  ;;  %v2533_v8 = vld [vmem:[#allocation6 + $0x384] sm:$0xf0]  ;;  %v2318_v13 = vld [vmem:[#allocation6 + $0x4f0] sm:$0xf]  ;;  %v2579_v14 = vld [vmem:[#allocation6 + $0x4f4] sm:$0xf0]  ;;  %v2255_v29 = vor.u32 %v2563_v12, %v2254_v9 }
  0x47   :  { %1152 = vmatpush.bf16.msrb.mxu0 %v1975_v24  ;;  %v2434_v15 = vld [vmem:[#allocation6 + $0x74] sm:$0xf]  ;;  %v1744_v16 = vld [vmem:[#allocation6 + $0x78] sm:$0xf0]  ;;  %v107_v21 = vld [vmem:[#allocation3 + $0x20] sm:$0xff]  ;;  %v2071_v24 = vor.u32 %v2517_v4, %v2070_v3  ;;  %v2135_v28 = vor.u32 %v2533_v8, %v2134_v7  ;;  %v2319_v33 = vor.u32 %v2579_v14, %v2318_v13 }
  0x48   :  { %1166 = vmatpush.bf16.msrb.mxu1 %v2039_v25  ;;  %v2450_v18 = vld [vmem:[#allocation6 + $0xf4] sm:$0xf]  ;;  %v1808_v20 = vld [vmem:[#allocation6 + $0xf8] sm:$0xf0]  ;;  %v108_v27 = vld [vmem:[#allocation3 + $0x28] sm:$0xff]  ;;  %v1747_v34 = vor.u32 %v2434_v15, %v1744_v16 }
  0x49   :  { %1180 = vmatpush.bf16.msrb.mxu2 %v2103_v26  ;;  %v117_v22 = vld [vmem:[#allocation3 + $0x70] sm:$0xff]  ;;  %v119_v26 = vld [vmem:[#allocation3 + $0x80] sm:$0xff]  ;;  %v110_v31 = vld [vmem:[#allocation3 + $0x38] sm:$0xff] }
  0x4a   :  { %1194 = vmatpush.bf16.msrb.mxu3 %v2167_v30  ;;  %v109_v25 = vld [vmem:[#allocation3 + $0x30] sm:$0xff]  ;;  %v118_v30 = vld [vmem:[#allocation3 + $0x78] sm:$0xff]  ;;  %v120_v32 = vld [vmem:[#allocation3 + $0x88] sm:$0xff]  ;;  %v2852_v39 = vpack.c.bf16 %v117_v22, %v107_v21 }
  0x4b   :  { %1153 = vmatpush.bf16.msrb.mxu0 %v1967_v36  ;;  %v2246_v35 = vld [vmem:[#allocation6 + $0x460] sm:$0xf]  ;;  %v2561_v36 = vld [vmem:[#allocation6 + $0x464] sm:$0xf0]  ;;  %v2432_v41 = vld [vmem:[#allocation6 + $0x64] sm:$0xf]  ;;  %v2854_v43 = vpack.c.bf16 %v119_v26, %v109_v25  ;;  %v2856_v44 = vpack.c.bf16 %v118_v30, %v108_v27  ;;  %v2858_v47 = vpack.c.bf16 %v120_v32, %v110_v31 }
  0x4c   :  { %1167 = vmatpush.bf16.msrb.mxu1 %v2031_v37  ;;  %v2310_v37 = vld [vmem:[#allocation6 + $0x4e0] sm:$0xf]  ;;  %v2577_v40 = vld [vmem:[#allocation6 + $0x4e4] sm:$0xf0]  ;;  %v2448_v45 = vld [vmem:[#allocation6 + $0xe4] sm:$0xf] }
  0x4d   :  { %1181 = vmatpush.bf16.msrb.mxu2 %v2095_v38  ;;  %v1811_v38 = vor.u32 %v2450_v18, %v1808_v20  ;;  %v1800_v46 = vld [vmem:[#allocation6 + $0xe8] sm:$0xf0]  ;;  %v2311_v49 = vor.u32 %v2577_v40, %v2310_v37  ;;  %v2559_v52 = vld [vmem:[#allocation6 + $0x454] sm:$0xf0]  ;;  %v2302_v53 = vld [vmem:[#allocation6 + $0x4d0] sm:$0xf] }
  0x4e   :  { %1195 = vmatpush.bf16.msrb.mxu3 %v2159_v42  ;;  %v1736_v42 = vld [vmem:[#allocation6 + $0x68] sm:$0xf0]  ;;  %v1803_v54 = vor.u32 %v2448_v45, %v1800_v46  ;;  %v2430_v56 = vld [vmem:[#allocation6 + $0x54] sm:$0xf]  ;;  %v1728_v57 = vld [vmem:[#allocation6 + $0x58] sm:$0xf0] }
  0x4f   :  { %1154 = vmatpush.bf16.msrb.mxu0 %v1959_v48  ;;  %v2247_v48 = vor.u32 %v2561_v36, %v2246_v35  ;;  %v2446_v59 = vld [vmem:[#allocation6 + $0xd4] sm:$0xf]  ;;  %v1792_v60 = vld [vmem:[#allocation6 + $0xd8] sm:$0xf0]  ;;  %v2230_v0 = vld [vmem:[#allocation6 + $0x440] sm:$0xf] }
  0x50   :  { %1168 = vmatpush.bf16.msrb.mxu1 %v2023_v50  ;;  %v1739_v50 = vor.u32 %v2432_v41, %v1736_v42  ;;  %v2557_v2 = vld [vmem:[#allocation6 + $0x444] sm:$0xf0]  ;;  %v2294_v3 = vld [vmem:[#allocation6 + $0x4c0] sm:$0xf]  ;;  %v1795_v4 = vor.u32 %v2446_v59, %v1792_v60  ;;  %v1720_v7 = vld [vmem:[#allocation6 + $0x48] sm:$0xf0] }
  0x51   :  { %1182 = vmatpush.bf16.msrb.mxu2 %v2087_v51  ;;  %v2238_v51 = vld [vmem:[#allocation6 + $0x450] sm:$0xf]  ;;  %v2444_v8 = vld [vmem:[#allocation6 + $0xc4] sm:$0xf]  ;;  %v1784_v9 = vld [vmem:[#allocation6 + $0xc8] sm:$0xf0] }
  0x52   :  { %1196 = vmatpush.bf16.msrb.mxu3 %v2151_v55  ;;  %v2575_v55 = vld [vmem:[#allocation6 + $0x4d4] sm:$0xf0]  ;;  %v2239_v61 = vor.u32 %v2559_v52, %v2238_v51  ;;  %v2222_v14 = vld [vmem:[#allocation6 + $0x430] sm:$0xf]  ;;  %v1787_v18 = vor.u32 %v2444_v8, %v1784_v9  ;;  %v2426_v20 = vld [vmem:[#allocation6 + $0x34] sm:$0xf] }
  0x53   :  { %1155 = vmatpush.bf16.msrb.mxu0 %v1951_v63  ;;  %v2303_v62 = vor.u32 %v2575_v55, %v2302_v53  ;;  %v1731_v63 = vor.u32 %v2430_v56, %v1728_v57  ;;  %v2555_v15 = vld [vmem:[#allocation6 + $0x434] sm:$0xf0]  ;;  %v2286_v16 = vld [vmem:[#allocation6 + $0x4b0] sm:$0xf]  ;;  %v1712_v21 = vld [vmem:[#allocation6 + $0x38] sm:$0xf0] }
  0x54   :  { %1169 = vmatpush.bf16.msrb.mxu1 %v2015_v5  ;;  %v2573_v5 = vld [vmem:[#allocation6 + $0x4c4] sm:$0xf0]  ;;  %v2442_v22 = vld [vmem:[#allocation6 + $0xb4] sm:$0xf]  ;;  %v1715_v26 = vor.u32 %v2426_v20, %v1712_v21  ;;  %v2214_v27 = vld [vmem:[#allocation6 + $0x420] sm:$0xf] }
  0x55   :  { %1183 = vmatpush.bf16.msrb.mxu2 %v2079_v6  ;;  %v2428_v6 = vld [vmem:[#allocation6 + $0x44] sm:$0xf]  ;;  %v2295_v12 = vor.u32 %v2573_v5, %v2294_v3  ;;  %v2569_v31 = vld [vmem:[#allocation6 + $0x4a4] sm:$0xf0]  ;;  %v1768_v35 = vld [vmem:[#allocation6 + $0xa8] sm:$0xf0] }
  0x56   :  { %1197 = vmatpush.bf16.msrb.mxu3 %v2143_v11  ;;  %v2231_v11 = vor.u32 %v2557_v2, %v2230_v0  ;;  %v1723_v13 = vor.u32 %v2428_v6, %v1720_v7  ;;  %v2424_v32 = vld [vmem:[#allocation6 + $0x24] sm:$0xf]  ;;  %v2206_v40 = vld [vmem:[#allocation6 + $0x410] sm:$0xf]  ;;  %v2551_v41 = vld [vmem:[#allocation6 + $0x414] sm:$0xf0] }
  0x57   :  { %1156 = vmatpush.bf16.msrb.mxu0 %v1943_v19  ;;  %v2571_v19 = vld [vmem:[#allocation6 + $0x4b4] sm:$0xf0]  ;;  %v2270_v42 = vld [vmem:[#allocation6 + $0x490] sm:$0xf]  ;;  %v1760_v51 = vld [vmem:[#allocation6 + $0x98] sm:$0xf0]  ;;  %v2207_v52 = vor.u32 %v2551_v41, %v2206_v40 }
  0x58   :  { %1170 = vmatpush.bf16.msrb.mxu1 %v2007_v23  ;;  %v1776_v23 = vld [vmem:[#allocation6 + $0xb8] sm:$0xf0]  ;;  %v2287_v25 = vor.u32 %v2571_v19, %v2286_v16  ;;  %v2567_v46 = vld [vmem:[#allocation6 + $0x494] sm:$0xf0]  ;;  %v2198_v53 = vld [vmem:[#allocation6 + $0x400] sm:$0xf] }
  0x59   :  { %1184 = vmatpush.bf16.msrb.mxu2 %v2071_v24  ;;  %v2223_v24 = vor.u32 %v2555_v15, %v2222_v14  ;;  %v1779_v30 = vor.u32 %v2442_v22, %v1776_v23  ;;  %v2262_v55 = vld [vmem:[#allocation6 + $0x480] sm:$0xf]  ;;  %v2271_v56 = vor.u32 %v2567_v46, %v2270_v42  ;;  %v2565_v59 = vld [vmem:[#allocation6 + $0x484] sm:$0xf0]  ;;  %v2420_v60 = vld [vmem:[#allocation6 + $0x4] sm:$0xf] }
  0x5a   :  { %1198 = vmatpush.bf16.msrb.mxu3 %v2135_v28  ;;  %1157 = vmatmul.bf16.vlgmr.msrb.gmra.mxu0 %v2852_v39  ;;  %v2553_v28 = vld [vmem:[#allocation6 + $0x424] sm:$0xf0]  ;;  %v1752_v0 = vld [vmem:[#allocation6 + $0x88] sm:$0xf0]  ;;  %v2466_v2 = vld [vmem:[#allocation6 + $0x174] sm:$0xf] }
  0x5b   :  { %1205 = vmatpush.bf16.msra.mxu0 %v2255_v29  ;;  %1171 = vmatmul.bf16.vlgmr.msrb.gmra.mxu1 %v2856_v44  ;;  %v2278_v29 = vld [vmem:[#allocation6 + $0x4a0] sm:$0xf]  ;;  %v2215_v36 = vor.u32 %v2553_v28, %v2214_v27  ;;  %v1872_v3 = vld [vmem:[#allocation6 + $0x178] sm:$0xf0]  ;;  %v2498_v7 = vld [vmem:[#allocation6 + $0x274] sm:$0xf] }
  0x5c   :  { %1219 = vmatpush.bf16.msra.mxu1 %v2319_v33  ;;  %1185 = vmatmul.bf16.vlgmr.msrb.gmra.mxu2 %v2854_v43  ;;  %v1704_v33 = vld [vmem:[#allocation6 + $0x28] sm:$0xf0]  ;;  %v2279_v37 = vor.u32 %v2569_v31, %v2278_v29  ;;  %v1936_v5 = vld [vmem:[#allocation6 + $0x1f8] sm:$0xf0]  ;;  %v2514_v9 = vld [vmem:[#allocation6 + $0x2f4] sm:$0xf] }
  0x5d   :  { %1233 = vmatpush.bf16.msra.mxu2 %v1747_v34  ;;  %1199 = vmatmul.bf16.vlgmr.msrb.gmra.mxu3 %v2858_v47  ;;  %v2440_v34 = vld [vmem:[#allocation6 + $0xa4] sm:$0xf]  ;;  %v2000_v8 = vld [vmem:[#allocation6 + $0x278] sm:$0xf0]  ;;  %v121_v15 = vld [vmem:[#allocation3 + $0x90] sm:$0xff] }
  0x5e   :  { %1247 = vmatpush.bf16.msra.mxu3 %v1811_v38  ;;  %v1707_v38 = vor.u32 %v2424_v32, %v1704_v33  ;;  %v1771_v45 = vor.u32 %v2440_v34, %v1768_v35  ;;  %v111_v14 = vld [vmem:[#allocation3 + $0x40] sm:$0xff]  ;;  %v112_v19 = vld [vmem:[#allocation3 + $0x48] sm:$0xff]  ;;  %v122_v20 = vld [vmem:[#allocation3 + $0x98] sm:$0xff]  ;;  %v2003_v22 = vor.u32 %v2498_v7, %v2000_v8 }
  0x5f   :  { %1206 = vmatpush.bf16.msra.mxu0 %v2247_v48  ;;  %v2422_v48 = vld [vmem:[#allocation6 + $0x14] sm:$0xf]  ;;  %v2464_v23 = vld [vmem:[#allocation6 + $0x164] sm:$0xf]  ;;  %v2864_v27 = vpack.c.bf16 %v121_v15, %v111_v14  ;;  %v1928_v28 = vld [vmem:[#allocation6 + $0x1e8] sm:$0xf0]  ;;  %v2866_v31 = vpack.c.bf16 %v122_v20, %v112_v19 }
  0x60   :  { %1220 = vmatpush.bf16.msra.mxu1 %v2311_v49  ;;  %v1696_v49 = vld [vmem:[#allocation6 + $0x18] sm:$0xf0]  ;;  %v2496_v29 = vld [vmem:[#allocation6 + $0x264] sm:$0xf]  ;;  %v2056_v33 = vld [vmem:[#allocation6 + $0x2e8] sm:$0xf0] }
  0x61   :  { %1234 = vmatpush.bf16.msra.mxu2 %v1739_v50  ;;  %v2438_v50 = vld [vmem:[#allocation6 + $0x94] sm:$0xf]  ;;  %v1699_v57 = vor.u32 %v2422_v48, %v1696_v49  ;;  %v2512_v32 = vld [vmem:[#allocation6 + $0x2e4] sm:$0xf]  ;;  %v1920_v42 = vld [vmem:[#allocation6 + $0x1d8] sm:$0xf0] }
  0x62   :  { %1248 = vmatpush.bf16.msra.mxu3 %v1803_v54  ;;  %v2549_v54 = vld [vmem:[#allocation6 + $0x404] sm:$0xf0]  ;;  %v2478_v40 = vld [vmem:[#allocation6 + $0x1d4] sm:$0xf]  ;;  %v2059_v41 = vor.u32 %v2512_v32, %v2056_v33  ;;  %v1984_v46 = vld [vmem:[#allocation6 + $0x258] sm:$0xf0] }
  0x63   :  { %1207 = vmatpush.bf16.msra.mxu0 %v2239_v61  ;;  %v1688_v61 = vld [vmem:[#allocation6 + $0x8] sm:$0xf0]  ;;  %v2199_v6 = vor.u32 %v2549_v54, %v2198_v53  ;;  %v2510_v48 = vld [vmem:[#allocation6 + $0x2d4] sm:$0xf]  ;;  %v2048_v49 = vld [vmem:[#allocation6 + $0x2d8] sm:$0xf0] }
  0x64   :  { %1221 = vmatpush.bf16.msra.mxu1 %v2303_v62  ;;  %v1763_v62 = vor.u32 %v2438_v50, %v1760_v51  ;;  %v2460_v51 = vld [vmem:[#allocation6 + $0x144] sm:$0xf]  ;;  %v1848_v54 = vld [vmem:[#allocation6 + $0x148] sm:$0xf0]  ;;  %v1968_v7 = vld [vmem:[#allocation6 + $0x238] sm:$0xf0] }
  0x65   :  { %1235 = vmatpush.bf16.msra.mxu2 %v1731_v63  ;;  %v2436_v63 = vld [vmem:[#allocation6 + $0x84] sm:$0xf]  ;;  %v2506_v8 = vld [vmem:[#allocation6 + $0x2b4] sm:$0xf]  ;;  %v1832_v15 = vld [vmem:[#allocation6 + $0x128] sm:$0xf0] }
  0x66   :  { %1249 = vmatpush.bf16.msra.mxu3 %v1795_v4  ;;  %v2482_v4 = vld [vmem:[#allocation6 + $0x1f4] sm:$0xf]  ;;  %v1755_v16 = vor.u32 %v2436_v63, %v1752_v0  ;;  %v2456_v14 = vld [vmem:[#allocation6 + $0x124] sm:$0xf]  ;;  %v1896_v19 = vld [vmem:[#allocation6 + $0x1a8] sm:$0xf0] }
  0x67   :  { %1208 = vmatpush.bf16.msra.mxu0 %v2231_v11  ;;  %v2263_v11 = vor.u32 %v2565_v59, %v2262_v55  ;;  %v1939_v21 = vor.u32 %v2482_v4, %v1936_v5  ;;  %v2476_v55 = vld [vmem:[#allocation6 + $0x1c4] sm:$0xf]  ;;  %v1904_v5 = vld [vmem:[#allocation6 + $0x1b8] sm:$0xf0] }
  0x68   :  { %1222 = vmatpush.bf16.msra.mxu1 %v2295_v12  ;;  %v1691_v12 = vor.u32 %v2420_v60, %v1688_v61  ;;  %v2492_v59 = vld [vmem:[#allocation6 + $0x244] sm:$0xf]  ;;  %v1976_v60 = vld [vmem:[#allocation6 + $0x248] sm:$0xf0]  ;;  %v1888_v33 = vld [vmem:[#allocation6 + $0x198] sm:$0xf0] }
  0x69   :  { %1236 = vmatpush.bf16.msra.mxu2 %v1723_v13  ;;  %v2064_v13 = vld [vmem:[#allocation6 + $0x2f8] sm:$0xf0]  ;;  %v2508_v61 = vld [vmem:[#allocation6 + $0x2c4] sm:$0xf]  ;;  %v1979_v0 = vor.u32 %v2492_v59, %v1976_v60  ;;  %v2562_v60 = vld [vmem:[#allocation6 + $0x474] sm:$0xf] }
  0x6a   :  { %1250 = vmatpush.bf16.msra.mxu3 %v1787_v18  ;;  %v1875_v18 = vor.u32 %v2466_v2, %v1872_v3  ;;  %v1840_v2 = vld [vmem:[#allocation6 + $0x138] sm:$0xf0]  ;;  %v2474_v3 = vld [vmem:[#allocation6 + $0x1b4] sm:$0xf]  ;;  %v2488_v20 = vld [vmem:[#allocation6 + $0x224] sm:$0xf] }
  0x6b   :  { %1209 = vmatpush.bf16.msra.mxu0 %v2223_v24  ;;  %v1864_v24 = vld [vmem:[#allocation6 + $0x168] sm:$0xf0]  ;;  %v2192_v59 = vld [vmem:[#allocation6 + $0x3f8] sm:$0xf0] }
  0x6c   :  { %1223 = vmatpush.bf16.msra.mxu1 %v2287_v25  ;;  %v2480_v25 = vld [vmem:[#allocation6 + $0x1e4] sm:$0xf]  ;;  %v1867_v34 = vor.u32 %v2464_v23, %v1864_v24  ;;  %v2024_v23 = vld [vmem:[#allocation6 + $0x2a8] sm:$0xf0]  ;;  %v1835_v24 = vor.u32 %v2456_v14, %v1832_v15 }
  0x6d   :  { %1237 = vmatpush.bf16.msra.mxu2 %v1715_v26  ;;  %v2067_v26 = vor.u32 %v2514_v9, %v2064_v13  ;;  %v1931_v35 = vor.u32 %v2480_v25, %v1928_v28  ;;  %v2032_v9 = vld [vmem:[#allocation6 + $0x2b8] sm:$0xf0]  ;;  %v2454_v28 = vld [vmem:[#allocation6 + $0x114] sm:$0xf]  ;;  %v2312_v14 = vld [vmem:[#allocation6 + $0x4e8] sm:$0xf0] }
  0x6e   :  { %1251 = vmatpush.bf16.msra.mxu3 %v1779_v30  ;;  %v1992_v30 = vld [vmem:[#allocation6 + $0x268] sm:$0xf0] }
  0x6f   :  { %1210 = vmatpush.bf16.msra.mxu0 %v2215_v36  ;;  %v1995_v36 = vor.u32 %v2496_v29, %v1992_v30  ;;  %v1824_v29 = vld [vmem:[#allocation6 + $0x118] sm:$0xf0]  ;;  %v2470_v30 = vld [vmem:[#allocation6 + $0x194] sm:$0xf] }
  0x70   :  { %1224 = vmatpush.bf16.msra.mxu1 %v2279_v37  ;;  %v2462_v37 = vld [vmem:[#allocation6 + $0x154] sm:$0xf] }
  0x71   :  { %1238 = vmatpush.bf16.msra.mxu2 %v1707_v38  ;;  %v1856_v38 = vld [vmem:[#allocation6 + $0x158] sm:$0xf0] }
  0x72   :  { %1252 = vmatpush.bf16.msra.mxu3 %v1771_v45  ;;  %v2494_v45 = vld [vmem:[#allocation6 + $0x254] sm:$0xf]  ;;  %v1859_v50 = vor.u32 %v2462_v37, %v1856_v38  ;;  %v2016_v37 = vld [vmem:[#allocation6 + $0x298] sm:$0xf0]  ;;  %v1827_v38 = vor.u32 %v2454_v28, %v1824_v29 }
  0x73   :  { %1211 = vmatpush.bf16.msra.mxu0 %v2207_v52  ;;  %v1923_v52 = vor.u32 %v2478_v40, %v1920_v42  ;;  %v1987_v53 = vor.u32 %v2494_v45, %v1984_v46  ;;  %v2452_v40 = vld [vmem:[#allocation6 + $0x104] sm:$0xf]  ;;  %v1891_v42 = vor.u32 %v2470_v30, %v1888_v33  ;;  %v2304_v28 = vld [vmem:[#allocation6 + $0x4d8] sm:$0xf0] }
  0x74   :  { %1225 = vmatpush.bf16.msra.mxu1 %v2271_v56  ;;  %v1912_v56 = vld [vmem:[#allocation6 + $0x1c8] sm:$0xf0]  ;;  %v2468_v46 = vld [vmem:[#allocation6 + $0x184] sm:$0xf] }
  0x75   :  { %1239 = vmatpush.bf16.msra.mxu2 %v1699_v57  ;;  %v2051_v57 = vor.u32 %v2510_v48, %v2048_v49  ;;  %v1915_v63 = vor.u32 %v2476_v55, %v1912_v56  ;;  %v1880_v48 = vld [vmem:[#allocation6 + $0x188] sm:$0xf0]  ;;  %v2484_v49 = vld [vmem:[#allocation6 + $0x204] sm:$0xf]  ;;  %v2128_v55 = vld [vmem:[#allocation6 + $0x378] sm:$0xf0] }
  0x76   :  { %1253 = vmatpush.bf16.msra.mxu3 %v1763_v62  ;;  %v2040_v62 = vld [vmem:[#allocation6 + $0x2c8] sm:$0xf0]  ;;  %v2546_v56 = vld [vmem:[#allocation6 + $0x3f4] sm:$0xf]  ;;  %v2524_v33 = vld [vmem:[#allocation6 + $0x344] sm:$0xf] }
  0x77   :  { %1212 = vmatpush.bf16.msra.mxu0 %v2199_v6  ;;  %v2043_v4 = vor.u32 %v2508_v61, %v2040_v62  ;;  %v2490_v6 = vld [vmem:[#allocation6 + $0x234] sm:$0xf]  ;;  %v2256_v61 = vld [vmem:[#allocation6 + $0x478] sm:$0xf0]  ;;  %v1883_v62 = vor.u32 %v2468_v46, %v1880_v48 }
  0x78   :  { %1226 = vmatpush.bf16.msra.mxu1 %v2263_v11  ;;  %v1971_v13 = vor.u32 %v2490_v6, %v1968_v7  ;;  %v2120_v6 = vld [vmem:[#allocation6 + $0x368] sm:$0xf0]  ;;  %v2544_v7 = vld [vmem:[#allocation6 + $0x3e4] sm:$0xf]  ;;  %v2538_v46 = vld [vmem:[#allocation6 + $0x3b4] sm:$0xf] }
  0x79   :  { %1240 = vmatpush.bf16.msra.mxu2 %v1691_v12  ;;  %v1907_v12 = vor.u32 %v2474_v3, %v1904_v5  ;;  %v2195_v3 = vor.u32 %v2546_v56, %v2192_v59  ;;  %v2528_v5 = vld [vmem:[#allocation6 + $0x364] sm:$0xf]  ;;  %v2088_v59 = vld [vmem:[#allocation6 + $0x328] sm:$0xf0] }
  0x7a   :  { %1254 = vmatpush.bf16.msra.mxu3 %v1755_v16  ;;  %1213 = vmatmul.bf16.vlgmr.msra.gmra.mxu0 %v2864_v27  ;;  %v2472_v16 = vld [vmem:[#allocation6 + $0x1a4] sm:$0xf]  ;;  %v2123_v15 = vor.u32 %v2528_v5, %v2120_v6  ;;  %v2518_v5 = vld [vmem:[#allocation6 + $0x314] sm:$0xf]  ;;  %v2080_v6 = vld [vmem:[#allocation6 + $0x318] sm:$0xf0] }
  0x7b   :  { %1261 = vmatpush.bf16.msrb.mxu0 %v1875_v18  ;;  %1227 = vmatmul.bf16.vlgmr.msra.gmra.mxu1 %v2866_v31  ;;  %v2035_v18 = vor.u32 %v2506_v8, %v2032_v9  ;;  %v1899_v25 = vor.u32 %v2472_v16, %v1896_v19  ;;  %v2184_v9 = vld [vmem:[#allocation6 + $0x3e8] sm:$0xf0]  ;;  %v2526_v19 = vld [vmem:[#allocation6 + $0x354] sm:$0xf] }
  0x7c   :  { %1275 = vmatpush.bf16.msrb.mxu1 %v1939_v21  ;;  %1241 = vmatmul.bf16.vlgmr.msra.gmra.mxu2 %v2840_v58  ;;  %v1851_v58 = vor.u32 %v2460_v51, %v1848_v54  ;;  %v1960_v21 = vld [vmem:[#allocation6 + $0x228] sm:$0xf0]  ;;  %v2530_v54 = vld [vmem:[#allocation6 + $0x374] sm:$0xf]  ;;  %v2187_v16 = vor.u32 %v2544_v7, %v2184_v9  ;;  %v2144_v9 = vld [vmem:[#allocation6 + $0x398] sm:$0xf0] }
  0x7d   :  { %1289 = vmatpush.bf16.msrb.mxu2 %v2003_v22  ;;  %1255 = vmatmul.bf16.vlgmr.msra.gmra.mxu3 %v2846_v10  ;;  %v2458_v10 = vld [vmem:[#allocation6 + $0x134] sm:$0xf]  ;;  %v2504_v22 = vld [vmem:[#allocation6 + $0x2a4] sm:$0xf]  ;;  %v1944_v51 = vld [vmem:[#allocation6 + $0x208] sm:$0xf0] }
  0x7e   :  { %1303 = vmatpush.bf16.msrb.mxu3 %v2067_v26  ;;  %v1843_v11 = vor.u32 %v2458_v10, %v1840_v2  ;;  %v1963_v26 = vor.u32 %v2488_v20, %v1960_v21  ;;  %v2027_v32 = vor.u32 %v2504_v22, %v2024_v23  ;;  %v2131_v2 = vor.u32 %v2530_v54, %v2128_v55  ;;  %v2112_v20 = vld [vmem:[#allocation6 + $0x358] sm:$0xf0]  ;;  %v2542_v21 = vld [vmem:[#allocation6 + $0x3d4] sm:$0xf] }
  0x7f   :  { %1262 = vmatpush.bf16.msrb.mxu0 %v1867_v34  ;;  %v2486_v34 = vld [vmem:[#allocation6 + $0x214] sm:$0xf]  ;;  %v2176_v23 = vld [vmem:[#allocation6 + $0x3d8] sm:$0xf0]  ;;  %v2115_v29 = vor.u32 %v2526_v19, %v2112_v20  ;;  %v2516_v19 = vld [vmem:[#allocation6 + $0x304] sm:$0xf] }
  0x80   :  { %1276 = vmatpush.bf16.msrb.mxu1 %v1931_v35  ;;  %v1952_v35 = vld [vmem:[#allocation6 + $0x218] sm:$0xf0]  ;;  %v2179_v30 = vor.u32 %v2542_v21, %v2176_v23  ;;  %v2534_v7 = vld [vmem:[#allocation6 + $0x394] sm:$0xf]  ;;  %v2072_v20 = vld [vmem:[#allocation6 + $0x308] sm:$0xf0] }
  0x81   :  { %1290 = vmatpush.bf16.msrb.mxu2 %v1995_v36  ;;  %v2502_v36 = vld [vmem:[#allocation6 + $0x294] sm:$0xf]  ;;  %v1955_v45 = vor.u32 %v2486_v34, %v1952_v35  ;;  %v2540_v34 = vld [vmem:[#allocation6 + $0x3c4] sm:$0xf]  ;;  %v2136_v23 = vld [vmem:[#allocation6 + $0x388] sm:$0xf0] }
  0x82   :  { %1304 = vmatpush.bf16.msrb.mxu3 %v2059_v41  ;;  %v1816_v41 = vld [vmem:[#allocation6 + $0x108] sm:$0xf0]  ;;  %v2532_v21 = vld [vmem:[#allocation6 + $0x384] sm:$0xf] }
  0x83   :  { %1263 = vmatpush.bf16.msrb.mxu0 %v1859_v50  ;;  %v2019_v50 = vor.u32 %v2502_v36, %v2016_v37  ;;  %v2168_v36 = vld [vmem:[#allocation6 + $0x3c8] sm:$0xf0]  ;;  %v2556_v37 = vld [vmem:[#allocation6 + $0x444] sm:$0xf] }
  0x84   :  { %1277 = vmatpush.bf16.msrb.mxu1 %v1923_v52  ;;  %v2500_v52 = vld [vmem:[#allocation6 + $0x284] sm:$0xf] }
  0x85   :  { %1291 = vmatpush.bf16.msrb.mxu2 %v1987_v53  ;;  %v2008_v53 = vld [vmem:[#allocation6 + $0x288] sm:$0xf0] }
  0x86   :  { %1305 = vmatpush.bf16.msrb.mxu3 %v2051_v57  ;;  %v1819_v57 = vor.u32 %v2452_v40, %v1816_v41  ;;  %v2011_v10 = vor.u32 %v2500_v52, %v2008_v53  ;;  %v2570_v52 = vld [vmem:[#allocation6 + $0x4b4] sm:$0xf]  ;;  %v2288_v53 = vld [vmem:[#allocation6 + $0x4b8] sm:$0xf0] }
  0x87   :  { %1264 = vmatpush.bf16.msrb.mxu0 %v1851_v58  ;;  %v1947_v58 = vor.u32 %v2484_v49, %v1944_v51  ;;  %v2160_v49 = vld [vmem:[#allocation6 + $0x3b8] sm:$0xf0] }
  0x88   :  { %1278 = vmatpush.bf16.msrb.mxu1 %v1915_v63  ;;  %v2578_v63 = vld [vmem:[#allocation6 + $0x4f4] sm:$0xf]  ;;  %v2224_v51 = vld [vmem:[#allocation6 + $0x438] sm:$0xf0]  ;;  %v2163_v55 = vor.u32 %v2538_v46, %v2160_v49 }
  0x89   :  { %1292 = vmatpush.bf16.msrb.mxu2 %v1979_v0  ;;  %v2320_v0 = vld [vmem:[#allocation6 + $0x4f8] sm:$0xf0] }
  0x8a   :  { %1306 = vmatpush.bf16.msrb.mxu3 %v2043_v4  ;;  %v2259_v4 = vor.u32 %v2562_v60, %v2256_v61  ;;  %v2323_v8 = vor.u32 %v2578_v63, %v2320_v0  ;;  %v2536_v60 = vld [vmem:[#allocation6 + $0x3a4] sm:$0xf]  ;;  %v2291_v61 = vor.u32 %v2570_v52, %v2288_v53  ;;  %v2216_v63 = vld [vmem:[#allocation6 + $0x428] sm:$0xf0] }
  0x8b   :  { %1265 = vmatpush.bf16.msrb.mxu0 %v1843_v11  ;;  %v2560_v11 = vld [vmem:[#allocation6 + $0x464] sm:$0xf] }
  0x8c   :  { %1279 = vmatpush.bf16.msrb.mxu1 %v1907_v12  ;;  %v2248_v12 = vld [vmem:[#allocation6 + $0x468] sm:$0xf0]  ;;  %v2568_v0 = vld [vmem:[#allocation6 + $0x4a4] sm:$0xf] }
  0x8d   :  { %1293 = vmatpush.bf16.msrb.mxu2 %v1971_v13  ;;  %v2576_v13 = vld [vmem:[#allocation6 + $0x4e4] sm:$0xf] }
  0x8e   :  { %1307 = vmatpush.bf16.msrb.mxu3 %v2035_v18  ;;  %v2251_v18 = vor.u32 %v2560_v11, %v2248_v12  ;;  %v2315_v22 = vor.u32 %v2576_v13, %v2312_v14  ;;  %v2550_v11 = vld [vmem:[#allocation6 + $0x414] sm:$0xf]  ;;  %v2208_v12 = vld [vmem:[#allocation6 + $0x418] sm:$0xf0] }
  0x8f   :  { %1266 = vmatpush.bf16.msrb.mxu0 %v1835_v24  ;;  %v2558_v24 = vld [vmem:[#allocation6 + $0x454] sm:$0xf]  ;;  %v2272_v14 = vld [vmem:[#allocation6 + $0x498] sm:$0xf0] }
  0x90   :  { %1280 = vmatpush.bf16.msrb.mxu1 %v1899_v25  ;;  %v2240_v25 = vld [vmem:[#allocation6 + $0x458] sm:$0xf0]  ;;  %v2566_v13 = vld [vmem:[#allocation6 + $0x494] sm:$0xf] }
  0x91   :  { %1294 = vmatpush.bf16.msrb.mxu2 %v1963_v26  ;;  %v2574_v26 = vld [vmem:[#allocation6 + $0x4d4] sm:$0xf] }
  0x92   :  { %1308 = vmatpush.bf16.msrb.mxu3 %v2027_v32  ;;  %v2243_v32 = vor.u32 %v2558_v24, %v2240_v25  ;;  %v2307_v35 = vor.u32 %v2574_v26, %v2304_v28  ;;  %v2548_v24 = vld [vmem:[#allocation6 + $0x404] sm:$0xf]  ;;  %v2200_v25 = vld [vmem:[#allocation6 + $0x408] sm:$0xf0] }
  0x93   :  { %1267 = vmatpush.bf16.msrb.mxu0 %v1827_v38  ;;  %v2572_v38 = vld [vmem:[#allocation6 + $0x4c4] sm:$0xf]  ;;  %v2264_v28 = vld [vmem:[#allocation6 + $0x488] sm:$0xf0] }
  0x94   :  { %1281 = vmatpush.bf16.msrb.mxu1 %v1891_v42  ;;  %v2522_v42 = vld [vmem:[#allocation6 + $0x334] sm:$0xf]  ;;  %v2564_v26 = vld [vmem:[#allocation6 + $0x484] sm:$0xf] }
  0x95   :  { %1295 = vmatpush.bf16.msrb.mxu2 %v1955_v45  ;;  %v2096_v45 = vld [vmem:[#allocation6 + $0x338] sm:$0xf0] }
  0x96   :  { %1309 = vmatpush.bf16.msrb.mxu3 %v2019_v50  ;;  %v2554_v50 = vld [vmem:[#allocation6 + $0x434] sm:$0xf]  ;;  %v2099_v54 = vor.u32 %v2522_v42, %v2096_v45  ;;  %v2581_v42 = vld [vmem:[#allocation9 + $0x8] sm:$0xff] }
  0x97   :  { %1268 = vmatpush.bf16.msrb.mxu0 %v1819_v57  ;;  %v2227_v56 = vor.u32 %v2554_v50, %v2224_v51  ;;  %v2520_v57 = vld [vmem:[#allocation6 + $0x324] sm:$0xf] }
  0x98   :  { %1282 = vmatpush.bf16.msrb.mxu1 %v1883_v62  ;;  %v2152_v62 = vld [vmem:[#allocation6 + $0x3a8] sm:$0xf0]  ;;  %v2580_v50 = vld [vmem:[#allocation9] sm:$0xff] }
  0x99   :  { %1296 = vmatpush.bf16.msrb.mxu2 %v1947_v58  ;;  %v2552_v58 = vld [vmem:[#allocation6 + $0x424] sm:$0xf] }
  0x9a   :  { %1310 = vmatpush.bf16.msrb.mxu3 %v2011_v10  ;;  %1269 = vmatmul.bf16.vlgmr.msrb.gmra.mxu0 %v2842_v1  ;;  %v2104_v1 = vld [vmem:[#allocation6 + $0x348] sm:$0xf0] }
  0x9b   :  { %1317 = vmatpush.bf16.msra.mxu0 %v2131_v2  ;;  %1283 = vmatmul.bf16.vlgmr.msrb.gmra.mxu1 %v2848_v17  ;;  %v2296_v17 = vld [vmem:[#allocation6 + $0x4c8] sm:$0xf0]  ;;  %v2107_v40 = vor.u32 %v2524_v33, %v2104_v1  ;;  %v2091_v2 = vor.u32 %v2520_v57, %v2088_v59  ;;  %v2267_v33 = vor.u32 %v2564_v26, %v2264_v28  ;;  %v2587_v1 = vld [vmem:[#allocation9 + $0x38] sm:$0xff]  ;;  %v2592_v26 = vld [vmem:[#allocation9 + $0x60] sm:$0xff] }
  0x9c   :  { %1331 = vmatpush.bf16.msra.mxu1 %v2195_v3  ;;  %1297 = vmatmul.bf16.vlgmr.msrb.gmra.mxu2 %v2852_v39  ;;  %v2232_v39 = vld [vmem:[#allocation6 + $0x448] sm:$0xf0]  ;;  %v2299_v48 = vor.u32 %v2572_v38, %v2296_v17  ;;  %v2155_v3 = vor.u32 %v2536_v60, %v2152_v62  ;;  %v2591_v28 = vld [vmem:[#allocation9 + $0x58] sm:$0xff] }
  0x9d   :  { %1345 = vmatpush.bf16.msra.mxu2 %v2259_v4  ;;  %1311 = vmatmul.bf16.vlgmr.msrb.gmra.mxu3 %v2856_v44  ;;  %v2171_v44 = vor.u32 %v2540_v34, %v2168_v36  ;;  %v2235_v41 = vor.u32 %v2556_v37, %v2232_v39  ;;  %v2280_v10 = vld [vmem:[#allocation6 + $0x4a8] sm:$0xf0]  ;;  %v2219_v4 = vor.u32 %v2552_v58, %v2216_v63  ;;  %v2586_v34 = vld [vmem:[#allocation9 + $0x30] sm:$0xff]  ;;  %v2584_v39 = vld [vmem:[#allocation9 + $0x20] sm:$0xff] }
  0x9e   :  { %1359 = vmatpush.bf16.msra.mxu3 %v2323_v8  ;;  %v2283_v8 = vor.u32 %v2568_v0, %v2280_v10  ;;  %v2585_v36 = vld [vmem:[#allocation9 + $0x28] sm:$0xff] }
  0x9f   :  { %1318 = vmatpush.bf16.msra.mxu0 %v2123_v15  ;;  %v2083_v15 = vor.u32 %v2518_v5, %v2080_v6  ;;  %v2880_v6 = vld [vmem:[#allocation8] sm:$0x3] }
  0xa0   :  { %1332 = vmatpush.bf16.msra.mxu1 %v2187_v16  ;;  %v2147_v16 = vor.u32 %v2534_v7, %v2144_v9  ;;  %v1402_v9 = vperm.slane %v2880_v6, 0 }
  0xa1   :  { %1346 = vmatpush.bf16.msra.mxu2 %v2251_v18  ;;  %v2211_v18 = vor.u32 %v2550_v11, %v2208_v12 }
  0xa2   :  { %1360 = vmatpush.bf16.msra.mxu3 %v2315_v22  ;;  %v2275_v22 = vor.u32 %v2566_v13, %v2272_v14 }
  0xa3   :  { %1319 = vmatpush.bf16.msra.mxu0 %v2115_v29  ;;  %v2075_v29 = vor.u32 %v2516_v19, %v2072_v20  ;;  %v2595_v20 = vld [vmem:[#allocation9 + $0x78] sm:$0xff] }
  0xa4   :  { %1333 = vmatpush.bf16.msra.mxu1 %v2179_v30  ;;  %v2139_v30 = vor.u32 %v2532_v21, %v2136_v23 }
  0xa5   :  { %1347 = vmatpush.bf16.msra.mxu2 %v2243_v32  ;;  %v2203_v32 = vor.u32 %v2548_v24, %v2200_v25  ;;  %v2593_v25 = vld [vmem:[#allocation9 + $0x68] sm:$0xff] }
  0xa6   :  { %1361 = vmatpush.bf16.msra.mxu3 %v2307_v35 }
  0xa7   :  { %1320 = vmatpush.bf16.msra.mxu0 %v2107_v40 }
  0xa8   :  { %1334 = vmatpush.bf16.msra.mxu1 %v2171_v44 }
  0xa9   :  { %1348 = vmatpush.bf16.msra.mxu2 %v2235_v41 }
  0xaa   :  { %1362 = vmatpush.bf16.msra.mxu3 %v2299_v48 }
  0xab   :  { %1321 = vmatpush.bf16.msra.mxu0 %v2099_v54 }
  0xac   :  { %1335 = vmatpush.bf16.msra.mxu1 %v2163_v55 }
  0xad   :  { %1349 = vmatpush.bf16.msra.mxu2 %v2227_v56 }
  0xae   :  { %1363 = vmatpush.bf16.msra.mxu3 %v2291_v61 }
  0xaf   :  { %1322 = vmatpush.bf16.msra.mxu0 %v2091_v2 }
  0xb0   :  { %1336 = vmatpush.bf16.msra.mxu1 %v2155_v3 }
  0xb1   :  { %1350 = vmatpush.bf16.msra.mxu2 %v2219_v4 }
  0xb2   :  { %1364 = vmatpush.bf16.msra.mxu3 %v2283_v8 }
  0xb3   :  { %1323 = vmatpush.bf16.msra.mxu0 %v2083_v15 }
  0xb4   :  { %1337 = vmatpush.bf16.msra.mxu1 %v2147_v16 }
  0xb5   :  { %1351 = vmatpush.bf16.msra.mxu2 %v2211_v18 }
  0xb6   :  { %1365 = vmatpush.bf16.msra.mxu3 %v2275_v22  ;;  %v2594_v22 = vld [vmem:[#allocation9 + $0x70] sm:$0xff] }
  0xb7   :  { %1324 = vmatpush.bf16.msra.mxu0 %v2075_v29  ;;  %v1102_v35 = vpop.f32.mrf.mxu0 }
  0xb8   :  { %1338 = vmatpush.bf16.msra.mxu1 %v2139_v30  ;;  %v1116_v37 = vpop.f32.mrf.mxu1 }
  0xb9   :  { %1352 = vmatpush.bf16.msra.mxu2 %v2203_v32 }
  0xba   :  { %1366 = vmatpush.bf16.msra.mxu3 %v2267_v33  ;;  %1325 = vmatmul.bf16.vlgmr.msra.gmra.mxu0 %v2854_v43  ;;  %v2583_v43 = vld [vmem:[#allocation9 + $0x18] sm:$0xff]  ;;  %v2590_v33 = vld [vmem:[#allocation9 + $0x50] sm:$0xff] }
  0xbb   :  { %1339 = vmatmul.bf16.vlgmr.msra.gmra.mxu1 %v2858_v47  ;;  %1548 = vmatpush.bf16.msrb.mxu0 %v2587_v1  ;;  %v1117_v47 = vadd.f32 %v1116_v37, %v1102_v35  ;;  %v2589_v35 = vld [vmem:[#allocation9 + $0x48] sm:$0xff] }
  0xbc   :  { %1353 = vmatmul.bf16.vlgmr.msra.gmra.mxu2 %v2864_v27  ;;  %v2582_v27 = vld [vmem:[#allocation9 + $0x10] sm:$0xff]  ;;  %1562 = vmatpush.bf16.msrb.mxu1 %v2595_v20 }
  0xbd   :  { %1367 = vmatmul.bf16.vlgmr.msra.gmra.mxu3 %v2866_v31 }
  0xbf   :  { %1549 = vmatpush.bf16.msrb.mxu0 %v2586_v34  ;;  %v1130_v38 = vpop.f32.mrf.mxu2  ;;  %v1104_v17 = vpop.f32.mrf.mxu0 }
  0xc0   :  { %v1118_v40 = vpop.f32.mrf.mxu1  ;;  %v1144_v44 = vpop.f32.mrf.mxu3  ;;  %v1131_v41 = vadd.f32 %v1130_v38, %v1117_v47  ;;  %1563 = vmatpush.bf16.msrb.mxu1 %v2594_v22  ;;  %v2588_v38 = vld [vmem:[#allocation9 + $0x40] sm:$0xff] }
  0xc1   :  { %v1119_v51 = vadd.f32 %v1118_v40, %v1104_v17 }
  0xc2   :  { %v1145_v49 = vadd.f32 %v1144_v44, %v1131_v41 }
  0xc3   :  { %1550 = vmatpush.bf16.msrb.mxu0 %v2585_v36 }
  0xc4   :  { %1564 = vmatpush.bf16.msrb.mxu1 %v2593_v25 }
  0xc7   :  { %1551 = vmatpush.bf16.msrb.mxu0 %v2584_v39  ;;  %v1132_v31 = vpop.f32.mrf.mxu2 }
  0xc8   :  { %v1146_v48 = vpop.f32.mrf.mxu3  ;;  %v1133_v54 = vadd.f32 %v1132_v31, %v1119_v51  ;;  %1565 = vmatpush.bf16.msrb.mxu1 %v2592_v26 }
  0xca   :  { %v1147_v60 = vadd.f32 %v1146_v48, %v1133_v54 }
  0xcb   :  { %1552 = vmatpush.bf16.msrb.mxu0 %v2583_v43 }
  0xcc   :  { %1566 = vmatpush.bf16.msrb.mxu1 %v2591_v28 }
  0xcf   :  { %1553 = vmatpush.bf16.msrb.mxu0 %v2582_v27 }
  0xd0   :  { %1567 = vmatpush.bf16.msrb.mxu1 %v2590_v33 }
  0xd3   :  { %1554 = vmatpush.bf16.msrb.mxu0 %v2581_v42 }
  0xd4   :  { %1568 = vmatpush.bf16.msrb.mxu1 %v2589_v35 }
  0xd7   :  { %v1158_v45 = vpop.f32.mrf.mxu0  ;;  %1555 = vmatpush.bf16.msrb.mxu0 %v2580_v50 }
  0xd8   :  { %v1172_v46 = vpop.f32.mrf.mxu1  ;;  %v1159_v52 = vadd.f32 %v1158_v45, %v1145_v49  ;;  %1569 = vmatpush.bf16.msrb.mxu1 %v2588_v38 }
  0xda   :  { %v1173_v56 = vadd.f32 %v1172_v46, %v1159_v52 }
  0xdf   :  { %v1186_v53 = vpop.f32.mrf.mxu2  ;;  %v1160_v55 = vpop.f32.mrf.mxu0 }
  0xe0   :  { %v1174_v57 = vpop.f32.mrf.mxu1  ;;  %v1200_v59 = vpop.f32.mrf.mxu3  ;;  %v1187_v61 = vadd.f32 %v1186_v53, %v1173_v56  ;;  %v1161_v62 = vadd.f32 %v1160_v55, %v1147_v60 }
  0xe2   :  { %v1201_v0 = vadd.f32 %v1200_v59, %v1187_v61  ;;  %v1175_v10 = vadd.f32 %v1174_v57, %v1161_v62  ;;  %v1403_v61 = vperm.slane %v2880_v6, 1  ;;  %v2599_v6 = vld [vmem:[#allocation11 + $0x18] sm:$0xff] }
  0xe7   :  { %v1188_v58 = vpop.f32.mrf.mxu2 }
  0xe8   :  { %v1189_v3 = vadd.f32 %v1188_v58, %v1175_v10  ;;  %v1202_v5 = vpop.f32.mrf.mxu3 }
  0xea   :  { %v1203_v7 = vadd.f32 %v1202_v5, %v1189_v3 }
  0xf7   :  { %v1214_v63 = vpop.f32.mrf.mxu0 }
  0xf8   :  { %v1228_v2 = vpop.f32.mrf.mxu1  ;;  %v1215_v4 = vadd.f32 %v1214_v63, %v1201_v0 }
  0xfa   :  { %v1229_v8 = vadd.f32 %v1228_v2, %v1215_v4 }
  0xfc   :  { %v1406_v14 = vadd.f32 %v1402_v9, %v1229_v8  ;;  %v2603_v8 = vld [vmem:[#allocation11 + $0x38] sm:$0xff] }
  0xfd   :  { %1647 = vmatpush.bf16.msrb.mxu2 %v2603_v8 }
  0xfe   :  { %v1410_v18 = vmax.f32 %v1406_v14, 0.0  ;;  %v2597_v14 = vld [vmem:[#allocation11 + $0x8] sm:$0xff] }
  0xff   :  { %v1216_v11 = vpop.f32.mrf.mxu0  ;;  %v1242_v23 = vpop.f32.mrf.mxu2 }
 0x100   :  { %v1217_v12 = vadd.f32 %v1216_v11, %v1203_v7  ;;  %v1230_v13 = vpop.f32.mrf.mxu1  ;;  %v1256_v24 = vpop.f32.mrf.mxu3  ;;  %v2601_v11 = vld [vmem:[#allocation11 + $0x28] sm:$0xff] }
 0x101   :  { %v1257_v34 = vadd.f32 %v1256_v24, %v1242_v23 }
 0x102   :  { %v1231_v15 = vadd.f32 %v1230_v13, %v1217_v12  ;;  %v2600_v12 = vld [vmem:[#allocation11 + $0x20] sm:$0xff]  ;;  %v2598_v13 = vld [vmem:[#allocation11 + $0x10] sm:$0xff] }
 0x104   :  { %v1408_v16 = vadd.f32 %v1402_v9, %v1231_v15  ;;  %v2602_v9 = vld [vmem:[#allocation11 + $0x30] sm:$0xff]  ;;  %v2596_v15 = vld [vmem:[#allocation11] sm:$0xff] }
 0x105   :  { %1648 = vmatpush.bf16.msrb.mxu2 %v2602_v9 }
 0x106   :  { %v1412_v19 = vmax.f32 %v1408_v16, 0.0 }
 0x107   :  { %v1244_v29 = vpop.f32.mrf.mxu2 }
 0x108   :  { %v1447_v21 = vpack.c.bf16 %v1412_v19, %v1410_v18  ;;  %v1258_v30 = vpop.f32.mrf.mxu3  ;;  %v2616_v19 = vld [vmem:[%s2900_s4] ss:$0 sm:$0xff] }
 0x109   :  { %v1259_v44 = vadd.f32 %v1258_v30, %v1244_v29  ;;  %1649 = vmatpush.bf16.msrb.mxu2 %v2601_v11  ;;  %v2617_v30 = vld [vmem:[%s2902_s6] ss:$0 sm:$0xff] }
 0x10a   :  { %1556 = vmatmul.bf16.vlgmr.msrb.gmra.mxu0 %v1447_v21 }
 0x10d   :  { %1650 = vmatpush.bf16.msrb.mxu2 %v2600_v12 }
 0x111   :  { %1651 = vmatpush.bf16.msrb.mxu2 %v2599_v6 }
 0x115   :  { %1652 = vmatpush.bf16.msrb.mxu2 %v2598_v13 }
 0x117   :  { %v1270_v32 = vpop.f32.mrf.mxu0 }
 0x118   :  { %v1284_v1 = vpop.f32.mrf.mxu1  ;;  %v1271_v37 = vadd.f32 %v1270_v32, %v1257_v34 }
 0x119   :  { %1653 = vmatpush.bf16.msrb.mxu2 %v2597_v14 }
 0x11a   :  { %v1285_v40 = vadd.f32 %v1284_v1, %v1271_v37 }
 0x11d   :  { %1654 = vmatpush.bf16.msrb.mxu2 %v2596_v15 }
 0x11f   :  { %v1298_v36 = vpop.f32.mrf.mxu2  ;;  %v1272_v17 = vpop.f32.mrf.mxu0 }
 0x120   :  { %v1312_v39 = vpop.f32.mrf.mxu3  ;;  %v1286_v43 = vpop.f32.mrf.mxu1  ;;  %v1299_v47 = vadd.f32 %v1298_v36, %v1285_v40  ;;  %v1273_v27 = vadd.f32 %v1272_v17, %v1259_v44 }
 0x122   :  { %v1313_v45 = vadd.f32 %v1312_v39, %v1299_v47  ;;  %v1287_v46 = vadd.f32 %v1286_v43, %v1273_v27 }
 0x127   :  { %v1300_v31 = vpop.f32.mrf.mxu2 }
 0x128   :  { %v1314_v41 = vpop.f32.mrf.mxu3  ;;  %v1301_v49 = vadd.f32 %v1300_v31, %v1287_v46 }
 0x12a   :  { %v1315_v52 = vadd.f32 %v1314_v41, %v1301_v49 }
 0x137   :  { %v1326_v42 = vpop.f32.mrf.mxu0 }
 0x138   :  { %v1340_v48 = vpop.f32.mrf.mxu1  ;;  %v1327_v50 = vadd.f32 %v1326_v42, %v1313_v45 }
 0x13a   :  { %v1341_v53 = vadd.f32 %v1340_v48, %v1327_v50 }
 0x13f   :  { %v1354_v51 = vpop.f32.mrf.mxu2  ;;  %v1328_v55 = vpop.f32.mrf.mxu0 }
 0x140   :  { %v1368_v54 = vpop.f32.mrf.mxu3  ;;  %v1355_v56 = vadd.f32 %v1354_v51, %v1341_v53  ;;  %v1329_v57 = vadd.f32 %v1328_v55, %v1315_v52  ;;  %v1342_v59 = vpop.f32.mrf.mxu1 }
 0x142   :  { %v1369_v60 = vadd.f32 %v1368_v54, %v1355_v56  ;;  %v1343_v62 = vadd.f32 %v1342_v59, %v1329_v57 }
 0x144   :  { %v1407_v10 = vadd.f32 %v1403_v61, %v1369_v60 }
 0x146   :  { %v1411_v4 = vmax.f32 %v1407_v10, 0.0 }
 0x147   :  { %v1356_v58 = vpop.f32.mrf.mxu2 }
 0x148   :  { %v1357_v63 = vadd.f32 %v1356_v58, %v1343_v62  ;;  %v1370_v0 = vpop.f32.mrf.mxu3 }
 0x14a   :  { %v1371_v2 = vadd.f32 %v1370_v0, %v1357_v63 }
 0x14c   :  { %v1409_v3 = vadd.f32 %v1403_v61, %v1371_v2 }
 0x14e   :  { %v1413_v5 = vmax.f32 %v1409_v3, 0.0 }
 0x150   :  { %v1448_v7 = vpack.c.bf16 %v1413_v5, %v1411_v4 }
 0x152   :  { %1570 = vmatmul.bf16.vlgmr.msrb.gmra.mxu1 %v1448_v7 }
 0x187   :  { %v1557_v16 = vpop.f32.mrf.mxu0 }
 0x188   :  { %v1558_v21 = vadd.f32 %v2616_v19, %v1557_v16 }
 0x18f   :  { %v1559_v20 = vpop.f32.mrf.mxu0 }
 0x190   :  { %v1560_v22 = vadd.f32 %v2616_v19, %v1559_v20 }
 0x1cf   :  { %v1571_v18 = vpop.f32.mrf.mxu1 }
 0x1d0   :  { %v1572_v23 = vadd.f32 %v1571_v18, %v1558_v21 }
 0x1d2   :  { %v1576_v26 = vmax.f32 %v1572_v23, 0.0 }
 0x1d7   :  { %v1573_v24 = vpop.f32.mrf.mxu1 }
 0x1d8   :  { %v1574_v25 = vadd.f32 %v1573_v24, %v1560_v22 }
 0x1da   :  { %v1577_v28 = vmax.f32 %v1574_v25, 0.0 }
 0x1dc   :  { %v1595_v29 = vpack.c.bf16 %v1577_v28, %v1576_v26 }
 0x1de   :  { %1655 = vmatmul.bf16.vlgmr.msrb.gmra.mxu2 %v1595_v29 }
 0x261   :  { %v1656_v32 = vpop.f32.mrf.mxu2 }
 0x262   :  { %v1657_v33 = vadd.f32 %v2617_v30, %v1656_v32 }
 0x264   :  { %1661 = vst [vmem:[#allocation12] sm:$0xff] %v1657_v33 }
 0x269   :  { %v1658_v1 = vpop.f32.mrf.mxu2 }
 0x26a   :  { %v1659_v34 = vadd.f32 %v2617_v30, %v1658_v1 }
 0x26c   :  { %1662 = vst [vmem:[#allocation12 + $0x8] sm:$0xff] %v1659_v34 }
 0x26d   :  { %1675 = dma.vmem_to_hbm [thread:$0]  %s1668_s11, 256, %s1670_s1, [#allocation5], %s2771_s9, %s2771_s9, %s2772_s10  }
 0x26e   :  { %2768 = dma.done.wait [#allocation5], 256  }
 0x26f   :  { %2769 = vsyncadd [#allocation5], 4294967040 }
 0x270   :  { %1680 = vsyncpa [#allocation4], 1 }
 0x271   :  { %1681 = vsyncpa [#allocation7], 1 }
 0x272   :  { %1682 = vsyncpa [#allocation10], 1 }
 0x273   :  { %1683 = vsyncpa [#allocation5], 1 }

</bundles_post_ra>
